<compile_context>
chip_gen: v6e
topology: v6e:2x2x1
jax: 0.10.0
libtpu: 0.0.40
codegen_flags: <defaults>
</compile_context>

<pallas_src>
import numpy as np
import jax
import jax.numpy as jnp
from jax.experimental import pallas as pl
from jax.experimental.pallas import tpu as pltpu

KSIZE = 5
PAD = 2
SEQ_LEN = 8  # input_size implied by fc1 = Linear(num_filters*8*2, 128) after two MaxPool1d(2)


def _make_kernel(d1, d2, d3, d4, dh):
    """Kernel closure over the static per-layer slab widths."""

    def kernel(x_ref, w1_ref, w2e_ref, w2o_ref, w3_ref, w4e_ref, w4o_ref,
               wf1_ref, vec_ref, o_ref):
        cdt = w1_ref.dtype

        def mm(a, w_ref):
            return jnp.dot(a, w_ref[...], preferred_element_type=jnp.float32)

        x = x_ref[...].astype(cdt)                                            # (TB, L)

        # conv1 + BN + relu (banded weight, BN scale pre-folded into w1 columns)
        a1 = jnp.maximum(mm(x, w1_ref) + vec_ref[0:1, 0:d1], 0.0).astype(cdt)  # (TB, d1)

        # conv2 + BN + relu + pool1 (even/odd-time banded weights; max == MaxPool1d(2))
        y2 = jnp.maximum(mm(a1, w2e_ref), mm(a1, w2o_ref))
        a2 = jnp.maximum(y2 + vec_ref[1:2, 0:d2], 0.0).astype(cdt)             # (TB, d2)

        # conv3 + BN + relu
        a3 = jnp.maximum(mm(a2, w3_ref) + vec_ref[2:3, 0:d3], 0.0).astype(cdt)  # (TB, d3)

        # conv4 + BN + relu + pool2
        y4 = jnp.maximum(mm(a3, w4e_ref), mm(a3, w4o_ref))
        a4 = jnp.maximum(y4 + vec_ref[3:4, 0:d4], 0.0).astype(cdt)             # (TB, d4)

        # fc1 + relu (Dropout(0.3) == identity in eval mode)
        f = jnp.maximum(mm(a4, wf1_ref) + vec_ref[4:5, 0:dh], 0.0)             # (TB, dh) f32

        # fc2: VPU multiply + lane-sum (no N=1 MXU matmul); lane-dense (1, TB) output block
        r = jnp.sum(f * vec_ref[5:6, 0:dh], axis=-1)                           # (TB,)
        o_ref[...] = r[None, :] + vec_ref[6:7, 0:1]

    return kernel


def _fold_bn(p, eps=1e-5):
    # relu(BN(conv(x)+b)) == relu(conv(x)*scale + shift)   (eval-mode BN, running stats)
    inv = 1.0 / jnp.sqrt(p["var"] + eps)
    scale = p["gamma"] * inv
    shift = (p["b"] - p["mean"]) * scale + p["beta"]
    return scale, shift


def _band_weight(w, scale, lin, out_times):
    """Block-banded conv weight in the (TB, time*channel) layout, BN scale folded in.

    w: (K, Cin, Cout).  Returns (lin*Cin, len(out_times)*Cout) with
      band[ti*Cin + ci, j*Cout + co] = w[ti - out_times[j] + PAD, ci, co] * scale[co]
    for valid taps; zero padding of the conv is baked in as zero rows.
    """
    w_np = np.asarray(w, np.float32) * np.asarray(scale, np.float32)[None, None, :]
    K, cin, cout = w_np.shape
    band = np.zeros((lin * cin, len(out_times) * cout), np.float32)
    for j, to in enumerate(out_times):
        for k in range(K):
            ti = to + k - PAD
            if 0 <= ti < lin:
                band[ti * cin:(ti + 1) * cin, j * cout:(j + 1) * cout] = w_np[k]
    return band


def cnn_regressor_forward(x, params, *, tb=None, matmul_dtype=jnp.bfloat16):
    B, L = x.shape
    assert L == SEQ_LEN
    tb = B if tb is None else min(tb, B)
    assert B % tb == 0 and (tb == B or tb % 128 == 0)
    cdt = matmul_dtype

    s1, t1 = _fold_bn(params["conv1"])
    s2, t2 = _fold_bn(params["conv2"])
    s3, t3 = _fold_bn(params["conv3"])
    s4, t4 = _fold_bn(params["conv4"])

    c1 = params["conv1"]["w"].shape[2]
    c2 = params["conv2"]["w"].shape[2]
    c3 = params["conv3"]["w"].shape[2]
    c4 = params["conv4"]["w"].shape[2]
    hid = params["fc1_w"].shape[2]
    L2, L4 = L // 2, L // 4

    # Banded conv weights (BN scale folded); pooled layers split into even/odd output times.
    w1 = _band_weight(params["conv1"]["w"], s1, L, range(L))              # (L,      L *C1)
    w2e = _band_weight(params["conv2"]["w"], s2, L, range(0, L, 2))        # (L *C1,  L2*C2)
    w2o = _band_weight(params["conv2"]["w"], s2, L, range(1, L, 2))
    w3 = _band_weight(params["conv3"]["w"], s3, L2, range(L2))            # (L2*C2,  L2*C3)
    w4e = _band_weight(params["conv4"]["w"], s4, L2, range(0, L2, 2))      # (L2*C3,  L4*C4)
    w4o = _band_weight(params["conv4"]["w"], s4, L2, range(1, L2, 2))
    wf1 = np.asarray(params["fc1_w"], np.float32).reshape(2 * c4, hid)     # row = t*C4 + c

    d1, d2, d3, d4, dh = L * c1, L2 * c2, L2 * c3, L4 * c4, hid

    # One lane-dense parameter slab for all shift vectors / fc params (single DMA).
    # Widths are multiples of 128 when num_filters % 16 == 0; otherwise they are simply padded.
    wpad = -(-max(d1, d2, d3, d4, dh) // 128) * 128
    vec = np.zeros((7, wpad), np.float32)
    vec[0, :d1] = np.tile(np.asarray(t1, np.float32), L)
    vec[1, :d2] = np.tile(np.asarray(t2, np.float32), L2)
    vec[2, :d3] = np.tile(np.asarray(t3, np.float32), L2)
    vec[3, :d4] = np.tile(np.asarray(t4, np.float32), L4)
    vec[4, :dh] = np.asarray(params["fc1_b"], np.float32)
    vec[5, :dh] = np.asarray(params["fc2_w"], np.float32).reshape(-1)
    vec[6, 0] = float(np.asarray(params["fc2_b"]).reshape(()))

    weights = [jnp.asarray(w, cdt) for w in (w1, w2e, w2o, w3, w4e, w4o, wf1)]
    vec_j = jnp.asarray(vec)

    in_specs = [pl.BlockSpec((tb, L), lambda i: (i, 0))]
    in_specs += [pl.BlockSpec(w.shape, lambda i: (0, 0)) for w in weights]
    in_specs += [pl.BlockSpec(vec_j.shape, lambda i: (0, 0))]

    grid_spec = pltpu.PrefetchScalarGridSpec(
        num_scalar_prefetch=0,
        grid=(B // tb,),
        in_specs=in_specs,
        out_specs=pl.BlockSpec((1, tb), lambda i: (0, i)),   # lane-dense output blocks
    )
    out = pl.pallas_call(
        _make_kernel(d1, d2, d3, d4, dh),
        out_shape=jax.ShapeDtypeStruct((1, B), jnp.float32),
        grid_spec=grid_spec,
        compiler_params=pltpu.CompilerParams(dimension_semantics=("parallel",)),
    )(x, *weights, vec_j)
    return out.reshape(B, 1)


def init_params(key, nf=16):
    ks = iter(jax.random.split(key, 32))

    def conv_block(cin, cout):
        return dict(
            w=jax.random.normal(next(ks), (KSIZE, cin, cout), jnp.float32) / np.sqrt(cin * KSIZE),
            b=0.1 * jax.random.normal(next(ks), (cout,), jnp.float32),
            gamma=1.0 + 0.2 * jax.random.normal(next(ks), (cout,), jnp.float32),
            beta=0.1 * jax.random.normal(next(ks), (cout,), jnp.float32),
            mean=0.1 * jax.random.normal(next(ks), (cout,), jnp.float32),
            var=jax.random.uniform(next(ks), (cout,), jnp.float32, 0.5, 1.5),
        )

    p = dict(
        conv1=conv_block(1, nf),
        conv2=conv_block(nf, 2 * nf),
        conv3=conv_block(2 * nf, 4 * nf),
        conv4=conv_block(4 * nf, 8 * nf),
    )
    c4 = 8 * nf
    # fc1 weight generated natively in (time, channel, hidden) layout; equivalent to PyTorch's
    # flatten(NCW)+Linear with the permutation absorbed into the weight.
    p["fc1_w"] = jax.random.normal(next(ks), (2, c4, 128), jnp.float32) / np.sqrt(2 * c4)
    p["fc1_b"] = 0.1 * jax.random.normal(next(ks), (128,), jnp.float32)
    p["fc2_w"] = jax.random.normal(next(ks), (128, 1), jnp.float32) / np.sqrt(128)
    p["fc2_b"] = 0.1 * jax.random.normal(next(ks), (1,), jnp.float32)
    return p


def reference_forward(x, params, eps=1e-5):
    # Pure-JAX reference in the PyTorch NCW layout (unfolded BN), for cross-checking.
    hi = jax.lax.Precision.HIGHEST

    def conv(a, p):                   # a: (B, Cin, L)
        K = p["w"].shape[0]
        L = a.shape[-1]
        ap = jnp.pad(a, ((0, 0), (0, 0), (PAD, PAD)))
        y = sum(jnp.einsum("bcl,cd->bdl", ap[:, :, k:k + L], p["w"][k], precision=hi)
                for k in range(K))
        return y + p["b"][None, :, None]

    def bn_relu(y, p):
        y = (y - p["mean"][None, :, None]) / jnp.sqrt(p["var"][None, :, None] + eps)
        y = y * p["gamma"][None, :, None] + p["beta"][None, :, None]
        return jnp.maximum(y, 0.0)

    def pool(a):
        B, C, L = a.shape
        return a.reshape(B, C, L // 2, 2).max(-1)

    a = x[:, None, :]
    a = bn_relu(conv(a, params["conv1"]), params["conv1"])
    a = bn_relu(conv(a, params["conv2"]), params["conv2"])
    a = pool(a)
    a = bn_relu(conv(a, params["conv3"]), params["conv3"])
    a = bn_relu(conv(a, params["conv4"]), params["conv4"])
    a = pool(a)                                       # (B, 8nf, 2)
    f = (jnp.dot(a[:, :, 0], params["fc1_w"][0], precision=hi)
         + jnp.dot(a[:, :, 1], params["fc1_w"][1], precision=hi)
         + params["fc1_b"][None, :])
    f = jnp.maximum(f, 0.0)
    return jnp.dot(f, params["fc2_w"], precision=hi) + params["fc2_b"][None, :]


if __name__ == "__main__":
    key = jax.random.PRNGKey(0)
    kx, kp = jax.random.split(key)
    B, nf = 256, 16
    x = jax.random.normal(kx, (B, SEQ_LEN), jnp.float32)
    params = init_params(kp, nf)

    ref = jax.block_until_ready(reference_forward(x, params))

    # f32 matmul path: tight numerical check.
    out_f32 = jax.block_until_ready(
        cnn_regressor_forward(x, params, matmul_dtype=jnp.float32))
    np.testing.assert_allclose(np.asarray(out_f32), np.asarray(ref), rtol=2e-3, atol=2e-3)

    # Default path: bf16 matmul operands / f32 accumulate, tb=B (grid of 1). Loose sanity check.
    out = jax.block_until_ready(cnn_regressor_forward(x, params))
    np.testing.assert_allclose(np.asarray(out), np.asarray(ref), rtol=0.3, atol=0.3)

    # Multi-step grid path (tb=128 -> grid=2, "parallel"): the option for v7x's two TensorCores.
    out_g2 = jax.block_until_ready(cnn_regressor_forward(x, params, tb=128))
    np.testing.assert_allclose(np.asarray(out_g2), np.asarray(ref), rtol=0.3, atol=0.3)

    print("KERNEL_OK")
</pallas_src>

<mosaic_0001>
module attributes {stable_mosaic.version = 11 : i64} {
  func.func @kernel(%arg0: i32, %arg1: memref<256x8xf32, #tpu.memory_space<vmem>>, %arg2: memref<8x128xf32, #tpu.memory_space<vmem>>, %arg3: memref<128x128xf32, #tpu.memory_space<vmem>>, %arg4: memref<128x128xf32, #tpu.memory_space<vmem>>, %arg5: memref<128x256xf32, #tpu.memory_space<vmem>>, %arg6: memref<256x256xf32, #tpu.memory_space<vmem>>, %arg7: memref<256x256xf32, #tpu.memory_space<vmem>>, %arg8: memref<256x128xf32, #tpu.memory_space<vmem>>, %arg9: memref<7x256xf32, #tpu.memory_space<vmem>>, %arg10: memref<1x256xf32, #tpu.memory_space<vmem>>) attributes {dimension_semantics = [#tpu.dimension_semantics<parallel>], iteration_bounds = array<i64: 1>, scalar_prefetch = 0 : i64, scratch_operands = 0 : i64, tpu.core_type = #tpu.core_type<tc>, window_params = [{transform_indices = @transform_0, window_bounds = array<i64: 256, 8>}, {pipeline_mode = #tpu.pipeline_mode<synchronous>, transform_indices = @transform_1, window_bounds = array<i64: 8, 128>}, {pipeline_mode = #tpu.pipeline_mode<synchronous>, transform_indices = @transform_2, window_bounds = array<i64: 128, 128>}, {pipeline_mode = #tpu.pipeline_mode<synchronous>, transform_indices = @transform_3, window_bounds = array<i64: 128, 128>}, {pipeline_mode = #tpu.pipeline_mode<synchronous>, transform_indices = @transform_4, window_bounds = array<i64: 128, 256>}, {pipeline_mode = #tpu.pipeline_mode<synchronous>, transform_indices = @transform_5, window_bounds = array<i64: 256, 256>}, {pipeline_mode = #tpu.pipeline_mode<synchronous>, transform_indices = @transform_6, window_bounds = array<i64: 256, 256>}, {pipeline_mode = #tpu.pipeline_mode<synchronous>, transform_indices = @transform_7, window_bounds = array<i64: 256, 128>}, {pipeline_mode = #tpu.pipeline_mode<synchronous>, transform_indices = @transform_8, window_bounds = array<i64: 7, 256>}, {transform_indices = @transform_9, window_bounds = array<i64: 1, 256>}]} {
    %c0 = arith.constant 0 : index
    %c0_0 = arith.constant 0 : index
    %0 = vector.load %arg1[%c0, %c0_0] : memref<256x8xf32, #tpu.memory_space<vmem>>, vector<256x8xf32>
    %c0_1 = arith.constant 0 : index
    %c0_2 = arith.constant 0 : index
    %1 = vector.load %arg2[%c0_1, %c0_2] : memref<8x128xf32, #tpu.memory_space<vmem>>, vector<8x128xf32>
    %cst = arith.constant dense<0.000000e+00> : vector<256x128xf32>
    %2 = tpu.matmul %0, %1, %cst {dimension_numbers = #tpu.dot_dimension_numbers<[1], [0], [0], [1], [0, 0, 1, 1], [], []>} : vector<256x8xf32>, vector<8x128xf32>, vector<256x128xf32> -> vector<256x128xf32>
    %c0_3 = arith.constant 0 : index
    %c0_4 = arith.constant 0 : index
    %3 = vector.load %arg9[%c0_3, %c0_4] : memref<7x256xf32, #tpu.memory_space<vmem>>, vector<1x128xf32>
    %4 = vector.broadcast %3 : vector<1x128xf32> to vector<256x128xf32>
    %5 = arith.addf %2, %4 : vector<256x128xf32>
    %cst_5 = arith.constant 0.000000e+00 : f32
    %6 = vector.broadcast %cst_5 : f32 to vector<256x128xf32>
    %7 = arith.maximumf %5, %6 : vector<256x128xf32>
    %c0_6 = arith.constant 0 : index
    %c0_7 = arith.constant 0 : index
    %8 = vector.load %arg3[%c0_6, %c0_7] : memref<128x128xf32, #tpu.memory_space<vmem>>, vector<128x128xf32>
    %cst_8 = arith.constant dense<0.000000e+00> : vector<256x128xf32>
    %9 = tpu.matmul %7, %8, %cst_8 {dimension_numbers = #tpu.dot_dimension_numbers<[1], [0], [0], [1], [0, 0, 1, 1], [], []>} : vector<256x128xf32>, vector<128x128xf32>, vector<256x128xf32> -> vector<256x128xf32>
    %c0_9 = arith.constant 0 : index
    %c0_10 = arith.constant 0 : index
    %10 = vector.load %arg4[%c0_9, %c0_10] : memref<128x128xf32, #tpu.memory_space<vmem>>, vector<128x128xf32>
    %cst_11 = arith.constant dense<0.000000e+00> : vector<256x128xf32>
    %11 = tpu.matmul %7, %10, %cst_11 {dimension_numbers = #tpu.dot_dimension_numbers<[1], [0], [0], [1], [0, 0, 1, 1], [], []>} : vector<256x128xf32>, vector<128x128xf32>, vector<256x128xf32> -> vector<256x128xf32>
    %12 = arith.maximumf %9, %11 : vector<256x128xf32>
    %c1 = arith.constant 1 : index
    %c0_12 = arith.constant 0 : index
    %13 = vector.load %arg9[%c1, %c0_12] : memref<7x256xf32, #tpu.memory_space<vmem>>, vector<1x128xf32>
    %14 = vector.broadcast %13 : vector<1x128xf32> to vector<256x128xf32>
    %15 = arith.addf %12, %14 : vector<256x128xf32>
    %cst_13 = arith.constant 0.000000e+00 : f32
    %16 = vector.broadcast %cst_13 : f32 to vector<256x128xf32>
    %17 = arith.maximumf %15, %16 : vector<256x128xf32>
    %c0_14 = arith.constant 0 : index
    %c0_15 = arith.constant 0 : index
    %18 = vector.load %arg5[%c0_14, %c0_15] : memref<128x256xf32, #tpu.memory_space<vmem>>, vector<128x256xf32>
    %cst_16 = arith.constant dense<0.000000e+00> : vector<256x256xf32>
    %19 = tpu.matmul %17, %18, %cst_16 {dimension_numbers = #tpu.dot_dimension_numbers<[1], [0], [0], [1], [0, 0, 1, 1], [], []>} : vector<256x128xf32>, vector<128x256xf32>, vector<256x256xf32> -> vector<256x256xf32>
    %c2 = arith.constant 2 : index
    %c0_17 = arith.constant 0 : index
    %20 = vector.load %arg9[%c2, %c0_17] : memref<7x256xf32, #tpu.memory_space<vmem>>, vector<1x256xf32>
    %21 = vector.broadcast %20 : vector<1x256xf32> to vector<256x256xf32>
    %22 = arith.addf %19, %21 : vector<256x256xf32>
    %cst_18 = arith.constant 0.000000e+00 : f32
    %23 = vector.broadcast %cst_18 : f32 to vector<256x256xf32>
    %24 = arith.maximumf %22, %23 : vector<256x256xf32>
    %c0_19 = arith.constant 0 : index
    %c0_20 = arith.constant 0 : index
    %25 = vector.load %arg6[%c0_19, %c0_20] : memref<256x256xf32, #tpu.memory_space<vmem>>, vector<256x256xf32>
    %cst_21 = arith.constant dense<0.000000e+00> : vector<256x256xf32>
    %26 = tpu.matmul %24, %25, %cst_21 {dimension_numbers = #tpu.dot_dimension_numbers<[1], [0], [0], [1], [0, 0, 1, 1], [], []>} : vector<256x256xf32>, vector<256x256xf32>, vector<256x256xf32> -> vector<256x256xf32>
    %c0_22 = arith.constant 0 : index
    %c0_23 = arith.constant 0 : index
    %27 = vector.load %arg7[%c0_22, %c0_23] : memref<256x256xf32, #tpu.memory_space<vmem>>, vector<256x256xf32>
    %cst_24 = arith.constant dense<0.000000e+00> : vector<256x256xf32>
    %28 = tpu.matmul %24, %27, %cst_24 {dimension_numbers = #tpu.dot_dimension_numbers<[1], [0], [0], [1], [0, 0, 1, 1], [], []>} : vector<256x256xf32>, vector<256x256xf32>, vector<256x256xf32> -> vector<256x256xf32>
    %29 = arith.maximumf %26, %28 : vector<256x256xf32>
    %c3 = arith.constant 3 : index
    %c0_25 = arith.constant 0 : index
    %30 = vector.load %arg9[%c3, %c0_25] : memref<7x256xf32, #tpu.memory_space<vmem>>, vector<1x256xf32>
    %31 = vector.broadcast %30 : vector<1x256xf32> to vector<256x256xf32>
    %32 = arith.addf %29, %31 : vector<256x256xf32>
    %cst_26 = arith.constant 0.000000e+00 : f32
    %33 = vector.broadcast %cst_26 : f32 to vector<256x256xf32>
    %34 = arith.maximumf %32, %33 : vector<256x256xf32>
    %c0_27 = arith.constant 0 : index
    %c0_28 = arith.constant 0 : index
    %35 = vector.load %arg8[%c0_27, %c0_28] : memref<256x128xf32, #tpu.memory_space<vmem>>, vector<256x128xf32>
    %cst_29 = arith.constant dense<0.000000e+00> : vector<256x128xf32>
    %36 = tpu.matmul %34, %35, %cst_29 {dimension_numbers = #tpu.dot_dimension_numbers<[1], [0], [0], [1], [0, 0, 1, 1], [], []>} : vector<256x256xf32>, vector<256x128xf32>, vector<256x128xf32> -> vector<256x128xf32>
    %c4 = arith.constant 4 : index
    %c0_30 = arith.constant 0 : index
    %37 = vector.load %arg9[%c4, %c0_30] : memref<7x256xf32, #tpu.memory_space<vmem>>, vector<1x128xf32>
    %38 = vector.broadcast %37 : vector<1x128xf32> to vector<256x128xf32>
    %39 = arith.addf %36, %38 : vector<256x128xf32>
    %cst_31 = arith.constant 0.000000e+00 : f32
    %40 = vector.broadcast %cst_31 : f32 to vector<256x128xf32>
    %41 = arith.maximumf %39, %40 : vector<256x128xf32>
    %c5 = arith.constant 5 : index
    %c0_32 = arith.constant 0 : index
    %42 = vector.load %arg9[%c5, %c0_32] : memref<7x256xf32, #tpu.memory_space<vmem>>, vector<1x128xf32>
    %43 = vector.broadcast %42 : vector<1x128xf32> to vector<256x128xf32>
    %44 = arith.mulf %41, %43 : vector<256x128xf32>
    %cst_33 = arith.constant dense<0.000000e+00> : vector<256xf32>
    %45 = vector.multi_reduction <add>, %44, %cst_33 [1] : vector<256x128xf32> to vector<256xf32>
    %46 = vector.shape_cast %45 : vector<256xf32> to vector<1x256xf32>
    %c6 = arith.constant 6 : index
    %c0_34 = arith.constant 0 : index
    %47 = vector.load %arg9[%c6, %c0_34] : memref<7x256xf32, #tpu.memory_space<vmem>>, vector<1x1xf32>
    %48 = vector.broadcast %47 : vector<1x1xf32> to vector<1x256xf32>
    %49 = arith.addf %46, %48 : vector<1x256xf32>
    %c0_35 = arith.constant 0 : index
    %c0_36 = arith.constant 0 : index
    %50 = vector.load %arg10[%c0_35, %c0_36] : memref<1x256xf32, #tpu.memory_space<vmem>>, vector<1x256xf32>
    tpu.vector_store %arg10[%c0_35, %c0_36], %49 {strides = array<i32>} : memref<1x256xf32, #tpu.memory_space<vmem>>, vector<1x256xf32>,
    return
  }
  func.func @transform_0(%arg0: i32) -> (i32, i32) {
    %c0_i32 = arith.constant 0 : i32
    %c0_i32_0 = arith.constant 0 : i32
    return %arg0, %c0_i32 : i32, i32
  }
  func.func @transform_1(%arg0: i32) -> (i32, i32) {
    %c0_i32 = arith.constant 0 : i32
    %c0_i32_0 = arith.constant 0 : i32
    %c0_i32_1 = arith.constant 0 : i32
    return %c0_i32, %c0_i32_0 : i32, i32
  }
  func.func @transform_2(%arg0: i32) -> (i32, i32) {
    %c0_i32 = arith.constant 0 : i32
    %c0_i32_0 = arith.constant 0 : i32
    %c0_i32_1 = arith.constant 0 : i32
    return %c0_i32, %c0_i32_0 : i32, i32
  }
  func.func @transform_3(%arg0: i32) -> (i32, i32) {
    %c0_i32 = arith.constant 0 : i32
    %c0_i32_0 = arith.constant 0 : i32
    %c0_i32_1 = arith.constant 0 : i32
    return %c0_i32, %c0_i32_0 : i32, i32
  }
  func.func @transform_4(%arg0: i32) -> (i32, i32) {
    %c0_i32 = arith.constant 0 : i32
    %c0_i32_0 = arith.constant 0 : i32
    %c0_i32_1 = arith.constant 0 : i32
    return %c0_i32, %c0_i32_0 : i32, i32
  }
  func.func @transform_5(%arg0: i32) -> (i32, i32) {
    %c0_i32 = arith.constant 0 : i32
    %c0_i32_0 = arith.constant 0 : i32
    %c0_i32_1 = arith.constant 0 : i32
    return %c0_i32, %c0_i32_0 : i32, i32
  }
  func.func @transform_6(%arg0: i32) -> (i32, i32) {
    %c0_i32 = arith.constant 0 : i32
    %c0_i32_0 = arith.constant 0 : i32
    %c0_i32_1 = arith.constant 0 : i32
    return %c0_i32, %c0_i32_0 : i32, i32
  }
  func.func @transform_7(%arg0: i32) -> (i32, i32) {
    %c0_i32 = arith.constant 0 : i32
    %c0_i32_0 = arith.constant 0 : i32
    %c0_i32_1 = arith.constant 0 : i32
    return %c0_i32, %c0_i32_0 : i32, i32
  }
  func.func @transform_8(%arg0: i32) -> (i32, i32) {
    %c0_i32 = arith.constant 0 : i32
    %c0_i32_0 = arith.constant 0 : i32
    %c0_i32_1 = arith.constant 0 : i32
    return %c0_i32, %c0_i32_0 : i32, i32
  }
  func.func @transform_9(%arg0: i32) -> (i32, i32) {
    %c0_i32 = arith.constant 0 : i32
    %c0_i32_0 = arith.constant 0 : i32
    return %c0_i32, %arg0 : i32, i32
  }
}

</mosaic_0001>

<bundles_post_ra>
// kernel: tpu_custom_call.1
= control target key start
LH: loop header
LB: loop body
LE: loop exit
PB: predicated region body
PF: predicated region fallthrough
CT: control target
= control target key end

     0   :  { %14 = vsyncpa [#allocation3], 0  ;;  %s7854_s0 = inlined_call_operand.vmem [shape: f32[256,8], index: 0, kind: input, shape index: {}]   ;;  %s7855_s1 = inlined_call_operand.hbm [shape: f32[8,128], index: 1, kind: input, shape index: {}]   ;;  %s7856_s2 = inlined_call_operand.hbm [shape: f32[128,128], index: 2, kind: input, shape index: {}]   ;;  %s7857_s3 = inlined_call_operand.hbm [shape: f32[128,128], index: 3, kind: input, shape index: {}]   ;;  %s7858_s4 = inlined_call_operand.vmem [shape: f32[128,256], index: 4, kind: input, shape index: {}]   ;;  %s7859_s5 = inlined_call_operand.hbm [shape: f32[256,256], index: 5, kind: input, shape index: {}]   ;;  %s7860_s6 = inlined_call_operand.hbm [shape: f32[256,256], index: 6, kind: input, shape index: {}]   ;;  %s7861_s7 = inlined_call_operand.hbm [shape: f32[256,128], index: 7, kind: input, shape index: {}]   ;;  %s7862_s8 = inlined_call_operand.vmem [shape: f32[7,256], index: 8, kind: input, shape index: {}]   ;;  %s7863_s9 = inlined_call_operand.hbm [shape: f32[1,256], index: 9, kind: output, shape index: {}]  }
   0x1   :  { %15 = vsyncpa [#allocation6], 0 }
   0x2   :  { %16 = vsyncpa [#allocation9], 0 }
   0x3   :  { %17 = vsyncpa [#allocation12], 0 }
   0x4   :  { %18 = vsyncpa [#allocation4], 0  ;;  %s6208_s30 = smov [#allocation5]  }
   0x5   :  { %s36_s10 = sshll.u32 %s6208_s30, 4  ;;  %s37_s10 = int_to_ptr.vmem [resolvable:$true] %s36_s10 }
   0x6   :  { %s6066_s11 = scalar_lea.vmem %s37_s10, 2048  ;;  %p6071_p1 = scmp.lt.s32.totalorder %s37_s10, %s37_s10 }
   0x7   :  { %p6067_p0 = scmp.ne.s32.totalorder %s37_s10, %s6066_s11  ;;  %p6072_p2 = scmp.lt.s32.totalorder %s6066_s11, %s6066_s11 }
   0x9   :  { %p6073_p3 = por %p6072_p2, %p6071_p1 }
   0xb   :  { %p6074_p4 = pnand %p6073_p3, %p6067_p0 }
   0xd   :  { %6077 = shalt.err (!%p6074_p4)
}
   0xe   :  { %s6209_s12 = smov 128   ;;  %s6210_s13 = smov 8  }
   0xf   :  { %42 = dma.hbm_to_vmem [thread:$0]  %s7856_s2, 2048, %s37_s10, [#allocation6], %s6209_s12, %s6209_s12, %s6210_s13  }
  0x10   :  { %s6211_s16 = smov [#allocation8]  }
  0x11   :  { %s62_s17 = sshll.u32 %s6211_s16, 4  ;;  %s63_s17 = int_to_ptr.vmem [resolvable:$true] %s62_s17 }
  0x12   :  { %s6086_s18 = scalar_lea.vmem %s63_s17, 8192  ;;  %p6091_p6 = scmp.lt.s32.totalorder %s63_s17, %s63_s17 }
  0x13   :  { %p6087_p5 = scmp.ne.s32.totalorder %s63_s17, %s6086_s18  ;;  %p6092_p7 = scmp.lt.s32.totalorder %s6086_s18, %s6086_s18 }
  0x15   :  { %p6093_p8 = por %p6092_p7, %p6091_p6 }
  0x17   :  { %p6094_p9 = pnand %p6093_p8, %p6087_p5 }
  0x19   :  { %6097 = shalt.err (!%p6094_p9)
}
  0x1a   :  { %s6212_s19 = smov 256   ;;  %s6213_s20 = smov 16  }
  0x1b   :  { %68 = dma.hbm_to_vmem [thread:$0]  %s7859_s5, 8192, %s63_s17, [#allocation9], %s6212_s19, %s6212_s19, %s6213_s20  }
  0x1c   :  { %s6214_s2 = smov [#allocation2]   ;;  %s6215_s24 = smov [#allocation7]  }
  0x1d   :  { %s27_s23 = sshll.u32 %s6214_s2, 4  ;;  %s48_s25 = sshll.u32 %s6215_s24, 4  ;;  %s28_s23 = int_to_ptr.vmem [resolvable:$true] %s27_s23  ;;  %s49_s25 = int_to_ptr.vmem [resolvable:$true] %s48_s25 }
  0x1e   :  { %s6106_s26 = scalar_lea.vmem %s28_s23, 128  ;;  %p6111_p11 = scmp.lt.s32.totalorder %s28_s23, %s28_s23 }
  0x1f   :  { %p6107_p10 = scmp.ne.s32.totalorder %s28_s23, %s6106_s26  ;;  %p6112_p12 = scmp.lt.s32.totalorder %s6106_s26, %s6106_s26 }
  0x21   :  { %p6113_p13 = por %p6112_p12, %p6111_p11 }
  0x23   :  { %p6114_p0 = pnand %p6113_p13, %p6107_p10 }
  0x25   :  { %6117 = shalt.err (!%p6114_p0)
}
  0x26   :  { %30 = dma.hbm_to_vmem [thread:$0]  %s7855_s1, 128, %s28_s23, [#allocation3]  }
  0x27   :  { %s6126_s29 = scalar_lea.vmem %s49_s25, 2048  ;;  %p6131_p2 = scmp.lt.s32.totalorder %s49_s25, %s49_s25 }
  0x28   :  { %p6127_p1 = scmp.ne.s32.totalorder %s49_s25, %s6126_s29  ;;  %p6132_p3 = scmp.lt.s32.totalorder %s6126_s29, %s6126_s29 }
  0x2a   :  { %p6133_p4 = por %p6132_p3, %p6131_p2 }
  0x2c   :  { %p6134_p5 = pnand %p6133_p4, %p6127_p1 }
  0x2e   :  { %6137 = shalt.err (!%p6134_p5)
}
  0x2f   :  { %54 = dma.hbm_to_vmem [thread:$0]  %s7857_s3, 2048, %s49_s25, [#allocation6], %s6209_s12, %s6209_s12, %s6210_s13  }
  0x30   :  { %s6216_s10 = smov [#allocation10]   ;;  %s6217_s14 = smov [#allocation11]  }
  0x31   :  { %s74_s11 = sshll.u32 %s6216_s10, 4  ;;  %s86_s15 = sshll.u32 %s6217_s14, 4  ;;  %s75_s11 = int_to_ptr.vmem [resolvable:$true] %s74_s11  ;;  %s87_s15 = int_to_ptr.vmem [resolvable:$true] %s86_s15 }
  0x32   :  { %s6146_s1 = scalar_lea.vmem %s75_s11, 8192  ;;  %p6151_p7 = scmp.lt.s32.totalorder %s75_s11, %s75_s11 }
  0x33   :  { %p6147_p6 = scmp.ne.s32.totalorder %s75_s11, %s6146_s1  ;;  %p6152_p8 = scmp.lt.s32.totalorder %s6146_s1, %s6146_s1 }
  0x35   :  { %p6153_p9 = por %p6152_p8, %p6151_p7 }
  0x37   :  { %p6154_p10 = pnand %p6153_p9, %p6147_p6 }
  0x39   :  { %6157 = shalt.err (!%p6154_p10)
}
  0x3a   :  { %80 = dma.hbm_to_vmem [thread:$0]  %s7860_s6, 8192, %s75_s11, [#allocation9], %s6212_s19, %s6212_s19, %s6213_s20  }
  0x3b   :  { %s6166_s3 = scalar_lea.vmem %s87_s15, 4096  ;;  %p6171_p12 = scmp.lt.s32.totalorder %s87_s15, %s87_s15 }
  0x3c   :  { %p6167_p11 = scmp.ne.s32.totalorder %s87_s15, %s6166_s3  ;;  %p6172_p13 = scmp.lt.s32.totalorder %s6166_s3, %s6166_s3 }
  0x3e   :  { %p6173_p0 = por %p6172_p13, %p6171_p12 }
  0x40   :  { %p6174_p1 = pnand %p6173_p0, %p6167_p11 }
  0x42   :  { %6177 = shalt.err (!%p6174_p1)
}
  0x43   :  { %92 = dma.hbm_to_vmem [thread:$0]  %s7861_s7, 4096, %s87_s15, [#allocation12], %s6209_s12, %s6209_s12, %s6210_s13  }
  0x44   :  { %6198 = dma.done.wait [#allocation3], 128  }
  0x45   :  { %6199 = vsyncadd [#allocation3], 4294967168 }
  0x46   :  { %6200 = dma.done.wait [#allocation6], 4096  }
  0x47   :  { %6201 = vsyncadd [#allocation6], 4294963200 }
  0x48   :  { %6202 = dma.done.wait [#allocation9], 16384  }
  0x49   :  { %6203 = vsyncadd [#allocation9], 4294950912 }
  0x4a   :  { %6204 = dma.done.wait [#allocation12], 4096  }
  0x4b   :  { %6205 = vsyncadd [#allocation12], 4294963200  ;;  %vm147_vm0 = vcmask 64512   ;;  %v145_v0 = vld [vmem:[#allocation2] sm:$0xff]  ;;  %v114_v2 = vld [vmem:[%s7854_s0 + $0x8] sm:$0xff]  ;;  %vm5449_vm1 = vcmask 130112  }
  0x4c   :  { %v113_v1 = vld [vmem:[%s7854_s0] sm:$0xff]  ;;  %5830 = vmatprep.subr.mxu0 %v145_v0  ;;  %v115_v3 = vld [vmem:[%s7854_s0 + $0x10] sm:$0xff]  ;;  %6040 = vmatprep.subr.mxu1 %v145_v0  ;;  %v116_v4 = vld [vmem:[%s7854_s0 + $0x18] sm:$0xff]  ;;  %vm5456_vm2 = vcmask 195712   ;;  %vm5463_vm3 = vcmask 261312   ;;  %vm5470_vm4 = vcmask 326912  }
  0x4d   :  { %5832 = vmatprep.mubr.msk.f32.mxu0 %vm147_vm0, %v113_v1  ;;  %5831 = vmatpush3.msra.mxu0 %v145_v0  ;;  %v117_v5 = vld [vmem:[%s7854_s0 + $0x20] sm:$0xff]  ;;  %v130_v7 = vld [vmem:[%s7854_s0 + $0x88] sm:$0xff]  ;;  %v131_v8 = vld [vmem:[%s7854_s0 + $0x90] sm:$0xff]  ;;  %vm5477_vm5 = vcmask 392512   ;;  %vm5484_vm6 = vcmask 458112   ;;  %vm5491_vm7 = vcmask 523712  }
  0x4e   :  { %5833 = vmatmul.mubr.msk.f32.vlgmr.msra.gmra.mxu0 %vm147_vm0, %v114_v2  ;;  %6041 = vmatpush3.msra.mxu1 %v145_v0  ;;  %v129_v6 = vld [vmem:[%s7854_s0 + $0x80] sm:$0xff]  ;;  %v118_v9 = vld [vmem:[%s7854_s0 + $0x28] sm:$0xff]  ;;  %v132_v10 = vld [vmem:[%s7854_s0 + $0x98] sm:$0xff]  ;;  %vm5498_vm8 = vcmask 589312   ;;  %vm5505_vm9 = vcmask 654912   ;;  %vm5512_vm10 = vcmask 720512  }
  0x4f   :  { %5835 = vmatprep.mubr.msk.f32.mxu0 %vm147_vm0, %v115_v3  ;;  %5856 = vmatprep.mubr.msk.f32.mxu1 %vm147_vm0, %v129_v6  ;;  %v119_v11 = vld [vmem:[%s7854_s0 + $0x30] sm:$0xff]  ;;  %v133_v12 = vld [vmem:[%s7854_s0 + $0xa0] sm:$0xff]  ;;  %v120_v15 = vld [vmem:[%s7854_s0 + $0x38] sm:$0xff]  ;;  %vm5519_vm11 = vcmask 786112   ;;  %vm5526_vm12 = vcmask 851712   ;;  %vm5533_vm13 = vcmask 917312  }
  0x50   :  { %5857 = vmatmul.mubr.msk.f32.vlgmr.msra.gmra.mxu1 %vm147_vm0, %v130_v7  ;;  %v516_v13 = vld [vmem:[#allocation5 + $0x78] sm:$0xff]  ;;  %v134_v16 = vld [vmem:[%s7854_s0 + $0xa8] sm:$0xff]  ;;  %v135_v18 = vld [vmem:[%s7854_s0 + $0xb0] sm:$0xff]  ;;  %vm5540_vm14 = vcmask 982912   ;;  %vm5547_vm15 = vcmask 1048512  }
  0x51   :  { %5859 = vmatprep.mubr.msk.f32.mxu1 %vm147_vm0, %v131_v8  ;;  %v757_v14 = vld [vmem:[#allocation7 + $0x78] sm:$0xff]  ;;  %5880 = vmatprep.subr.mxu1 %v516_v13  ;;  %v515_v19 = vld [vmem:[#allocation5 + $0x70] sm:$0xff]  ;;  %v122_v21 = vld [vmem:[%s7854_s0 + $0x48] sm:$0xff] }
  0x52   :  { %5836 = vmatmul.mubr.msk.f32.gmra.mxu0 %vm147_vm0, %v116_v4  ;;  %v121_v17 = vld [vmem:[%s7854_s0 + $0x40] sm:$0xff]  ;;  %5960 = vmatprep.subr.mxu0 %v757_v14  ;;  %v756_v20 = vld [vmem:[#allocation7 + $0x70] sm:$0xff]  ;;  %v123_v23 = vld [vmem:[%s7854_s0 + $0x50] sm:$0xff] }
  0x53   :  { %5838 = vmatprep.mubr.msk.f32.mxu0 %vm147_vm0, %v117_v5  ;;  %5881 = vmatpush3.msra.mxu1 %v516_v13  ;;  %v136_v22 = vld [vmem:[%s7854_s0 + $0xb8] sm:$0xff]  ;;  %v137_v24 = vld [vmem:[%s7854_s0 + $0xc0] sm:$0xff]  ;;  %v514_v25 = vld [vmem:[#allocation5 + $0x68] sm:$0xff] }
  0x54   :  { %5860 = vmatmul.mubr.msk.f32.gmra.mxu1 %vm147_vm0, %v132_v10  ;;  %5961 = vmatpush3.msra.mxu0 %v757_v14  ;;  %v755_v26 = vld [vmem:[#allocation7 + $0x68] sm:$0xff]  ;;  %v124_v27 = vld [vmem:[%s7854_s0 + $0x58] sm:$0xff]  ;;  %v138_v28 = vld [vmem:[%s7854_s0 + $0xc8] sm:$0xff] }
  0x55   :  { %5862 = vmatprep.mubr.msk.f32.mxu1 %vm147_vm0, %v133_v12  ;;  %5882 = vmatprep.subr.mxu1 %v515_v19  ;;  %v125_v29 = vld [vmem:[%s7854_s0 + $0x60] sm:$0xff]  ;;  %v139_v30 = vld [vmem:[%s7854_s0 + $0xd0] sm:$0xff]  ;;  %v513_v31 = vld [vmem:[#allocation5 + $0x60] sm:$0xff] }
  0x56   :  { %5839 = vmatmul.mubr.msk.f32.gmra.mxu0 %vm147_vm0, %v118_v9  ;;  %5962 = vmatprep.subr.mxu0 %v756_v20  ;;  %v754_v32 = vld [vmem:[#allocation7 + $0x60] sm:$0xff]  ;;  %v140_v34 = vld [vmem:[%s7854_s0 + $0xd8] sm:$0xff]  ;;  %v127_v35 = vld [vmem:[%s7854_s0 + $0x70] sm:$0xff] }
  0x57   :  { %5841 = vmatprep.mubr.msk.f32.mxu0 %vm147_vm0, %v119_v11  ;;  %5883 = vmatpush3.msra.mxu1 %v515_v19  ;;  %v126_v33 = vld [vmem:[%s7854_s0 + $0x68] sm:$0xff]  ;;  %v141_v36 = vld [vmem:[%s7854_s0 + $0xe0] sm:$0xff]  ;;  %v128_v39 = vld [vmem:[%s7854_s0 + $0x78] sm:$0xff] }
  0x58   :  { %5863 = vmatmul.mubr.msk.f32.gmra.mxu1 %vm147_vm0, %v134_v16  ;;  %5963 = vmatpush3.msra.mxu0 %v756_v20  ;;  %v512_v37 = vld [vmem:[#allocation5 + $0x58] sm:$0xff]  ;;  %v142_v40 = vld [vmem:[%s7854_s0 + $0xe8] sm:$0xff]  ;;  %v143_v41 = vld [vmem:[%s7854_s0 + $0xf0] sm:$0xff] }
  0x59   :  { %5865 = vmatprep.mubr.msk.f32.mxu1 %vm147_vm0, %v135_v18  ;;  %5884 = vmatprep.subr.mxu1 %v514_v25  ;;  %v753_v38 = vld [vmem:[#allocation7 + $0x58] sm:$0xff]  ;;  %v511_v42 = vld [vmem:[#allocation5 + $0x50] sm:$0xff]  ;;  %v510_v44 = vld [vmem:[#allocation5 + $0x48] sm:$0xff] }
  0x5a   :  { %5842 = vmatmul.mubr.msk.f32.gmra.mxu0 %vm147_vm0, %v120_v15  ;;  %5964 = vmatprep.subr.mxu0 %v755_v26  ;;  %v752_v43 = vld [vmem:[#allocation7 + $0x50] sm:$0xff]  ;;  %v751_v46 = vld [vmem:[#allocation7 + $0x48] sm:$0xff]  ;;  %v509_v47 = vld [vmem:[#allocation5 + $0x40] sm:$0xff] }
  0x5b   :  { %5844 = vmatprep.mubr.msk.f32.mxu0 %vm147_vm0, %v121_v17  ;;  %5885 = vmatpush3.msra.mxu1 %v514_v25  ;;  %v144_v45 = vld [vmem:[%s7854_s0 + $0xf8] sm:$0xff]  ;;  %v750_v48 = vld [vmem:[#allocation7 + $0x40] sm:$0xff]  ;;  %v508_v49 = vld [vmem:[#allocation5 + $0x38] sm:$0xff] }
  0x5c   :  { %5866 = vmatmul.mubr.msk.f32.gmra.mxu1 %vm147_vm0, %v136_v22  ;;  %5965 = vmatpush3.msra.mxu0 %v755_v26  ;;  %v749_v50 = vld [vmem:[#allocation7 + $0x38] sm:$0xff]  ;;  %v507_v51 = vld [vmem:[#allocation5 + $0x30] sm:$0xff]  ;;  %v506_v53 = vld [vmem:[#allocation5 + $0x28] sm:$0xff] }
  0x5d   :  { %5868 = vmatprep.mubr.msk.f32.mxu1 %vm147_vm0, %v137_v24  ;;  %5886 = vmatprep.subr.mxu1 %v513_v31  ;;  %v748_v52 = vld [vmem:[#allocation7 + $0x30] sm:$0xff]  ;;  %v747_v54 = vld [vmem:[#allocation7 + $0x28] sm:$0xff]  ;;  %v505_v55 = vld [vmem:[#allocation5 + $0x20] sm:$0xff] }
  0x5e   :  { %5845 = vmatmul.mubr.msk.f32.gmra.mxu0 %vm147_vm0, %v122_v21  ;;  %5966 = vmatprep.subr.mxu0 %v754_v32  ;;  %v746_v56 = vld [vmem:[#allocation7 + $0x20] sm:$0xff]  ;;  %v504_v57 = vld [vmem:[#allocation5 + $0x18] sm:$0xff]  ;;  %v503_v59 = vld [vmem:[#allocation5 + $0x10] sm:$0xff] }
  0x5f   :  { %5847 = vmatprep.mubr.msk.f32.mxu0 %vm147_vm0, %v123_v23  ;;  %5887 = vmatpush3.msra.mxu1 %v513_v31  ;;  %v745_v58 = vld [vmem:[#allocation7 + $0x18] sm:$0xff]  ;;  %v744_v60 = vld [vmem:[#allocation7 + $0x10] sm:$0xff]  ;;  %v502_v61 = vld [vmem:[#allocation5 + $0x8] sm:$0xff] }
  0x60   :  { %5869 = vmatmul.mubr.msk.f32.gmra.mxu1 %vm147_vm0, %v138_v28  ;;  %5967 = vmatpush3.msra.mxu0 %v754_v32  ;;  %v743_v62 = vld [vmem:[#allocation7 + $0x8] sm:$0xff]  ;;  %v501_v63 = vld [vmem:[#allocation5] sm:$0xff]  ;;  %v1111_v1 = vld [vmem:[%s7858_s4 + $0xf8] sm:$0xff] }
  0x61   :  { %5871 = vmatprep.mubr.msk.f32.mxu1 %vm147_vm0, %v139_v30  ;;  %5888 = vmatprep.subr.mxu1 %v512_v37  ;;  %v742_v0 = vld [vmem:[#allocation7] sm:$0xff]  ;;  %v6439_v2 = vld [vmem:[%s7862_s8] ss:$0 sm:$0xff]  ;;  %v1110_v12 = vld [vmem:[%s7858_s4 + $0xf0] sm:$0xff] }
  0x62   :  { %5848 = vmatmul.mubr.msk.f32.gmra.mxu0 %vm147_vm0, %v124_v27  ;;  %5968 = vmatprep.subr.mxu0 %v753_v38  ;;  %v1109_v14 = vld [vmem:[%s7858_s4 + $0xe8] sm:$0xff]  ;;  %v1108_v21 = vld [vmem:[%s7858_s4 + $0xe0] sm:$0xff]  ;;  %v1107_v23 = vld [vmem:[%s7858_s4 + $0xd8] sm:$0xff] }
  0x63   :  { %5850 = vmatprep.mubr.msk.f32.mxu0 %vm147_vm0, %v125_v29  ;;  %5889 = vmatpush3.msra.mxu1 %v512_v37  ;;  %v1106_v31 = vld [vmem:[%s7858_s4 + $0xd0] sm:$0xff] }
  0x64   :  { %5872 = vmatmul.mubr.msk.f32.gmra.mxu1 %vm147_vm0, %v140_v34  ;;  %5969 = vmatpush3.msra.mxu0 %v753_v38 }
  0x65   :  { %5874 = vmatprep.mubr.msk.f32.mxu1 %vm147_vm0, %v141_v36  ;;  %5890 = vmatprep.subr.mxu1 %v511_v42 }
  0x66   :  { %5851 = vmatmul.mubr.msk.f32.gmra.mxu0 %vm147_vm0, %v126_v33  ;;  %5970 = vmatprep.subr.mxu0 %v752_v43  ;;  %v1105_v33 = vld [vmem:[%s7858_s4 + $0xc8] sm:$0xff] }
  0x67   :  { %5853 = vmatprep.mubr.msk.f32.mxu0 %vm147_vm0, %v127_v35  ;;  %5891 = vmatpush3.msra.mxu1 %v511_v42  ;;  %v1103_v42 = vld [vmem:[%s7858_s4 + $0xb8] sm:$0xff] }
  0x68   :  { %5875 = vmatmul.mubr.msk.f32.gmra.mxu1 %vm147_vm0, %v142_v40  ;;  %5971 = vmatpush3.msra.mxu0 %v752_v43  ;;  %v1104_v40 = vld [vmem:[%s7858_s4 + $0xc0] sm:$0xff] }
  0x69   :  { %5877 = vmatprep.mubr.msk.f32.mxu1 %vm147_vm0, %v143_v41  ;;  %5892 = vmatprep.subr.mxu1 %v510_v44 }
  0x6a   :  { %5854 = vmatmul.mubr.msk.f32.gmra.mxu0 %vm147_vm0, %v128_v39  ;;  %5972 = vmatprep.subr.mxu0 %v751_v46 }
  0x6b   :  { %5893 = vmatpush3.msra.mxu1 %v510_v44  ;;  %5973 = vmatpush3.msra.mxu0 %v751_v46 }
  0x6c   :  { %5878 = vmatmul.mubr.msk.f32.gmra.mxu1 %vm147_vm0, %v144_v45  ;;  %5894 = vmatprep.subr.mxu1 %v509_v47 }
  0x6d   :  { %5974 = vmatprep.subr.mxu0 %v750_v48  ;;  %5895 = vmatpush3.msra.mxu1 %v509_v47 }
  0x6e   :  { %5975 = vmatpush3.msra.mxu0 %v750_v48  ;;  %5896 = vmatprep.subr.mxu1 %v508_v49 }
  0x6f   :  { %5976 = vmatprep.subr.mxu0 %v749_v50  ;;  %5897 = vmatpush3.msra.mxu1 %v508_v49  ;;  %v1102_v49 = vld [vmem:[%s7858_s4 + $0xb0] sm:$0xff] }
  0x70   :  { %5977 = vmatpush3.msra.mxu0 %v749_v50  ;;  %5898 = vmatprep.subr.mxu1 %v507_v51 }
  0x71   :  { %5978 = vmatprep.subr.mxu0 %v748_v52  ;;  %5899 = vmatpush3.msra.mxu1 %v507_v51  ;;  %v1101_v51 = vld [vmem:[%s7858_s4 + $0xa8] sm:$0xff] }
  0x72   :  { %5979 = vmatpush3.msra.mxu0 %v748_v52  ;;  %5900 = vmatprep.subr.mxu1 %v506_v53 }
  0x73   :  { %5980 = vmatprep.subr.mxu0 %v747_v54  ;;  %5901 = vmatpush3.msra.mxu1 %v506_v53 }
  0x74   :  { %5981 = vmatpush3.msra.mxu0 %v747_v54  ;;  %5902 = vmatprep.subr.mxu1 %v505_v55 }
  0x75   :  { %5982 = vmatprep.subr.mxu0 %v746_v56  ;;  %5903 = vmatpush3.msra.mxu1 %v505_v55 }
  0x76   :  { %5983 = vmatpush3.msra.mxu0 %v746_v56  ;;  %5904 = vmatprep.subr.mxu1 %v504_v57 }
  0x77   :  { %5984 = vmatprep.subr.mxu0 %v745_v58  ;;  %5905 = vmatpush3.msra.mxu1 %v504_v57 }
  0x78   :  { %5985 = vmatpush3.msra.mxu0 %v745_v58  ;;  %5906 = vmatprep.subr.mxu1 %v503_v59 }
  0x79   :  { %5986 = vmatprep.subr.mxu0 %v744_v60  ;;  %5907 = vmatpush3.msra.mxu1 %v503_v59  ;;  %v1100_v59 = vld [vmem:[%s7858_s4 + $0xa0] sm:$0xff] }
  0x7a   :  { %5987 = vmatpush3.msra.mxu0 %v744_v60  ;;  %5908 = vmatprep.subr.mxu1 %v502_v61 }
  0x7b   :  { %5988 = vmatprep.subr.mxu0 %v743_v62  ;;  %5909 = vmatpush3.msra.mxu1 %v502_v61  ;;  %v1099_v61 = vld [vmem:[%s7858_s4 + $0x98] sm:$0xff] }
  0x7c   :  { %5989 = vmatpush3.msra.mxu0 %v743_v62  ;;  %5910 = vmatprep.subr.mxu1 %v501_v63 }
  0x7d   :  { %5990 = vmatprep.subr.mxu0 %v742_v0  ;;  %5911 = vmatpush3.msra.mxu1 %v501_v63 }
  0x7e   :  { %5991 = vmatpush3.msra.mxu0 %v742_v0  ;;  %1125 = vmatprep.subr.mxu1 %v1111_v1 }
 0x10e   :  { %v5834_v3 = vpop.f32.mrf.mxu0 }
 0x10f   :  { %v316_v4 = vadd.f32 %v5834_v3, %v6439_v2 }
 0x110   :  { %v310_v5 = vpop.f32.mrf.mxu0  ;;  %v6451_v17 = vpop.f32.mrf.mxu1 }
 0x111   :  { %v311_v6 = vadd.f32 %v310_v5, %v6439_v2  ;;  %v470_v10 = vmax.f32 %v316_v4, 0.0 }
 0x112   :  { %v5837_v7 = vpop.f32.mrf.mxu0  ;;  %v6461_v26 = vpop.f32.mrf.mxu1 }
 0x113   :  { %v469_v8 = vmax.f32 %v311_v6, 0.0  ;;  %v326_v9 = vadd.f32 %v5837_v7, %v6439_v2  ;;  %v391_v3 = vadd.f32 %v6461_v26, %v6439_v2  ;;  %v1098_v6 = vld [vmem:[%s7858_s4 + $0x90] sm:$0xff]  ;;  %v1093_v26 = vld [vmem:[%s7858_s4 + $0x68] sm:$0xff] }
 0x114   :  { %v320_v11 = vpop.f32.mrf.mxu0  ;;  %v6464_v30 = vpop.f32.mrf.mxu1 }
 0x115   :  { %v321_v13 = vadd.f32 %v320_v11, %v6439_v2  ;;  %5912 = vmatprep.mubr.f32.mxu1 %v469_v8  ;;  %5992 = vmatprep.mubr.f32.mxu0 %v469_v8  ;;  %v472_v15 = vmax.f32 %v326_v9, 0.0  ;;  %v1097_v8 = vld [vmem:[%s7858_s4 + $0x88] sm:$0xff] }
 0x116   :  { %5913 = vmatmul.mubr.f32.vlgmr.msra.gmra.mxu1 %v470_v10  ;;  %5993 = vmatmul.mubr.f32.vlgmr.msra.gmra.mxu0 %v470_v10  ;;  %v5840_v16 = vpop.f32.mrf.mxu0  ;;  %v400_v39 = vpop.f32.mrf.mxu1  ;;  %v396_v10 = vadd.f32 %v6451_v17, %v6439_v2 }
 0x117   :  { %v471_v18 = vmax.f32 %v321_v13, 0.0  ;;  %v336_v19 = vadd.f32 %v5840_v16, %v6439_v2  ;;  %1126 = vmatpush1.msra.mxu1 %v1110_v12  ;;  %v485_v13 = vmax.f32 %v391_v3, 0.0  ;;  %v6218_v3 = vmov 0.0  }
 0x118   :  { %v330_v20 = vpop.f32.mrf.mxu0  ;;  %1127 = vmatprep.subr.mxu1 %v1109_v14  ;;  %v6481_v45 = vpop.f32.mrf.mxu1  ;;  %v401_v14 = vadd.f32 %v400_v39, %v6439_v2  ;;  %v486_v16 = vmax.f32 %v396_v10, 0.0 }
 0x119   :  { %5915 = vmatprep.mubr.f32.mxu1 %v471_v18  ;;  %5995 = vmatprep.mubr.f32.mxu0 %v471_v18  ;;  %v331_v22 = vadd.f32 %v330_v20, %v6439_v2  ;;  %v474_v24 = vmax.f32 %v336_v19, 0.0  ;;  %v406_v18 = vadd.f32 %v6464_v30, %v6439_v2  ;;  %v1095_v19 = vld [vmem:[%s7858_s4 + $0x78] sm:$0xff]  ;;  %v1092_v30 = vld [vmem:[%s7858_s4 + $0x60] sm:$0xff] }
 0x11a   :  { %5916 = vmatmul.mubr.f32.gmra.mxu1 %v472_v15  ;;  %5996 = vmatmul.mubr.f32.gmra.mxu0 %v472_v15  ;;  %v5843_v25 = vpop.f32.mrf.mxu0  ;;  %v410_v54 = vpop.f32.mrf.mxu1  ;;  %v1096_v15 = vld [vmem:[%s7858_s4 + $0x80] sm:$0xff]  ;;  %v487_v20 = vmax.f32 %v401_v14, 0.0 }
 0x11b   :  { %v473_v27 = vmax.f32 %v331_v22, 0.0  ;;  %v346_v28 = vadd.f32 %v5843_v25, %v6439_v2  ;;  %1128 = vmatpush1.msra.mxu1 %v1108_v21  ;;  %v411_v21 = vadd.f32 %v410_v54, %v6439_v2  ;;  %v416_v25 = vadd.f32 %v6481_v45, %v6439_v2  ;;  %v1088_v45 = vld [vmem:[%s7858_s4 + $0x40] sm:$0xff] }
 0x11c   :  { %v340_v29 = vpop.f32.mrf.mxu0  ;;  %1129 = vmatprep.subr.mxu1 %v1107_v23  ;;  %v6492_v58 = vpop.f32.mrf.mxu1  ;;  %v1094_v23 = vld [vmem:[%s7858_s4 + $0x70] sm:$0xff] }
 0x11d   :  { %5918 = vmatprep.mubr.f32.mxu1 %v473_v27  ;;  %5998 = vmatprep.mubr.f32.mxu0 %v473_v27  ;;  %v341_v32 = vadd.f32 %v340_v29, %v6439_v2  ;;  %v476_v34 = vmax.f32 %v346_v28, 0.0  ;;  %v489_v27 = vmax.f32 %v411_v21, 0.0  ;;  %v1797_v21 = vld [vmem:[#allocation10 + $0xf0] sm:$0xff] }
 0x11e   :  { %5919 = vmatmul.mubr.f32.gmra.mxu1 %v474_v24  ;;  %5999 = vmatmul.mubr.f32.gmra.mxu0 %v474_v24  ;;  %v5846_v35 = vpop.f32.mrf.mxu0  ;;  %v420_v5 = vpop.f32.mrf.mxu1  ;;  %v488_v24 = vmax.f32 %v406_v18, 0.0  ;;  %v1477_v18 = vld [vmem:[#allocation8 + $0xf8] sm:$0xff] }
 0x11f   :  { %v475_v36 = vmax.f32 %v341_v32, 0.0  ;;  %v356_v37 = vadd.f32 %v5846_v35, %v6439_v2  ;;  %1130 = vmatpush1.msra.mxu1 %v1106_v31  ;;  %v421_v28 = vadd.f32 %v420_v5, %v6439_v2  ;;  %v490_v31 = vmax.f32 %v416_v25, 0.0  ;;  %1510 = vmatprep.subr.mxu0 %v1477_v18  ;;  %v1796_v25 = vld [vmem:[#allocation10 + $0xe8] sm:$0xff] }
 0x120   :  { %v350_v38 = vpop.f32.mrf.mxu0  ;;  %1131 = vmatprep.subr.mxu1 %v1105_v33  ;;  %v5870_v11 = vpop.f32.mrf.mxu1  ;;  %v426_v32 = vadd.f32 %v6492_v58, %v6439_v2  ;;  %v1084_v58 = vld [vmem:[%s7858_s4 + $0x20] sm:$0xff] }
 0x121   :  { %5921 = vmatprep.mubr.f32.mxu1 %v475_v36  ;;  %6001 = vmatprep.mubr.f32.mxu0 %v475_v36  ;;  %v351_v41 = vadd.f32 %v350_v38, %v6439_v2  ;;  %v478_v43 = vmax.f32 %v356_v37, 0.0  ;;  %v491_v35 = vmax.f32 %v421_v28, 0.0  ;;  %v1090_v37 = vld [vmem:[%s7858_s4 + $0x50] sm:$0xff]  ;;  %v436_v39 = vadd.f32 %v5870_v11, %v6439_v2  ;;  %v6585_v11 = vld [vmem:[%s7862_s8 + $0x1] ss:$0 sm:$0xff]  ;;  %v1795_v28 = vld [vmem:[#allocation10 + $0xe0] sm:$0xff] }
 0x122   :  { %5922 = vmatmul.mubr.f32.gmra.mxu1 %v476_v34  ;;  %6002 = vmatmul.mubr.f32.gmra.mxu0 %v476_v34  ;;  %v5849_v44 = vpop.f32.mrf.mxu0  ;;  %v430_v17 = vpop.f32.mrf.mxu1  ;;  %v1091_v34 = vld [vmem:[%s7858_s4 + $0x58] sm:$0xff]  ;;  %v492_v38 = vmax.f32 %v426_v32, 0.0 }
 0x123   :  { %v477_v46 = vmax.f32 %v351_v41, 0.0  ;;  %v366_v47 = vadd.f32 %v5849_v44, %v6439_v2  ;;  %1132 = vmatpush1.msra.mxu1 %v1104_v40  ;;  %v431_v36 = vadd.f32 %v430_v17, %v6439_v2  ;;  %v1089_v41 = vld [vmem:[%s7858_s4 + $0x48] sm:$0xff] }
 0x124   :  { %v360_v48 = vpop.f32.mrf.mxu0  ;;  %1133 = vmatprep.subr.mxu1 %v1103_v42  ;;  %v5873_v22 = vpop.f32.mrf.mxu1 }
 0x125   :  { %5924 = vmatprep.mubr.f32.mxu1 %v477_v46  ;;  %6004 = vmatprep.mubr.f32.mxu0 %v477_v46  ;;  %v361_v50 = vadd.f32 %v360_v48, %v6439_v2  ;;  %v480_v52 = vmax.f32 %v366_v47, 0.0  ;;  %v493_v42 = vmax.f32 %v431_v36, 0.0  ;;  %v494_v46 = vmax.f32 %v436_v39, 0.0  ;;  %v1087_v48 = vld [vmem:[%s7858_s4 + $0x38] sm:$0xff]  ;;  %v1791_v39 = vld [vmem:[#allocation10 + $0xc0] sm:$0xff] }
 0x126   :  { %5925 = vmatmul.mubr.f32.gmra.mxu1 %v478_v43  ;;  %6005 = vmatmul.mubr.f32.gmra.mxu0 %v478_v43  ;;  %v5852_v53 = vpop.f32.mrf.mxu0  ;;  %v440_v29 = vpop.f32.mrf.mxu1  ;;  %v446_v47 = vadd.f32 %v5873_v22, %v6439_v2  ;;  %v1476_v22 = vld [vmem:[#allocation8 + $0xf0] sm:$0xff] }
 0x127   :  { %v479_v55 = vmax.f32 %v361_v50, 0.0  ;;  %v376_v56 = vadd.f32 %v5852_v53, %v6439_v2  ;;  %1134 = vmatpush1.msra.mxu1 %v1102_v49  ;;  %v441_v43 = vadd.f32 %v440_v29, %v6439_v2  ;;  %1511 = vmatpush1.msra.mxu0 %v1476_v22  ;;  %v1473_v29 = vld [vmem:[#allocation8 + $0xd8] sm:$0xff]  ;;  %v1463_v22 = vld [vmem:[#allocation8 + $0x88] sm:$0xff] }
 0x128   :  { %v370_v57 = vpop.f32.mrf.mxu0  ;;  %1135 = vmatprep.subr.mxu1 %v1101_v51  ;;  %v5876_v33 = vpop.f32.mrf.mxu1  ;;  %v496_v53 = vmax.f32 %v446_v47, 0.0 }
 0x129   :  { %5927 = vmatprep.mubr.f32.mxu1 %v479_v55  ;;  %6007 = vmatprep.mubr.f32.mxu0 %v479_v55  ;;  %v371_v60 = vadd.f32 %v370_v57, %v6439_v2  ;;  %v482_v62 = vmax.f32 %v376_v56, 0.0  ;;  %v495_v49 = vmax.f32 %v441_v43, 0.0  ;;  %v456_v54 = vadd.f32 %v5876_v33, %v6439_v2  ;;  %v1085_v55 = vld [vmem:[%s7858_s4 + $0x28] sm:$0xff] }
 0x12a   :  { %5928 = vmatmul.mubr.f32.gmra.mxu1 %v480_v52  ;;  %6008 = vmatmul.mubr.f32.gmra.mxu0 %v480_v52  ;;  %v5855_v63 = vpop.f32.mrf.mxu0  ;;  %v450_v40 = vpop.f32.mrf.mxu1  ;;  %v1086_v52 = vld [vmem:[%s7858_s4 + $0x30] sm:$0xff] }
 0x12b   :  { %v481_v0 = vmax.f32 %v371_v60, 0.0  ;;  %v386_v1 = vadd.f32 %v5855_v63, %v6439_v2  ;;  %1136 = vmatpush1.msra.mxu1 %v1100_v59  ;;  %v451_v50 = vadd.f32 %v450_v40, %v6439_v2  ;;  %v498_v59 = vmax.f32 %v456_v54, 0.0  ;;  %v1083_v63 = vld [vmem:[%s7858_s4 + $0x18] sm:$0xff]  ;;  %v1471_v40 = vld [vmem:[#allocation8 + $0xc8] sm:$0xff] }
 0x12c   :  { %v380_v4 = vpop.f32.mrf.mxu0  ;;  %1137 = vmatprep.subr.mxu1 %v1099_v61  ;;  %v5879_v44 = vpop.f32.mrf.mxu1 }
 0x12d   :  { %5930 = vmatprep.mubr.f32.mxu1 %v481_v0  ;;  %6010 = vmatprep.mubr.f32.mxu0 %v481_v0  ;;  %v381_v7 = vadd.f32 %v380_v4, %v6439_v2  ;;  %v484_v9 = vmax.f32 %v386_v1, 0.0  ;;  %v497_v56 = vmax.f32 %v451_v50, 0.0  ;;  %v466_v60 = vadd.f32 %v5879_v44, %v6439_v2  ;;  %v1081_v0 = vld [vmem:[%s7858_s4 + $0x8] sm:$0xff]  ;;  %v1080_v1 = vld [vmem:[%s7858_s4] sm:$0xff] }
 0x12e   :  { %5931 = vmatmul.mubr.f32.gmra.mxu1 %v482_v62  ;;  %6011 = vmatmul.mubr.f32.gmra.mxu0 %v482_v62  ;;  %v460_v51 = vpop.f32.mrf.mxu1  ;;  %v1798_v4 = vld [vmem:[#allocation10 + $0xf8] sm:$0xff]  ;;  %v1787_v50 = vld [vmem:[#allocation10 + $0xa0] sm:$0xff] }
 0x12f   :  { %v483_v12 = vmax.f32 %v381_v7, 0.0  ;;  %1138 = vmatpush1.msra.mxu1 %v1098_v6  ;;  %v461_v57 = vadd.f32 %v460_v51, %v6439_v2  ;;  %v500_v62 = vmax.f32 %v466_v60, 0.0  ;;  %v1082_v2 = vld [vmem:[%s7858_s4 + $0x10] sm:$0xff]  ;;  %v1469_v51 = vld [vmem:[#allocation8 + $0xb8] sm:$0xff]  ;;  %v1468_v60 = vld [vmem:[#allocation8 + $0xb0] sm:$0xff] }
 0x130   :  { %1139 = vmatprep.subr.mxu1 %v1097_v8 }
 0x131   :  { %5933 = vmatprep.mubr.f32.mxu1 %v483_v12  ;;  %6013 = vmatprep.mubr.f32.mxu0 %v483_v12  ;;  %v499_v61 = vmax.f32 %v461_v57, 0.0 }
 0x132   :  { %5934 = vmatmul.mubr.f32.gmra.mxu1 %v484_v9  ;;  %6014 = vmatmul.mubr.f32.gmra.mxu0 %v484_v9 }
 0x133   :  { %5936 = vmatprep.mubr.f32.mxu1 %v485_v13  ;;  %6016 = vmatprep.mubr.f32.mxu0 %v485_v13 }
 0x134   :  { %1140 = vmatpush1.msra.mxu1 %v1096_v15 }
 0x135   :  { %1141 = vmatprep.subr.mxu1 %v1095_v19 }
 0x136   :  { %5937 = vmatmul.mubr.f32.gmra.mxu1 %v486_v16  ;;  %6017 = vmatmul.mubr.f32.gmra.mxu0 %v486_v16 }
 0x137   :  { %5939 = vmatprep.mubr.f32.mxu1 %v487_v20  ;;  %6019 = vmatprep.mubr.f32.mxu0 %v487_v20 }
 0x138   :  { %1142 = vmatpush1.msra.mxu1 %v1094_v23 }
 0x139   :  { %1143 = vmatprep.subr.mxu1 %v1093_v26  ;;  %v1475_v26 = vld [vmem:[#allocation8 + $0xe8] sm:$0xff] }
 0x13a   :  { %5940 = vmatmul.mubr.f32.gmra.mxu1 %v488_v24  ;;  %6020 = vmatmul.mubr.f32.gmra.mxu0 %v488_v24 }
 0x13b   :  { %5942 = vmatprep.mubr.f32.mxu1 %v489_v27  ;;  %6022 = vmatprep.mubr.f32.mxu0 %v489_v27  ;;  %v1474_v27 = vld [vmem:[#allocation8 + $0xe0] sm:$0xff] }
 0x13c   :  { %1144 = vmatpush1.msra.mxu1 %v1092_v30  ;;  %1512 = vmatprep.subr.mxu0 %v1475_v26  ;;  %v1794_v30 = vld [vmem:[#allocation10 + $0xd8] sm:$0xff] }
 0x13d   :  { %1145 = vmatprep.subr.mxu1 %v1091_v34  ;;  %v1793_v34 = vld [vmem:[#allocation10 + $0xd0] sm:$0xff]  ;;  %1513 = vmatpush1.msra.mxu0 %v1474_v27 }
 0x13e   :  { %5943 = vmatmul.mubr.f32.gmra.mxu1 %v490_v31  ;;  %6023 = vmatmul.mubr.f32.gmra.mxu0 %v490_v31  ;;  %v1773_v27 = vld [vmem:[#allocation10 + $0x30] sm:$0xff] }
 0x13f   :  { %5945 = vmatprep.mubr.f32.mxu1 %v491_v35  ;;  %6025 = vmatprep.mubr.f32.mxu0 %v491_v35 }
 0x140   :  { %1146 = vmatpush1.msra.mxu1 %v1090_v37  ;;  %v1792_v37 = vld [vmem:[#allocation10 + $0xc8] sm:$0xff]  ;;  %1514 = vmatprep.subr.mxu0 %v1473_v29 }
 0x141   :  { %1147 = vmatprep.subr.mxu1 %v1089_v41  ;;  %v1790_v41 = vld [vmem:[#allocation10 + $0xb8] sm:$0xff] }
 0x142   :  { %5946 = vmatmul.mubr.f32.gmra.mxu1 %v492_v38  ;;  %6026 = vmatmul.mubr.f32.gmra.mxu0 %v492_v38  ;;  %v1472_v38 = vld [vmem:[#allocation8 + $0xd0] sm:$0xff] }
 0x143   :  { %5948 = vmatprep.mubr.f32.mxu1 %v493_v42  ;;  %6028 = vmatprep.mubr.f32.mxu0 %v493_v42 }
 0x144   :  { %1148 = vmatpush1.msra.mxu1 %v1088_v45  ;;  %v1789_v45 = vld [vmem:[#allocation10 + $0xb0] sm:$0xff]  ;;  %1515 = vmatpush1.msra.mxu0 %v1472_v38 }
 0x145   :  { %1149 = vmatprep.subr.mxu1 %v1087_v48  ;;  %v1788_v48 = vld [vmem:[#allocation10 + $0xa8] sm:$0xff]  ;;  %1516 = vmatprep.subr.mxu0 %v1471_v40  ;;  %v1769_v38 = vld [vmem:[#allocation10 + $0x10] sm:$0xff] }
 0x146   :  { %5949 = vmatmul.mubr.f32.gmra.mxu1 %v494_v46  ;;  %6029 = vmatmul.mubr.f32.gmra.mxu0 %v494_v46 }
 0x147   :  { %5951 = vmatprep.mubr.f32.mxu1 %v495_v49  ;;  %6031 = vmatprep.mubr.f32.mxu0 %v495_v49  ;;  %v1470_v49 = vld [vmem:[#allocation8 + $0xc0] sm:$0xff] }
 0x148   :  { %1150 = vmatpush1.msra.mxu1 %v1086_v52  ;;  %v1786_v52 = vld [vmem:[#allocation10 + $0x98] sm:$0xff]  ;;  %1517 = vmatpush1.msra.mxu0 %v1470_v49  ;;  %v1829_v49 = vld [vmem:[#allocation10 + $0x1f0] sm:$0xff] }
 0x149   :  { %1151 = vmatprep.subr.mxu1 %v1085_v55  ;;  %1518 = vmatprep.subr.mxu0 %v1469_v51 }
 0x14a   :  { %5952 = vmatmul.mubr.f32.gmra.mxu1 %v496_v53  ;;  %6032 = vmatmul.mubr.f32.gmra.mxu0 %v496_v53 }
 0x14b   :  { %5954 = vmatprep.mubr.f32.mxu1 %v497_v56  ;;  %6034 = vmatprep.mubr.f32.mxu0 %v497_v56  ;;  %v1785_v56 = vld [vmem:[#allocation10 + $0x90] sm:$0xff] }
 0x14c   :  { %1152 = vmatpush1.msra.mxu1 %v1084_v58  ;;  %1519 = vmatpush1.msra.mxu0 %v1468_v60  ;;  %v1825_v60 = vld [vmem:[#allocation10 + $0x1d0] sm:$0xff] }
 0x14d   :  { %1153 = vmatprep.subr.mxu1 %v1083_v63  ;;  %v1782_v63 = vld [vmem:[#allocation10 + $0x78] sm:$0xff] }
 0x14e   :  { %5955 = vmatmul.mubr.f32.gmra.mxu1 %v498_v59  ;;  %6035 = vmatmul.mubr.f32.gmra.mxu0 %v498_v59  ;;  %v1784_v59 = vld [vmem:[#allocation10 + $0x88] sm:$0xff] }
 0x14f   :  { %5957 = vmatprep.mubr.f32.mxu1 %v499_v61  ;;  %6037 = vmatprep.mubr.f32.mxu0 %v499_v61  ;;  %v1783_v61 = vld [vmem:[#allocation10 + $0x80] sm:$0xff] }
 0x150   :  { %1154 = vmatpush1.msra.mxu1 %v1082_v2 }
 0x151   :  { %1155 = vmatprep.subr.mxu1 %v1081_v0 }
 0x152   :  { %5958 = vmatmul.mubr.f32.gmra.mxu1 %v500_v62  ;;  %6038 = vmatmul.mubr.f32.gmra.mxu0 %v500_v62  ;;  %v1467_v62 = vld [vmem:[#allocation8 + $0xa8] sm:$0xff] }
 0x153   :  { %1156 = vmatpush1.msra.mxu1 %v1080_v1  ;;  %1189 = vmatprep.mubr.f32.mxu1 %v6218_v3 }
 0x154   :  { %1831 = vmatprep.subr.mxu1 %v1798_v4  ;;  %v1781_v4 = vld [vmem:[#allocation10 + $0x70] sm:$0xff]  ;;  %1520 = vmatprep.subr.mxu0 %v1467_v62 }
 0x1d6   :  { %v5914_v5 = vpop.f32.mrf.mxu1  ;;  %v5994_v6 = vpop.f32.mrf.mxu0 }
 0x1d7   :  { %v984_v9 = vmax.f32 %v5914_v5, %v5994_v6 }
 0x1d8   :  { %v583_v7 = vpop.f32.mrf.mxu1  ;;  %v824_v8 = vpop.f32.mrf.mxu0 }
 0x1d9   :  { %v983_v10 = vmax.f32 %v583_v7, %v824_v8  ;;  %v1017_v17 = vadd.f32 %v6585_v11, %v984_v9  ;;  %v1780_v7 = vld [vmem:[#allocation10 + $0x68] sm:$0xff]  ;;  %v1466_v8 = vld [vmem:[#allocation8 + $0xa0] sm:$0xff] }
 0x1da   :  { %v5917_v12 = vpop.f32.mrf.mxu1  ;;  %v5997_v13 = vpop.f32.mrf.mxu0  ;;  %v1779_v9 = vld [vmem:[#allocation10 + $0x60] sm:$0xff]  ;;  %1521 = vmatpush1.msra.mxu0 %v1466_v8  ;;  %v1821_v8 = vld [vmem:[#allocation10 + $0x1b0] sm:$0xff] }
 0x1db   :  { %v1016_v14 = vadd.f32 %v6585_v11, %v983_v10  ;;  %v1049_v31 = vmax.f32 %v1017_v17, 0.0  ;;  %v986_v32 = vmax.f32 %v5917_v12, %v5997_v13  ;;  %v1465_v10 = vld [vmem:[#allocation8 + $0x98] sm:$0xff] }
 0x1dc   :  { %v593_v15 = vpop.f32.mrf.mxu1  ;;  %v834_v16 = vpop.f32.mrf.mxu0  ;;  %v1778_v12 = vld [vmem:[#allocation10 + $0x58] sm:$0xff]  ;;  %1522 = vmatprep.subr.mxu0 %v1465_v10 }
 0x1dd   :  { %v1048_v19 = vmax.f32 %v1016_v14, 0.0  ;;  %v985_v20 = vmax.f32 %v593_v15, %v834_v16  ;;  %v1019_v42 = vadd.f32 %v6585_v11, %v986_v32  ;;  %v1777_v16 = vld [vmem:[#allocation10 + $0x50] sm:$0xff]  ;;  %v1771_v32 = vld [vmem:[#allocation10 + $0x20] sm:$0xff] }
 0x1de   :  { %v6589_v23 = vpop.f32.mrf.mxu1  ;;  %v6591_v24 = vpop.f32.mrf.mxu0 }
 0x1df   :  { %1190 = vmatmul.mubr.f32.vlgmr.msra.gmra.mxu1 %v1048_v19  ;;  %v1018_v33 = vadd.f32 %v6585_v11, %v985_v20  ;;  %v1051_v53 = vmax.f32 %v1019_v42, 0.0  ;;  %v988_v54 = vmax.f32 %v6589_v23, %v6591_v24  ;;  %v1776_v19 = vld [vmem:[#allocation10 + $0x48] sm:$0xff]  ;;  %v1464_v20 = vld [vmem:[#allocation8 + $0x90] sm:$0xff]  ;;  %v1774_v23 = vld [vmem:[#allocation10 + $0x38] sm:$0xff] }
 0x1e0   :  { %1195 = vmatprep.mubr.f32.mxu1 %v6218_v3  ;;  %1832 = vmatpush1.msra.mxu1 %v1797_v21  ;;  %v603_v35 = vpop.f32.mrf.mxu1  ;;  %v844_v36 = vpop.f32.mrf.mxu0  ;;  %v1775_v21 = vld [vmem:[#allocation10 + $0x40] sm:$0xff]  ;;  %v1460_v42 = vld [vmem:[#allocation8 + $0x70] sm:$0xff] }
 0x1e1   :  { %1833 = vmatprep.subr.mxu1 %v1796_v25  ;;  %v987_v43 = vmax.f32 %v603_v35, %v844_v36  ;;  %v1050_v44 = vmax.f32 %v1018_v33, 0.0  ;;  %v1021_v2 = vadd.f32 %v6585_v11, %v988_v54  ;;  %1523 = vmatpush1.msra.mxu0 %v1464_v20  ;;  %v1461_v33 = vld [vmem:[#allocation8 + $0x78] sm:$0xff]  ;;  %v1827_v54 = vld [vmem:[#allocation10 + $0x1e0] sm:$0xff]  ;;  %v1452_v20 = vld [vmem:[#allocation8 + $0x30] sm:$0xff] }
 0x1e2   :  { %1834 = vmatpush1.msra.mxu1 %v1795_v28  ;;  %v6597_v46 = vpop.f32.mrf.mxu1  ;;  %v6599_v47 = vpop.f32.mrf.mxu0  ;;  %1524 = vmatprep.subr.mxu0 %v1463_v22 }
 0x1e3   :  { %1196 = vmatmul.mubr.f32.gmra.mxu1 %v1049_v31  ;;  %1835 = vmatprep.subr.mxu1 %v1794_v30  ;;  %v1020_v55 = vadd.f32 %v6585_v11, %v987_v43  ;;  %v1053_v13 = vmax.f32 %v1021_v2, 0.0  ;;  %v990_v14 = vmax.f32 %v6597_v46, %v6599_v47  ;;  %v1772_v30 = vld [vmem:[#allocation10 + $0x28] sm:$0xff]  ;;  %v1462_v31 = vld [vmem:[#allocation8 + $0x80] sm:$0xff]  ;;  %v1456_v2 = vld [vmem:[#allocation8 + $0x50] sm:$0xff] }
 0x1e4   :  { %1201 = vmatprep.mubr.f32.mxu1 %v6218_v3  ;;  %1836 = vmatpush1.msra.mxu1 %v1793_v34  ;;  %v613_v57 = vpop.f32.mrf.mxu1  ;;  %v854_v58 = vpop.f32.mrf.mxu0  ;;  %v1770_v34 = vld [vmem:[#allocation10 + $0x18] sm:$0xff]  ;;  %v1767_v43 = vld [vmem:[#allocation10] sm:$0xff] }
 0x1e5   :  { %1837 = vmatprep.subr.mxu1 %v1792_v37  ;;  %v989_v0 = vmax.f32 %v613_v57, %v854_v58  ;;  %v1052_v1 = vmax.f32 %v1020_v55, 0.0  ;;  %v1023_v24 = vadd.f32 %v6585_v11, %v990_v14  ;;  %1525 = vmatpush1.msra.mxu0 %v1462_v31  ;;  %v1457_v55 = vld [vmem:[#allocation8 + $0x58] sm:$0xff]  ;;  %v1819_v14 = vld [vmem:[#allocation10 + $0x1a0] sm:$0xff]  ;;  %v1448_v31 = vld [vmem:[#allocation8 + $0x10] sm:$0xff] }
 0x1e6   :  { %1838 = vmatpush1.msra.mxu1 %v1791_v39  ;;  %v6607_v5 = vpop.f32.mrf.mxu1  ;;  %v6609_v6 = vpop.f32.mrf.mxu0  ;;  %1526 = vmatprep.subr.mxu0 %v1461_v33 }
 0x1e7   :  { %1202 = vmatmul.mubr.f32.gmra.mxu1 %v1050_v44  ;;  %1839 = vmatprep.subr.mxu1 %v1790_v41  ;;  %v1022_v15 = vadd.f32 %v6585_v11, %v989_v0  ;;  %v1055_v35 = vmax.f32 %v1023_v24, 0.0  ;;  %v992_v36 = vmax.f32 %v6607_v5, %v6609_v6  ;;  %v1768_v41 = vld [vmem:[#allocation10 + $0x8] sm:$0xff]  ;;  %v1823_v0 = vld [vmem:[#allocation10 + $0x1c0] sm:$0xff] }
 0x1e8   :  { %1207 = vmatprep.mubr.f32.mxu1 %v6218_v3  ;;  %1840 = vmatpush1.msra.mxu1 %v1789_v45  ;;  %v623_v18 = vpop.f32.mrf.mxu1  ;;  %v864_v17 = vpop.f32.mrf.mxu0  ;;  %v1459_v44 = vld [vmem:[#allocation8 + $0x68] sm:$0xff]  ;;  %v1830_v45 = vld [vmem:[#allocation10 + $0x1f8] sm:$0xff] }
 0x1e9   :  { %1841 = vmatprep.subr.mxu1 %v1788_v48  ;;  %v991_v25 = vmax.f32 %v623_v18, %v864_v17  ;;  %v1054_v26 = vmax.f32 %v1022_v15, 0.0  ;;  %v1025_v46 = vadd.f32 %v6585_v11, %v992_v36  ;;  %1527 = vmatpush1.msra.mxu0 %v1460_v42  ;;  %v1453_v15 = vld [vmem:[#allocation8 + $0x38] sm:$0xff]  ;;  %v1451_v24 = vld [vmem:[#allocation8 + $0x28] sm:$0xff]  ;;  %v1446_v36 = vld [vmem:[#allocation8] sm:$0xff] }
 0x1ea   :  { %1842 = vmatpush1.msra.mxu1 %v1787_v50  ;;  %v6617_v28 = vpop.f32.mrf.mxu1  ;;  %v6619_v29 = vpop.f32.mrf.mxu0  ;;  %1528 = vmatprep.subr.mxu0 %v1459_v44  ;;  %v1508_v42 = vld [vmem:[#allocation8 + $0x1f0] sm:$0xff] }
 0x1eb   :  { %1208 = vmatmul.mubr.f32.gmra.mxu1 %v1051_v53  ;;  %1843 = vmatprep.subr.mxu1 %v1786_v52  ;;  %v1024_v37 = vadd.f32 %v6585_v11, %v991_v25  ;;  %v1828_v52 = vld [vmem:[#allocation10 + $0x1e8] sm:$0xff]  ;;  %v1458_v53 = vld [vmem:[#allocation8 + $0x60] sm:$0xff]  ;;  %v1057_v57 = vmax.f32 %v1025_v46, 0.0  ;;  %v994_v58 = vmax.f32 %v6617_v28, %v6619_v29 }
 0x1ec   :  { %1213 = vmatprep.mubr.f32.mxu1 %v6218_v3  ;;  %1844 = vmatpush1.msra.mxu1 %v1785_v56  ;;  %v633_v39 = vpop.f32.mrf.mxu1  ;;  %v874_v40 = vpop.f32.mrf.mxu0  ;;  %v1826_v56 = vld [vmem:[#allocation10 + $0x1d8] sm:$0xff]  ;;  %v1450_v25 = vld [vmem:[#allocation8 + $0x20] sm:$0xff]  ;;  %v1507_v46 = vld [vmem:[#allocation8 + $0x1e8] sm:$0xff] }
 0x1ed   :  { %1845 = vmatprep.subr.mxu1 %v1784_v59  ;;  %v993_v47 = vmax.f32 %v633_v39, %v874_v40  ;;  %v1056_v48 = vmax.f32 %v1024_v37, 0.0  ;;  %1529 = vmatpush1.msra.mxu0 %v1458_v53  ;;  %v1027_v5 = vadd.f32 %v6585_v11, %v994_v58  ;;  %v1814_v37 = vld [vmem:[#allocation10 + $0x178] sm:$0xff]  ;;  %v1504_v53 = vld [vmem:[#allocation8 + $0x1d0] sm:$0xff]  ;;  %v1502_v58 = vld [vmem:[#allocation8 + $0x1c0] sm:$0xff] }
 0x1ee   :  { %1846 = vmatpush1.msra.mxu1 %v1783_v61  ;;  %v6627_v50 = vpop.f32.mrf.mxu1  ;;  %v6629_v51 = vpop.f32.mrf.mxu0  ;;  %1530 = vmatprep.subr.mxu0 %v1457_v55 }
 0x1ef   :  { %1214 = vmatmul.mubr.f32.gmra.mxu1 %v1052_v1  ;;  %1847 = vmatprep.subr.mxu1 %v1782_v63  ;;  %v1026_v59 = vadd.f32 %v6585_v11, %v993_v47  ;;  %v1824_v63 = vld [vmem:[#allocation10 + $0x1c8] sm:$0xff]  ;;  %v1059_v18 = vmax.f32 %v1027_v5, 0.0  ;;  %v996_v17 = vmax.f32 %v6627_v50, %v6629_v51  ;;  %v1506_v47 = vld [vmem:[#allocation8 + $0x1e0] sm:$0xff] }
 0x1f0   :  { %1219 = vmatprep.mubr.f32.mxu1 %v6218_v3  ;;  %1848 = vmatpush1.msra.mxu1 %v1781_v4  ;;  %v643_v61 = vpop.f32.mrf.mxu1  ;;  %v884_v62 = vpop.f32.mrf.mxu0  ;;  %v1455_v1 = vld [vmem:[#allocation8 + $0x48] sm:$0xff]  ;;  %v1822_v4 = vld [vmem:[#allocation10 + $0x1b8] sm:$0xff] }
 0x1f1   :  { %1849 = vmatprep.subr.mxu1 %v1780_v7  ;;  %v995_v6 = vmax.f32 %v643_v61, %v884_v62  ;;  %v1058_v7 = vmax.f32 %v1026_v59, 0.0  ;;  %1531 = vmatpush1.msra.mxu0 %v1456_v2  ;;  %v1029_v28 = vadd.f32 %v6585_v11, %v996_v17  ;;  %v1810_v59 = vld [vmem:[#allocation10 + $0x158] sm:$0xff]  ;;  %v1500_v2 = vld [vmem:[#allocation8 + $0x1b0] sm:$0xff]  ;;  %v1499_v5 = vld [vmem:[#allocation8 + $0x1a8] sm:$0xff] }
 0x1f2   :  { %1850 = vmatpush1.msra.mxu1 %v1779_v9  ;;  %v6637_v9 = vpop.f32.mrf.mxu1  ;;  %v6639_v10 = vpop.f32.mrf.mxu0  ;;  %1532 = vmatprep.subr.mxu0 %v1455_v1  ;;  %v1494_v17 = vld [vmem:[#allocation8 + $0x180] sm:$0xff] }
 0x1f3   :  { %1220 = vmatmul.mubr.f32.gmra.mxu1 %v1053_v13  ;;  %1851 = vmatprep.subr.mxu1 %v1778_v12  ;;  %v1820_v12 = vld [vmem:[#allocation10 + $0x1a8] sm:$0xff]  ;;  %v1454_v13 = vld [vmem:[#allocation8 + $0x40] sm:$0xff]  ;;  %v1061_v39 = vmax.f32 %v1029_v28, 0.0  ;;  %v998_v40 = vmax.f32 %v6637_v9, %v6639_v10 }
 0x1f4   :  { %1225 = vmatprep.mubr.f32.mxu1 %v6218_v3  ;;  %1852 = vmatpush1.msra.mxu1 %v1777_v16  ;;  %v1818_v16 = vld [vmem:[#allocation10 + $0x198] sm:$0xff]  ;;  %v894_v22 = vpop.f32.mrf.mxu0  ;;  %v1491_v28 = vld [vmem:[#allocation8 + $0x168] sm:$0xff] }
 0x1f5   :  { %1853 = vmatprep.subr.mxu1 %v1776_v19  ;;  %v1028_v19 = vadd.f32 %v6585_v11, %v995_v6  ;;  %1533 = vmatpush1.msra.mxu0 %v1454_v13  ;;  %v1031_v50 = vadd.f32 %v6585_v11, %v998_v40  ;;  %v1498_v6 = vld [vmem:[#allocation8 + $0x1a0] sm:$0xff]  ;;  %v1496_v13 = vld [vmem:[#allocation8 + $0x190] sm:$0xff] }
 0x1f6   :  { %1854 = vmatpush1.msra.mxu1 %v1775_v21  ;;  %v653_v21 = vpop.f32.mrf.mxu1  ;;  %1534 = vmatprep.subr.mxu0 %v1453_v15  ;;  %v6649_v33 = vpop.f32.mrf.mxu0  ;;  %v1486_v40 = vld [vmem:[#allocation8 + $0x140] sm:$0xff] }
 0x1f7   :  { %1226 = vmatmul.mubr.f32.gmra.mxu1 %v1054_v26  ;;  %1855 = vmatprep.subr.mxu1 %v1774_v23  ;;  %v1817_v23 = vld [vmem:[#allocation10 + $0x190] sm:$0xff]  ;;  %v1816_v26 = vld [vmem:[#allocation10 + $0x188] sm:$0xff]  ;;  %v997_v29 = vmax.f32 %v653_v21, %v894_v22  ;;  %v1063_v61 = vmax.f32 %v1031_v50, 0.0 }
 0x1f8   :  { %1231 = vmatprep.mubr.f32.mxu1 %v6218_v3  ;;  %1856 = vmatpush1.msra.mxu1 %v1773_v27  ;;  %v1449_v27 = vld [vmem:[#allocation8 + $0x18] sm:$0xff]  ;;  %v904_v44 = vpop.f32.mrf.mxu0  ;;  %v1483_v50 = vld [vmem:[#allocation8 + $0x128] sm:$0xff] }
 0x1f9   :  { %1857 = vmatprep.subr.mxu1 %v1772_v30  ;;  %1535 = vmatpush1.msra.mxu0 %v1452_v20  ;;  %v1060_v30 = vmax.f32 %v1028_v19, 0.0  ;;  %v1806_v19 = vld [vmem:[#allocation10 + $0x138] sm:$0xff] }
 0x1fa   :  { %1858 = vmatpush1.msra.mxu1 %v1771_v32  ;;  %1536 = vmatprep.subr.mxu0 %v1451_v24  ;;  %v6647_v32 = vpop.f32.mrf.mxu1  ;;  %v6659_v55 = vpop.f32.mrf.mxu0  ;;  %v1493_v20 = vld [vmem:[#allocation8 + $0x178] sm:$0xff]  ;;  %v1492_v24 = vld [vmem:[#allocation8 + $0x170] sm:$0xff] }
 0x1fb   :  { %1232 = vmatmul.mubr.f32.gmra.mxu1 %v1055_v35  ;;  %1859 = vmatprep.subr.mxu1 %v1770_v34  ;;  %v1815_v34 = vld [vmem:[#allocation10 + $0x180] sm:$0xff]  ;;  %v1447_v35 = vld [vmem:[#allocation8 + $0x8] sm:$0xff]  ;;  %v1000_v62 = vmax.f32 %v6647_v32, %v6649_v33 }
 0x1fc   :  { %1237 = vmatprep.mubr.f32.mxu1 %v6218_v3  ;;  %1860 = vmatpush1.msra.mxu1 %v1769_v38  ;;  %v1509_v38 = vld [vmem:[#allocation8 + $0x1f8] sm:$0xff]  ;;  %v914_v1 = vpop.f32.mrf.mxu0 }
 0x1fd   :  { %1861 = vmatprep.subr.mxu1 %v1768_v41  ;;  %1537 = vmatpush1.msra.mxu0 %v1450_v25  ;;  %v1030_v41 = vadd.f32 %v6585_v11, %v997_v29  ;;  %v1033_v9 = vadd.f32 %v6585_v11, %v1000_v62  ;;  %v1490_v29 = vld [vmem:[#allocation8 + $0x160] sm:$0xff] }
 0x1fe   :  { %1862 = vmatpush1.msra.mxu1 %v1767_v43  ;;  %1538 = vmatprep.subr.mxu0 %v1449_v27  ;;  %v663_v43 = vpop.f32.mrf.mxu1  ;;  %v6669_v15 = vpop.f32.mrf.mxu0  ;;  %v1805_v27 = vld [vmem:[#allocation10 + $0x130] sm:$0xff]  ;;  %v1478_v62 = vld [vmem:[#allocation8 + $0x100] sm:$0xff] }
 0x1ff   :  { %1238 = vmatmul.mubr.f32.gmra.mxu1 %v1056_v48  ;;  %1863 = vmatprep.subr.mxu1 %v1830_v45  ;;  %v1813_v45 = vld [vmem:[#allocation10 + $0x170] sm:$0xff]  ;;  %v1812_v48 = vld [vmem:[#allocation10 + $0x168] sm:$0xff]  ;;  %v999_v51 = vmax.f32 %v663_v43, %v904_v44  ;;  %v1065_v21 = vmax.f32 %v1033_v9, 0.0 }
 0x200   :  { %1243 = vmatprep.mubr.f32.mxu1 %v6218_v3  ;;  %1864 = vmatpush2.msra.mxu1 %v1829_v49  ;;  %v1505_v49 = vld [vmem:[#allocation8 + $0x1d8] sm:$0xff] }
 0x201   :  { %1865 = vmatprep.subr.mxu1 %v1828_v52  ;;  %1539 = vmatpush1.msra.mxu0 %v1448_v31  ;;  %v1062_v52 = vmax.f32 %v1030_v41, 0.0  ;;  %v1489_v31 = vld [vmem:[#allocation8 + $0x158] sm:$0xff] }
 0x202   :  { %1866 = vmatpush2.msra.mxu1 %v1827_v54  ;;  %1540 = vmatprep.subr.mxu0 %v1447_v35  ;;  %v6657_v54 = vpop.f32.mrf.mxu1  ;;  %v1488_v35 = vld [vmem:[#allocation8 + $0x150] sm:$0xff]  ;;  %v1802_v41 = vld [vmem:[#allocation10 + $0x118] sm:$0xff] }
 0x203   :  { %1244 = vmatmul.mubr.f32.gmra.mxu1 %v1057_v57  ;;  %1867 = vmatprep.subr.mxu1 %v1826_v56  ;;  %v1811_v56 = vld [vmem:[#allocation10 + $0x160] sm:$0xff]  ;;  %v1503_v57 = vld [vmem:[#allocation8 + $0x1c8] sm:$0xff]  ;;  %v1002_v22 = vmax.f32 %v6657_v54, %v6659_v55 }
 0x204   :  { %1249 = vmatprep.mubr.f32.mxu1 %v6218_v3  ;;  %1868 = vmatpush2.msra.mxu1 %v1825_v60  ;;  %v1501_v60 = vld [vmem:[#allocation8 + $0x1b8] sm:$0xff] }
 0x205   :  { %1869 = vmatprep.subr.mxu1 %v1824_v63  ;;  %1541 = vmatpush1.msra.mxu0 %v1446_v36  ;;  %v1032_v63 = vadd.f32 %v6585_v11, %v999_v51  ;;  %v1035_v32 = vadd.f32 %v6585_v11, %v1002_v22  ;;  %v1482_v51 = vld [vmem:[#allocation8 + $0x120] sm:$0xff] }
 0x206   :  { %1870 = vmatpush2.msra.mxu1 %v1823_v0  ;;  %1542 = vmatprep.subr.mxu0 %v1509_v38  ;;  %v673_v0 = vpop.f32.mrf.mxu1  ;;  %v1803_v38 = vld [vmem:[#allocation10 + $0x120] sm:$0xff] }
 0x207   :  { %1250 = vmatmul.mubr.f32.gmra.mxu1 %v1058_v7  ;;  %1871 = vmatprep.subr.mxu1 %v1822_v4  ;;  %v1809_v4 = vld [vmem:[#allocation10 + $0x150] sm:$0xff]  ;;  %v1808_v7 = vld [vmem:[#allocation10 + $0x148] sm:$0xff]  ;;  %v1001_v10 = vmax.f32 %v673_v0, %v914_v1  ;;  %v1067_v43 = vmax.f32 %v1035_v32, 0.0 }
 0x208   :  { %1255 = vmatprep.mubr.f32.mxu1 %v6218_v3  ;;  %1872 = vmatpush2.msra.mxu1 %v1821_v8  ;;  %v1497_v8 = vld [vmem:[#allocation8 + $0x198] sm:$0xff] }
 0x209   :  { %1873 = vmatprep.subr.mxu1 %v1820_v12  ;;  %1543 = vmatpush2.msra.mxu0 %v1508_v42  ;;  %v1064_v12 = vmax.f32 %v1032_v63, 0.0  ;;  %v1485_v42 = vld [vmem:[#allocation8 + $0x138] sm:$0xff] }
 0x20a   :  { %1874 = vmatpush2.msra.mxu1 %v1819_v14  ;;  %1544 = vmatprep.subr.mxu0 %v1507_v46  ;;  %v6667_v14 = vpop.f32.mrf.mxu1  ;;  %v1484_v46 = vld [vmem:[#allocation8 + $0x130] sm:$0xff] }
 0x20b   :  { %1256 = vmatmul.mubr.f32.gmra.mxu1 %v1059_v18  ;;  %1875 = vmatprep.subr.mxu1 %v1818_v16  ;;  %v1807_v16 = vld [vmem:[#allocation10 + $0x140] sm:$0xff]  ;;  %v1495_v18 = vld [vmem:[#allocation8 + $0x188] sm:$0xff]  ;;  %v1004_v44 = vmax.f32 %v6667_v14, %v6669_v15 }
 0x20c   :  { %1261 = vmatprep.mubr.f32.mxu1 %v6218_v3  ;;  %1876 = vmatpush2.msra.mxu1 %v1817_v23  ;;  %v1034_v23 = vadd.f32 %v6585_v11, %v1001_v10  ;;  %v683_v25 = vpop.f32.mrf.mxu1 }
 0x20d   :  { %1877 = vmatprep.subr.mxu1 %v1816_v26  ;;  %1545 = vmatpush2.msra.mxu0 %v1506_v47  ;;  %v924_v26 = vpop.f32.mrf.mxu0  ;;  %v1037_v54 = vadd.f32 %v6585_v11, %v1004_v44 }
 0x20e   :  { %1878 = vmatpush2.msra.mxu1 %v1815_v34  ;;  %1546 = vmatprep.subr.mxu0 %v1505_v49  ;;  %v1003_v33 = vmax.f32 %v683_v25, %v924_v26  ;;  %v1066_v34 = vmax.f32 %v1034_v23, 0.0  ;;  %v5947_v36 = vpop.f32.mrf.mxu1  ;;  %v1801_v49 = vld [vmem:[#allocation10 + $0x110] sm:$0xff] }
 0x20f   :  { %1262 = vmatmul.mubr.f32.gmra.mxu1 %v1060_v30  ;;  %1879 = vmatprep.subr.mxu1 %v1814_v37  ;;  %v1804_v30 = vld [vmem:[#allocation10 + $0x128] sm:$0xff]  ;;  %v6027_v37 = vpop.f32.mrf.mxu0  ;;  %v1069_v63 = vmax.f32 %v1037_v54, 0.0 }
 0x210   :  { %1267 = vmatprep.mubr.f32.mxu1 %v6218_v3  ;;  %1880 = vmatpush2.msra.mxu1 %v1813_v45  ;;  %v1036_v45 = vadd.f32 %v6585_v11, %v1003_v33  ;;  %v693_v47 = vpop.f32.mrf.mxu1 }
 0x211   :  { %1881 = vmatprep.subr.mxu1 %v1812_v48  ;;  %1547 = vmatpush2.msra.mxu0 %v1504_v53  ;;  %v934_v48 = vpop.f32.mrf.mxu0  ;;  %v1481_v53 = vld [vmem:[#allocation8 + $0x118] sm:$0xff] }
 0x212   :  { %1882 = vmatpush2.msra.mxu1 %v1811_v56  ;;  %1548 = vmatprep.subr.mxu0 %v1503_v57  ;;  %v1005_v55 = vmax.f32 %v693_v47, %v934_v48  ;;  %v1068_v56 = vmax.f32 %v1036_v45, 0.0  ;;  %v1480_v57 = vld [vmem:[#allocation8 + $0x110] sm:$0xff]  ;;  %v1115_v45 = vlaneseq  ;;  %v5699_v48 = vld [vmem:[%s7862_s8 + $0x2] ss:$8 sm:$0x3] }
 0x213   :  { %1268 = vmatmul.mubr.f32.gmra.mxu1 %v1061_v39  ;;  %1549 = vmatpush2.msra.mxu0 %v1502_v58  ;;  %v1487_v39 = vld [vmem:[#allocation8 + $0x148] sm:$0xff]  ;;  %v5950_v58 = vpop.f32.mrf.mxu1 }
 0x214   :  { %1273 = vmatprep.mubr.f32.mxu1 %v6218_v3  ;;  %1883 = vmatprep.subr.mxu1 %v1810_v59  ;;  %v6030_v59 = vpop.f32.mrf.mxu0  ;;  %v1038_v0 = vadd.f32 %v6585_v11, %v1005_v55  ;;  %vm5646_vm0 = vcmp.lt.s32.totalorder %v1115_v45, 256 }
 0x215   :  { %1550 = vmatprep.subr.mxu0 %v1501_v60  ;;  %1884 = vmatpush2.msra.mxu1 %v1809_v4  ;;  %v1799_v60 = vld [vmem:[#allocation10 + $0x100] sm:$0xff]  ;;  %v703_v1 = vpop.f32.mrf.mxu1 }
 0x216   :  { %1551 = vmatpush2.msra.mxu0 %v1500_v2  ;;  %1885 = vmatprep.subr.mxu1 %v1808_v7  ;;  %v1006_v2 = vmax.f32 %v5947_v36, %v6027_v37  ;;  %v944_v4 = vpop.f32.mrf.mxu0  ;;  %v1070_v7 = vmax.f32 %v1038_v0, 0.0 }
 0x217   :  { %1274 = vmatmul.mubr.f32.gmra.mxu1 %v1062_v52  ;;  %1552 = vmatprep.subr.mxu0 %v1499_v5  ;;  %v1800_v52 = vld [vmem:[#allocation10 + $0x108] sm:$0xff] }
 0x218   :  { %1279 = vmatprep.mubr.f32.mxu1 %v6218_v3  ;;  %1553 = vmatpush2.msra.mxu0 %v1498_v6  ;;  %v1039_v5 = vadd.f32 %v6585_v11, %v1006_v2  ;;  %v1007_v6 = vmax.f32 %v703_v1, %v944_v4  ;;  %v6033_v9 = vpop.f32.mrf.mxu0  ;;  %v2307_v4 = vld [vmem:[#allocation11 + $0x70] sm:$0xff] }
 0x219   :  { %1554 = vmatprep.subr.mxu0 %v1497_v8  ;;  %1886 = vmatpush2.msra.mxu1 %v1807_v16  ;;  %v5953_v8 = vpop.f32.mrf.mxu1 }
 0x21a   :  { %1555 = vmatpush2.msra.mxu0 %v1496_v13  ;;  %1887 = vmatprep.subr.mxu1 %v1806_v19  ;;  %v1071_v10 = vmax.f32 %v1039_v5, 0.0  ;;  %v1040_v13 = vadd.f32 %v6585_v11, %v1007_v6  ;;  %v954_v15 = vpop.f32.mrf.mxu0  ;;  %v1010_v22 = vmax.f32 %v5953_v8, %v6033_v9 }
 0x21b   :  { %1280 = vmatmul.mubr.f32.gmra.mxu1 %v1063_v61  ;;  %1556 = vmatprep.subr.mxu0 %v1495_v18  ;;  %v1479_v61 = vld [vmem:[#allocation8 + $0x108] sm:$0xff]  ;;  %v713_v14 = vpop.f32.mrf.mxu1 }
 0x21c   :  { %1285 = vmatprep.mubr.f32.mxu1 %v6218_v3  ;;  %1557 = vmatpush2.msra.mxu0 %v1494_v17  ;;  %v1009_v18 = vmax.f32 %v713_v14, %v954_v15  ;;  %v1072_v17 = vmax.f32 %v1040_v13, 0.0  ;;  %v1043_v26 = vadd.f32 %v6585_v11, %v1010_v22 }
 0x21d   :  { %1558 = vmatprep.subr.mxu0 %v1493_v20  ;;  %1888 = vmatpush2.msra.mxu1 %v1805_v27  ;;  %v5956_v19 = vpop.f32.mrf.mxu1  ;;  %v6036_v20 = vpop.f32.mrf.mxu0 }
 0x21e   :  { %1559 = vmatpush2.msra.mxu0 %v1492_v24  ;;  %1889 = vmatprep.subr.mxu1 %v1804_v30  ;;  %v1042_v23 = vadd.f32 %v6585_v11, %v1009_v18  ;;  %v1012_v32 = vmax.f32 %v5956_v19, %v6036_v20  ;;  %v2305_v19 = vld [vmem:[#allocation11 + $0x60] sm:$0xff] }
 0x21f   :  { %1286 = vmatmul.mubr.f32.gmra.mxu1 %v1064_v12  ;;  %1560 = vmatprep.subr.mxu0 %v1491_v28  ;;  %v1008_v12 = vmax.f32 %v5950_v58, %v6030_v59  ;;  %v723_v24 = vpop.f32.mrf.mxu1  ;;  %v964_v25 = vpop.f32.mrf.mxu0 }
 0x220   :  { %1291 = vmatprep.mubr.f32.mxu1 %v6218_v3  ;;  %1561 = vmatpush2.msra.mxu0 %v1490_v29  ;;  %v1011_v27 = vmax.f32 %v723_v24, %v964_v25  ;;  %v1074_v28 = vmax.f32 %v1042_v23, 0.0  ;;  %v1045_v36 = vadd.f32 %v6585_v11, %v1012_v32 }
 0x221   :  { %1562 = vmatprep.subr.mxu0 %v1489_v31  ;;  %1890 = vmatpush2.msra.mxu1 %v1803_v38  ;;  %v1041_v16 = vadd.f32 %v6585_v11, %v1008_v12  ;;  %v5959_v29 = vpop.f32.mrf.mxu1  ;;  %v6039_v30 = vpop.f32.mrf.mxu0  ;;  %v1075_v31 = vmax.f32 %v1043_v26, 0.0  ;;  %v2306_v12 = vld [vmem:[#allocation11 + $0x68] sm:$0xff]  ;;  %v2304_v26 = vld [vmem:[#allocation11 + $0x58] sm:$0xff] }
 0x222   :  { %1563 = vmatpush2.msra.mxu0 %v1488_v35  ;;  %1891 = vmatprep.subr.mxu1 %v1802_v41  ;;  %v1044_v33 = vadd.f32 %v6585_v11, %v1011_v27 }
 0x223   :  { %1292 = vmatmul.mubr.f32.gmra.mxu1 %v1065_v21  ;;  %1564 = vmatprep.subr.mxu0 %v1487_v39  ;;  %v1073_v21 = vmax.f32 %v1041_v16, 0.0  ;;  %v974_v35 = vpop.f32.mrf.mxu0  ;;  %v1077_v39 = vmax.f32 %v1045_v36, 0.0 }
 0x224   :  { %1297 = vmatprep.mubr.f32.mxu1 %v6218_v3  ;;  %1565 = vmatpush2.msra.mxu0 %v1486_v40  ;;  %v1076_v38 = vmax.f32 %v1044_v33, 0.0  ;;  %v1014_v40 = vmax.f32 %v5959_v29, %v6039_v30  ;;  %v2303_v33 = vld [vmem:[#allocation11 + $0x50] sm:$0xff] }
 0x225   :  { %1566 = vmatprep.subr.mxu0 %v1485_v42  ;;  %1892 = vmatpush2.msra.mxu1 %v1801_v49 }
 0x226   :  { %1567 = vmatpush2.msra.mxu0 %v1484_v46  ;;  %1893 = vmatprep.subr.mxu1 %v1800_v52  ;;  %v1047_v42 = vadd.f32 %v6585_v11, %v1014_v40  ;;  %v6706_v46 = vshrl.u32 %v1115_v45, 7  ;;  %v2302_v40 = vld [vmem:[#allocation11 + $0x48] sm:$0xff] }
 0x227   :  { %1298 = vmatmul.mubr.f32.gmra.mxu1 %v1066_v34  ;;  %1568 = vmatprep.subr.mxu0 %v1483_v50  ;;  %v733_v34 = vpop.f32.mrf.mxu1 }
 0x228   :  { %1303 = vmatprep.mubr.f32.mxu1 %v6218_v3  ;;  %1569 = vmatpush2.msra.mxu0 %v1482_v51  ;;  %v1013_v37 = vmax.f32 %v733_v34, %v974_v35  ;;  %v1079_v44 = vmax.f32 %v1047_v42, 0.0  ;;  %v6709_v47 = vsub.s32 0, %v6706_v46  ;;  %v6715_v49 = vsub.s32 1, %v6706_v46 }
 0x229   :  { %1570 = vmatprep.subr.mxu0 %v1481_v53  ;;  %1894 = vmatpush2.msra.mxu1 %v1799_v60  ;;  %v2308_v60 = vld [vmem:[#allocation11 + $0x78] sm:$0xff] }
 0x22a   :  { %1571 = vmatpush2.msra.mxu0 %v1480_v57  ;;  %v1046_v41 = vadd.f32 %v6585_v11, %v1013_v37  ;;  %v6718_v11 = vrot.slane %v5699_v48, %v6709_v47  ;;  %v6721_v50 = vrot.slane %v5699_v48, %v6715_v49 }
 0x22b   :  { %1304 = vmatmul.mubr.f32.gmra.mxu1 %v1067_v43  ;;  %1572 = vmatprep.subr.mxu0 %v1479_v61 }
 0x22c   :  { %1309 = vmatprep.mubr.f32.mxu1 %v6218_v3  ;;  %1573 = vmatpush2.msra.mxu0 %v1478_v62  ;;  %v1078_v43 = vmax.f32 %v1046_v41, 0.0 }
 0x22d   :  { %2326 = vmatprep.subr.mxu0 %v6218_v3 }
 0x22f   :  { %1310 = vmatmul.mubr.f32.gmra.mxu1 %v1068_v56 }
 0x230   :  { %1315 = vmatprep.mubr.f32.mxu1 %v6218_v3 }
 0x233   :  { %1316 = vmatmul.mubr.f32.gmra.mxu1 %v1069_v63 }
 0x234   :  { %1321 = vmatprep.mubr.f32.mxu1 %v6218_v3 }
 0x237   :  { %1322 = vmatmul.mubr.f32.gmra.mxu1 %v1070_v7 }
 0x238   :  { %1327 = vmatprep.mubr.f32.mxu1 %v6218_v3 }
 0x23b   :  { %1328 = vmatmul.mubr.f32.gmra.mxu1 %v1071_v10 }
 0x23c   :  { %1333 = vmatprep.mubr.f32.mxu1 %v6218_v3 }
 0x23f   :  { %1334 = vmatmul.mubr.f32.gmra.mxu1 %v1072_v17 }
 0x240   :  { %1339 = vmatprep.mubr.f32.mxu1 %v6218_v3 }
 0x243   :  { %1340 = vmatmul.mubr.f32.gmra.mxu1 %v1073_v21 }
 0x244   :  { %1345 = vmatprep.mubr.f32.mxu1 %v6218_v3 }
 0x247   :  { %1346 = vmatmul.mubr.f32.gmra.mxu1 %v1074_v28 }
 0x248   :  { %1351 = vmatprep.mubr.f32.mxu1 %v6218_v3 }
 0x24b   :  { %1352 = vmatmul.mubr.f32.gmra.mxu1 %v1075_v31 }
 0x24c   :  { %1357 = vmatprep.mubr.f32.mxu1 %v6218_v3 }
 0x24f   :  { %1358 = vmatmul.mubr.f32.gmra.mxu1 %v1076_v38 }
 0x250   :  { %1363 = vmatprep.mubr.f32.mxu1 %v6218_v3 }
 0x253   :  { %1364 = vmatmul.mubr.f32.gmra.mxu1 %v1077_v39 }
 0x254   :  { %1369 = vmatprep.mubr.f32.mxu1 %v6218_v3 }
 0x257   :  { %1370 = vmatmul.mubr.f32.gmra.mxu1 %v1078_v43 }
 0x258   :  { %1375 = vmatprep.mubr.f32.mxu1 %v6218_v3 }
 0x25b   :  { %1376 = vmatmul.mubr.f32.gmra.mxu1 %v1079_v44 }
 0x29f   :  { %v1191_v51 = vpop.f32.mrf.mxu1 }
 0x2a0   :  { %v1192_v52 = vadd.f32 %v1191_v51, %v6718_v11 }
 0x2a1   :  { %v1193_v53 = vpop.f32.mrf.mxu1 }
 0x2a2   :  { %v1194_v54 = vadd.f32 %v1193_v53, %v6721_v50  ;;  %v1382_v57 = vmax.f32 %v1192_v52, 0.0  ;;  %v2301_v52 = vld [vmem:[#allocation11 + $0x40] sm:$0xff] }
 0x2a3   :  { %v1197_v55 = vpop.f32.mrf.mxu1 }
 0x2a4   :  { %v1383_v56 = vmax.f32 %v1194_v54, 0.0  ;;  %v1198_v58 = vadd.f32 %v1197_v55, %v6718_v11 }
 0x2a5   :  { %v1199_v59 = vpop.f32.mrf.mxu1 }
 0x2a6   :  { %v1200_v61 = vadd.f32 %v1199_v59, %v6721_v50  ;;  %1574 = vmatprep.mubr.f32.mxu0 %v1383_v56  ;;  %1895 = vmatprep.mubr.f32.mxu1 %v1383_v56  ;;  %v1384_v2 = vmax.f32 %v1198_v58, 0.0  ;;  %v2300_v59 = vld [vmem:[#allocation11 + $0x38] sm:$0xff] }
 0x2a7   :  { %v1203_v62 = vpop.f32.mrf.mxu1  ;;  %1575 = vmatmul.mubr.f32.vlgmr.msra.gmra.mxu0 %v1382_v57  ;;  %1896 = vmatmul.mubr.f32.vlgmr.msra.gmra.mxu1 %v1382_v57 }
 0x2a8   :  { %v1385_v63 = vmax.f32 %v1200_v61, 0.0  ;;  %2327 = vmatpush1.msra.mxu0 %v2308_v60  ;;  %v1204_v0 = vadd.f32 %v1203_v62, %v6718_v11 }
 0x2a9   :  { %v1205_v1 = vpop.f32.mrf.mxu1  ;;  %2328 = vmatprep.subr.mxu0 %v6218_v3 }
 0x2aa   :  { %v1206_v5 = vadd.f32 %v1205_v1, %v6721_v50  ;;  %1580 = vmatprep.mubr.f32.mxu0 %v1385_v63  ;;  %1901 = vmatprep.mubr.f32.mxu1 %v1385_v63  ;;  %v1386_v8 = vmax.f32 %v1204_v0, 0.0  ;;  %v2299_v1 = vld [vmem:[#allocation11 + $0x30] sm:$0xff] }
 0x2ab   :  { %v1209_v6 = vpop.f32.mrf.mxu1  ;;  %1581 = vmatmul.mubr.f32.gmra.mxu0 %v1384_v2  ;;  %1902 = vmatmul.mubr.f32.gmra.mxu1 %v1384_v2 }
 0x2ac   :  { %v1387_v7 = vmax.f32 %v1206_v5, 0.0  ;;  %2329 = vmatpush1.msra.mxu0 %v2307_v4  ;;  %v1210_v9 = vadd.f32 %v1209_v6, %v6718_v11 }
 0x2ad   :  { %v1211_v10 = vpop.f32.mrf.mxu1  ;;  %2330 = vmatprep.subr.mxu0 %v6218_v3 }
 0x2ae   :  { %v1212_v13 = vadd.f32 %v1211_v10, %v6721_v50  ;;  %1586 = vmatprep.mubr.f32.mxu0 %v1387_v7  ;;  %1907 = vmatprep.mubr.f32.mxu1 %v1387_v7  ;;  %v1388_v16 = vmax.f32 %v1210_v9, 0.0  ;;  %v2298_v10 = vld [vmem:[#allocation11 + $0x28] sm:$0xff] }
 0x2af   :  { %v1215_v14 = vpop.f32.mrf.mxu1  ;;  %1587 = vmatmul.mubr.f32.gmra.mxu0 %v1386_v8  ;;  %1908 = vmatmul.mubr.f32.gmra.mxu1 %v1386_v8 }
 0x2b0   :  { %v1389_v15 = vmax.f32 %v1212_v13, 0.0  ;;  %2331 = vmatpush1.msra.mxu0 %v2306_v12  ;;  %v1216_v18 = vadd.f32 %v1215_v14, %v6718_v11 }
 0x2b1   :  { %v1217_v17 = vpop.f32.mrf.mxu1  ;;  %2332 = vmatprep.subr.mxu0 %v6218_v3 }
 0x2b2   :  { %v1218_v20 = vadd.f32 %v1217_v17, %v6721_v50  ;;  %1592 = vmatprep.mubr.f32.mxu0 %v1389_v15  ;;  %1913 = vmatprep.mubr.f32.mxu1 %v1389_v15  ;;  %v1390_v23 = vmax.f32 %v1216_v18, 0.0  ;;  %v2297_v17 = vld [vmem:[#allocation11 + $0x20] sm:$0xff] }
 0x2b3   :  { %v1221_v21 = vpop.f32.mrf.mxu1  ;;  %1593 = vmatmul.mubr.f32.gmra.mxu0 %v1388_v16  ;;  %1914 = vmatmul.mubr.f32.gmra.mxu1 %v1388_v16 }
 0x2b4   :  { %v1391_v22 = vmax.f32 %v1218_v20, 0.0  ;;  %2333 = vmatpush1.msra.mxu0 %v2305_v19  ;;  %v1222_v24 = vadd.f32 %v1221_v21, %v6718_v11 }
 0x2b5   :  { %v1223_v25 = vpop.f32.mrf.mxu1  ;;  %2334 = vmatprep.subr.mxu0 %v6218_v3 }
 0x2b6   :  { %v1224_v27 = vadd.f32 %v1223_v25, %v6721_v50  ;;  %1598 = vmatprep.mubr.f32.mxu0 %v1391_v22  ;;  %1919 = vmatprep.mubr.f32.mxu1 %v1391_v22  ;;  %v1392_v30 = vmax.f32 %v1222_v24, 0.0  ;;  %v2296_v25 = vld [vmem:[#allocation11 + $0x18] sm:$0xff] }
 0x2b7   :  { %v1227_v28 = vpop.f32.mrf.mxu1  ;;  %1599 = vmatmul.mubr.f32.gmra.mxu0 %v1390_v23  ;;  %1920 = vmatmul.mubr.f32.gmra.mxu1 %v1390_v23 }
 0x2b8   :  { %v1393_v29 = vmax.f32 %v1224_v27, 0.0  ;;  %2335 = vmatpush1.msra.mxu0 %v2304_v26  ;;  %v1228_v31 = vadd.f32 %v1227_v28, %v6718_v11 }
 0x2b9   :  { %v1229_v32 = vpop.f32.mrf.mxu1  ;;  %2336 = vmatprep.subr.mxu0 %v6218_v3 }
 0x2ba   :  { %v1230_v34 = vadd.f32 %v1229_v32, %v6721_v50  ;;  %1604 = vmatprep.mubr.f32.mxu0 %v1393_v29  ;;  %1925 = vmatprep.mubr.f32.mxu1 %v1393_v29  ;;  %v1394_v37 = vmax.f32 %v1228_v31, 0.0  ;;  %v2295_v32 = vld [vmem:[#allocation11 + $0x10] sm:$0xff] }
 0x2bb   :  { %v1233_v35 = vpop.f32.mrf.mxu1  ;;  %1605 = vmatmul.mubr.f32.gmra.mxu0 %v1392_v30  ;;  %1926 = vmatmul.mubr.f32.gmra.mxu1 %v1392_v30 }
 0x2bc   :  { %v1395_v36 = vmax.f32 %v1230_v34, 0.0  ;;  %2337 = vmatpush1.msra.mxu0 %v2303_v33  ;;  %v1234_v38 = vadd.f32 %v1233_v35, %v6718_v11 }
 0x2bd   :  { %v1235_v39 = vpop.f32.mrf.mxu1  ;;  %2338 = vmatprep.subr.mxu0 %v6218_v3 }
 0x2be   :  { %v1236_v41 = vadd.f32 %v1235_v39, %v6721_v50  ;;  %1610 = vmatprep.mubr.f32.mxu0 %v1395_v36  ;;  %1931 = vmatprep.mubr.f32.mxu1 %v1395_v36  ;;  %v1396_v44 = vmax.f32 %v1234_v38, 0.0  ;;  %v2294_v39 = vld [vmem:[#allocation11 + $0x8] sm:$0xff] }
 0x2bf   :  { %v1239_v42 = vpop.f32.mrf.mxu1  ;;  %1611 = vmatmul.mubr.f32.gmra.mxu0 %v1394_v37  ;;  %1932 = vmatmul.mubr.f32.gmra.mxu1 %v1394_v37 }
 0x2c0   :  { %v1397_v43 = vmax.f32 %v1236_v41, 0.0  ;;  %2339 = vmatpush1.msra.mxu0 %v2302_v40  ;;  %v1240_v48 = vadd.f32 %v1239_v42, %v6718_v11 }
 0x2c1   :  { %v1241_v51 = vpop.f32.mrf.mxu1  ;;  %2340 = vmatprep.subr.mxu0 %v6218_v3 }
 0x2c2   :  { %v1242_v53 = vadd.f32 %v1241_v51, %v6721_v50  ;;  %1616 = vmatprep.mubr.f32.mxu0 %v1397_v43  ;;  %1937 = vmatprep.mubr.f32.mxu1 %v1397_v43  ;;  %v1398_v56 = vmax.f32 %v1240_v48, 0.0  ;;  %v2293_v51 = vld [vmem:[#allocation11] sm:$0xff] }
 0x2c3   :  { %v1245_v54 = vpop.f32.mrf.mxu1  ;;  %1617 = vmatmul.mubr.f32.gmra.mxu0 %v1396_v44  ;;  %1938 = vmatmul.mubr.f32.gmra.mxu1 %v1396_v44 }
 0x2c4   :  { %v1399_v55 = vmax.f32 %v1242_v53, 0.0  ;;  %2341 = vmatpush1.msra.mxu0 %v2301_v52  ;;  %v1246_v57 = vadd.f32 %v1245_v54, %v6718_v11 }
 0x2c5   :  { %v1247_v58 = vpop.f32.mrf.mxu1  ;;  %2342 = vmatprep.subr.mxu0 %v6218_v3 }
 0x2c6   :  { %v1248_v60 = vadd.f32 %v1247_v58, %v6721_v50  ;;  %1622 = vmatprep.mubr.f32.mxu0 %v1399_v55  ;;  %1943 = vmatprep.mubr.f32.mxu1 %v1399_v55  ;;  %v1400_v63 = vmax.f32 %v1246_v57, 0.0  ;;  %v2324_v58 = vld [vmem:[#allocation11 + $0xf8] sm:$0xff] }
 0x2c7   :  { %v1251_v61 = vpop.f32.mrf.mxu1  ;;  %1623 = vmatmul.mubr.f32.gmra.mxu0 %v1398_v56  ;;  %1944 = vmatmul.mubr.f32.gmra.mxu1 %v1398_v56 }
 0x2c8   :  { %v1401_v62 = vmax.f32 %v1248_v60, 0.0  ;;  %2343 = vmatpush1.msra.mxu0 %v2300_v59  ;;  %v1252_v2 = vadd.f32 %v1251_v61, %v6718_v11 }
 0x2c9   :  { %v1253_v0 = vpop.f32.mrf.mxu1  ;;  %2344 = vmatprep.subr.mxu0 %v6218_v3 }
 0x2ca   :  { %v1254_v4 = vadd.f32 %v1253_v0, %v6721_v50  ;;  %1628 = vmatprep.mubr.f32.mxu0 %v1401_v62  ;;  %1949 = vmatprep.mubr.f32.mxu1 %v1401_v62  ;;  %v1402_v7 = vmax.f32 %v1252_v2, 0.0  ;;  %v2323_v0 = vld [vmem:[#allocation11 + $0xf0] sm:$0xff] }
 0x2cb   :  { %v1257_v5 = vpop.f32.mrf.mxu1  ;;  %1629 = vmatmul.mubr.f32.gmra.mxu0 %v1400_v63  ;;  %1950 = vmatmul.mubr.f32.gmra.mxu1 %v1400_v63 }
 0x2cc   :  { %v1403_v6 = vmax.f32 %v1254_v4, 0.0  ;;  %2345 = vmatpush1.msra.mxu0 %v2299_v1  ;;  %v1258_v8 = vadd.f32 %v1257_v5, %v6718_v11 }
 0x2cd   :  { %v1259_v9 = vpop.f32.mrf.mxu1  ;;  %2346 = vmatprep.subr.mxu0 %v6218_v3 }
 0x2ce   :  { %v1260_v12 = vadd.f32 %v1259_v9, %v6721_v50  ;;  %1634 = vmatprep.mubr.f32.mxu0 %v1403_v6  ;;  %1955 = vmatprep.mubr.f32.mxu1 %v1403_v6  ;;  %v1404_v15 = vmax.f32 %v1258_v8, 0.0  ;;  %v2322_v9 = vld [vmem:[#allocation11 + $0xe8] sm:$0xff] }
 0x2cf   :  { %v1263_v13 = vpop.f32.mrf.mxu1  ;;  %1635 = vmatmul.mubr.f32.gmra.mxu0 %v1402_v7  ;;  %1956 = vmatmul.mubr.f32.gmra.mxu1 %v1402_v7 }
 0x2d0   :  { %v1405_v14 = vmax.f32 %v1260_v12, 0.0  ;;  %2347 = vmatpush1.msra.mxu0 %v2298_v10  ;;  %v1264_v16 = vadd.f32 %v1263_v13, %v6718_v11 }
 0x2d1   :  { %v1265_v18 = vpop.f32.mrf.mxu1  ;;  %2348 = vmatprep.subr.mxu0 %v6218_v3 }
 0x2d2   :  { %v1266_v19 = vadd.f32 %v1265_v18, %v6721_v50  ;;  %1640 = vmatprep.mubr.f32.mxu0 %v1405_v14  ;;  %1961 = vmatprep.mubr.f32.mxu1 %v1405_v14  ;;  %v1406_v22 = vmax.f32 %v1264_v16, 0.0  ;;  %v2321_v18 = vld [vmem:[#allocation11 + $0xe0] sm:$0xff] }
 0x2d3   :  { %v1269_v20 = vpop.f32.mrf.mxu1  ;;  %1641 = vmatmul.mubr.f32.gmra.mxu0 %v1404_v15  ;;  %1962 = vmatmul.mubr.f32.gmra.mxu1 %v1404_v15 }
 0x2d4   :  { %v1407_v21 = vmax.f32 %v1266_v19, 0.0  ;;  %2349 = vmatpush1.msra.mxu0 %v2297_v17  ;;  %v1270_v23 = vadd.f32 %v1269_v20, %v6718_v11 }
 0x2d5   :  { %v1271_v24 = vpop.f32.mrf.mxu1  ;;  %2350 = vmatprep.subr.mxu0 %v6218_v3 }
 0x2d6   :  { %v1272_v26 = vadd.f32 %v1271_v24, %v6721_v50  ;;  %1646 = vmatprep.mubr.f32.mxu0 %v1407_v21  ;;  %1967 = vmatprep.mubr.f32.mxu1 %v1407_v21  ;;  %v1408_v29 = vmax.f32 %v1270_v23, 0.0  ;;  %v2320_v24 = vld [vmem:[#allocation11 + $0xd8] sm:$0xff] }
 0x2d7   :  { %v1275_v27 = vpop.f32.mrf.mxu1  ;;  %1647 = vmatmul.mubr.f32.gmra.mxu0 %v1406_v22  ;;  %1968 = vmatmul.mubr.f32.gmra.mxu1 %v1406_v22 }
 0x2d8   :  { %v1409_v28 = vmax.f32 %v1272_v26, 0.0  ;;  %2351 = vmatpush1.msra.mxu0 %v2296_v25  ;;  %v1276_v30 = vadd.f32 %v1275_v27, %v6718_v11 }
 0x2d9   :  { %v1277_v31 = vpop.f32.mrf.mxu1  ;;  %2352 = vmatprep.subr.mxu0 %v6218_v3 }
 0x2da   :  { %v1278_v33 = vadd.f32 %v1277_v31, %v6721_v50  ;;  %1652 = vmatprep.mubr.f32.mxu0 %v1409_v28  ;;  %1973 = vmatprep.mubr.f32.mxu1 %v1409_v28  ;;  %v1410_v36 = vmax.f32 %v1276_v30, 0.0  ;;  %v2319_v31 = vld [vmem:[#allocation11 + $0xd0] sm:$0xff] }
 0x2db   :  { %v1281_v34 = vpop.f32.mrf.mxu1  ;;  %1653 = vmatmul.mubr.f32.gmra.mxu0 %v1408_v29  ;;  %1974 = vmatmul.mubr.f32.gmra.mxu1 %v1408_v29 }
 0x2dc   :  { %v1411_v35 = vmax.f32 %v1278_v33, 0.0  ;;  %2353 = vmatpush1.msra.mxu0 %v2295_v32  ;;  %v1282_v37 = vadd.f32 %v1281_v34, %v6718_v11 }
 0x2dd   :  { %v1283_v38 = vpop.f32.mrf.mxu1  ;;  %2354 = vmatprep.subr.mxu0 %v6218_v3 }
 0x2de   :  { %v1284_v40 = vadd.f32 %v1283_v38, %v6721_v50  ;;  %1658 = vmatprep.mubr.f32.mxu0 %v1411_v35  ;;  %1979 = vmatprep.mubr.f32.mxu1 %v1411_v35  ;;  %v1412_v43 = vmax.f32 %v1282_v37, 0.0  ;;  %v2318_v38 = vld [vmem:[#allocation11 + $0xc8] sm:$0xff] }
 0x2df   :  { %v1287_v41 = vpop.f32.mrf.mxu1  ;;  %1659 = vmatmul.mubr.f32.gmra.mxu0 %v1410_v36  ;;  %1980 = vmatmul.mubr.f32.gmra.mxu1 %v1410_v36 }
 0x2e0   :  { %v1413_v42 = vmax.f32 %v1284_v40, 0.0  ;;  %2355 = vmatpush1.msra.mxu0 %v2294_v39  ;;  %v1288_v44 = vadd.f32 %v1287_v41, %v6718_v11 }
 0x2e1   :  { %v1289_v48 = vpop.f32.mrf.mxu1  ;;  %2356 = vmatprep.subr.mxu0 %v6218_v3 }
 0x2e2   :  { %v1290_v52 = vadd.f32 %v1289_v48, %v6721_v50  ;;  %1664 = vmatprep.mubr.f32.mxu0 %v1413_v42  ;;  %1985 = vmatprep.mubr.f32.mxu1 %v1413_v42  ;;  %v1414_v55 = vmax.f32 %v1288_v44, 0.0  ;;  %v2317_v48 = vld [vmem:[#allocation11 + $0xc0] sm:$0xff] }
 0x2e3   :  { %v1293_v53 = vpop.f32.mrf.mxu1  ;;  %1665 = vmatmul.mubr.f32.gmra.mxu0 %v1412_v43  ;;  %1986 = vmatmul.mubr.f32.gmra.mxu1 %v1412_v43 }
 0x2e4   :  { %v1415_v54 = vmax.f32 %v1290_v52, 0.0  ;;  %2357 = vmatpush1.msra.mxu0 %v2293_v51  ;;  %v1294_v56 = vadd.f32 %v1293_v53, %v6718_v11 }
 0x2e5   :  { %v1295_v57 = vpop.f32.mrf.mxu1  ;;  %2358 = vmatprep.subr.mxu0 %v6218_v3 }
 0x2e6   :  { %v1296_v59 = vadd.f32 %v1295_v57, %v6721_v50  ;;  %1670 = vmatprep.mubr.f32.mxu0 %v1415_v54  ;;  %1991 = vmatprep.mubr.f32.mxu1 %v1415_v54  ;;  %v1416_v62 = vmax.f32 %v1294_v56, 0.0  ;;  %v2316_v57 = vld [vmem:[#allocation11 + $0xb8] sm:$0xff] }
 0x2e7   :  { %v1299_v60 = vpop.f32.mrf.mxu1  ;;  %1671 = vmatmul.mubr.f32.gmra.mxu0 %v1414_v55  ;;  %1992 = vmatmul.mubr.f32.gmra.mxu1 %v1414_v55 }
 0x2e8   :  { %v1417_v61 = vmax.f32 %v1296_v59, 0.0  ;;  %2359 = vmatpush2.msra.mxu0 %v2324_v58  ;;  %v1300_v63 = vadd.f32 %v1299_v60, %v6718_v11 }
 0x2e9   :  { %v1301_v2 = vpop.f32.mrf.mxu1  ;;  %2360 = vmatprep.subr.mxu0 %v6218_v3 }
 0x2ea   :  { %v1302_v1 = vadd.f32 %v1301_v2, %v6721_v50  ;;  %1676 = vmatprep.mubr.f32.mxu0 %v1417_v61  ;;  %1997 = vmatprep.mubr.f32.mxu1 %v1417_v61  ;;  %v1418_v6 = vmax.f32 %v1300_v63, 0.0  ;;  %v2315_v2 = vld [vmem:[#allocation11 + $0xb0] sm:$0xff] }
 0x2eb   :  { %v1305_v4 = vpop.f32.mrf.mxu1  ;;  %1677 = vmatmul.mubr.f32.gmra.mxu0 %v1416_v62  ;;  %1998 = vmatmul.mubr.f32.gmra.mxu1 %v1416_v62 }
 0x2ec   :  { %v1419_v5 = vmax.f32 %v1302_v1, 0.0  ;;  %2361 = vmatpush2.msra.mxu0 %v2323_v0  ;;  %v1306_v7 = vadd.f32 %v1305_v4, %v6718_v11 }
 0x2ed   :  { %v1307_v8 = vpop.f32.mrf.mxu1  ;;  %2362 = vmatprep.subr.mxu0 %v6218_v3 }
 0x2ee   :  { %v1308_v10 = vadd.f32 %v1307_v8, %v6721_v50  ;;  %1682 = vmatprep.mubr.f32.mxu0 %v1419_v5  ;;  %2003 = vmatprep.mubr.f32.mxu1 %v1419_v5  ;;  %v1420_v14 = vmax.f32 %v1306_v7, 0.0  ;;  %v2314_v8 = vld [vmem:[#allocation11 + $0xa8] sm:$0xff] }
 0x2ef   :  { %v1311_v12 = vpop.f32.mrf.mxu1  ;;  %1683 = vmatmul.mubr.f32.gmra.mxu0 %v1418_v6  ;;  %2004 = vmatmul.mubr.f32.gmra.mxu1 %v1418_v6 }
 0x2f0   :  { %v1421_v13 = vmax.f32 %v1308_v10, 0.0  ;;  %2363 = vmatpush2.msra.mxu0 %v2322_v9  ;;  %v1312_v15 = vadd.f32 %v1311_v12, %v6718_v11 }
 0x2f1   :  { %v1313_v16 = vpop.f32.mrf.mxu1  ;;  %2364 = vmatprep.subr.mxu0 %v6218_v3 }
 0x2f2   :  { %v1314_v17 = vadd.f32 %v1313_v16, %v6721_v50  ;;  %1688 = vmatprep.mubr.f32.mxu0 %v1421_v13  ;;  %2009 = vmatprep.mubr.f32.mxu1 %v1421_v13  ;;  %v1422_v21 = vmax.f32 %v1312_v15, 0.0  ;;  %v2313_v16 = vld [vmem:[#allocation11 + $0xa0] sm:$0xff] }
 0x2f3   :  { %v1317_v19 = vpop.f32.mrf.mxu1  ;;  %1689 = vmatmul.mubr.f32.gmra.mxu0 %v1420_v14  ;;  %2010 = vmatmul.mubr.f32.gmra.mxu1 %v1420_v14 }
 0x2f4   :  { %v1423_v20 = vmax.f32 %v1314_v17, 0.0  ;;  %2365 = vmatpush2.msra.mxu0 %v2321_v18  ;;  %v1318_v22 = vadd.f32 %v1317_v19, %v6718_v11 }
 0x2f5   :  { %v1319_v23 = vpop.f32.mrf.mxu1  ;;  %2366 = vmatprep.subr.mxu0 %v6218_v3 }
 0x2f6   :  { %v1320_v25 = vadd.f32 %v1319_v23, %v6721_v50  ;;  %1694 = vmatprep.mubr.f32.mxu0 %v1423_v20  ;;  %2015 = vmatprep.mubr.f32.mxu1 %v1423_v20  ;;  %v1424_v28 = vmax.f32 %v1318_v22, 0.0  ;;  %v2312_v23 = vld [vmem:[#allocation11 + $0x98] sm:$0xff] }
 0x2f7   :  { %v1323_v26 = vpop.f32.mrf.mxu1  ;;  %1695 = vmatmul.mubr.f32.gmra.mxu0 %v1422_v21  ;;  %2016 = vmatmul.mubr.f32.gmra.mxu1 %v1422_v21 }
 0x2f8   :  { %v1425_v27 = vmax.f32 %v1320_v25, 0.0  ;;  %2367 = vmatpush2.msra.mxu0 %v2320_v24  ;;  %v1324_v29 = vadd.f32 %v1323_v26, %v6718_v11 }
 0x2f9   :  { %v1325_v30 = vpop.f32.mrf.mxu1  ;;  %2368 = vmatprep.subr.mxu0 %v6218_v3 }
 0x2fa   :  { %v1326_v32 = vadd.f32 %v1325_v30, %v6721_v50  ;;  %1700 = vmatprep.mubr.f32.mxu0 %v1425_v27  ;;  %2021 = vmatprep.mubr.f32.mxu1 %v1425_v27  ;;  %v1426_v35 = vmax.f32 %v1324_v29, 0.0  ;;  %v2311_v30 = vld [vmem:[#allocation11 + $0x90] sm:$0xff] }
 0x2fb   :  { %v1329_v33 = vpop.f32.mrf.mxu1  ;;  %1701 = vmatmul.mubr.f32.gmra.mxu0 %v1424_v28  ;;  %2022 = vmatmul.mubr.f32.gmra.mxu1 %v1424_v28 }
 0x2fc   :  { %v1427_v34 = vmax.f32 %v1326_v32, 0.0  ;;  %2369 = vmatpush2.msra.mxu0 %v2319_v31  ;;  %v1330_v36 = vadd.f32 %v1329_v33, %v6718_v11 }
 0x2fd   :  { %v1331_v37 = vpop.f32.mrf.mxu1  ;;  %2370 = vmatprep.subr.mxu0 %v6218_v3 }
 0x2fe   :  { %v1332_v39 = vadd.f32 %v1331_v37, %v6721_v50  ;;  %1706 = vmatprep.mubr.f32.mxu0 %v1427_v34  ;;  %2027 = vmatprep.mubr.f32.mxu1 %v1427_v34  ;;  %v1428_v42 = vmax.f32 %v1330_v36, 0.0  ;;  %v2310_v37 = vld [vmem:[#allocation11 + $0x88] sm:$0xff] }
 0x2ff   :  { %v1335_v40 = vpop.f32.mrf.mxu1  ;;  %1707 = vmatmul.mubr.f32.gmra.mxu0 %v1426_v35  ;;  %2028 = vmatmul.mubr.f32.gmra.mxu1 %v1426_v35 }
 0x300   :  { %v1429_v41 = vmax.f32 %v1332_v39, 0.0  ;;  %2371 = vmatpush2.msra.mxu0 %v2318_v38  ;;  %v1336_v43 = vadd.f32 %v1335_v40, %v6718_v11 }
 0x301   :  { %v1337_v44 = vpop.f32.mrf.mxu1  ;;  %2372 = vmatprep.subr.mxu0 %v6218_v3 }
 0x302   :  { %v1338_v51 = vadd.f32 %v1337_v44, %v6721_v50  ;;  %1712 = vmatprep.mubr.f32.mxu0 %v1429_v41  ;;  %2033 = vmatprep.mubr.f32.mxu1 %v1429_v41  ;;  %v1430_v54 = vmax.f32 %v1336_v43, 0.0  ;;  %v2309_v41 = vld [vmem:[#allocation11 + $0x80] sm:$0xff] }
 0x303   :  { %v1341_v52 = vpop.f32.mrf.mxu1  ;;  %1713 = vmatmul.mubr.f32.gmra.mxu0 %v1428_v42  ;;  %2034 = vmatmul.mubr.f32.gmra.mxu1 %v1428_v42 }
 0x304   :  { %v1431_v53 = vmax.f32 %v1338_v51, 0.0  ;;  %2373 = vmatpush2.msra.mxu0 %v2317_v48  ;;  %v1342_v55 = vadd.f32 %v1341_v52, %v6718_v11 }
 0x305   :  { %v1343_v56 = vpop.f32.mrf.mxu1  ;;  %2374 = vmatprep.subr.mxu0 %v6218_v3 }
 0x306   :  { %v1344_v58 = vadd.f32 %v1343_v56, %v6721_v50  ;;  %1718 = vmatprep.mubr.f32.mxu0 %v1431_v53  ;;  %2039 = vmatprep.mubr.f32.mxu1 %v1431_v53  ;;  %v1432_v61 = vmax.f32 %v1342_v55, 0.0 }
 0x307   :  { %v1347_v59 = vpop.f32.mrf.mxu1  ;;  %1719 = vmatmul.mubr.f32.gmra.mxu0 %v1430_v54  ;;  %2040 = vmatmul.mubr.f32.gmra.mxu1 %v1430_v54 }
 0x308   :  { %v1433_v60 = vmax.f32 %v1344_v58, 0.0  ;;  %2375 = vmatpush2.msra.mxu0 %v2316_v57  ;;  %v1348_v62 = vadd.f32 %v1347_v59, %v6718_v11 }
 0x309   :  { %v1349_v63 = vpop.f32.mrf.mxu1  ;;  %2376 = vmatprep.subr.mxu0 %v6218_v3 }
 0x30a   :  { %v1350_v0 = vadd.f32 %v1349_v63, %v6721_v50  ;;  %1724 = vmatprep.mubr.f32.mxu0 %v1433_v60  ;;  %2045 = vmatprep.mubr.f32.mxu1 %v1433_v60  ;;  %v1434_v5 = vmax.f32 %v1348_v62, 0.0  ;;  %v2680_v60 = vld [vmem:[%s7862_s8 + $0x6] ss:$0 sm:$0xff]  ;;  %v6219_v63 = vmov 0  }
 0x30b   :  { %v1353_v1 = vpop.f32.mrf.mxu1  ;;  %1725 = vmatmul.mubr.f32.gmra.mxu0 %v1432_v61  ;;  %2046 = vmatmul.mubr.f32.gmra.mxu1 %v1432_v61 }
 0x30c   :  { %v1435_v4 = vmax.f32 %v1350_v0, 0.0  ;;  %2377 = vmatpush2.msra.mxu0 %v2315_v2  ;;  %v1354_v6 = vadd.f32 %v1353_v1, %v6718_v11  ;;  %6056 = vset.pattern.permute.xlu1 %v6219_v63 }
 0x30d   :  { %v1355_v7 = vpop.f32.mrf.mxu1  ;;  %2378 = vmatprep.subr.mxu0 %v6218_v3  ;;  %6057 = vset.pattern.permute.xlu0 %v6219_v63 }
 0x30e   :  { %v1356_v9 = vadd.f32 %v1355_v7, %v6721_v50  ;;  %1730 = vmatprep.mubr.f32.mxu0 %v1435_v4  ;;  %2051 = vmatprep.mubr.f32.mxu1 %v1435_v4  ;;  %v1436_v13 = vmax.f32 %v1354_v6, 0.0 }
 0x30f   :  { %v1359_v10 = vpop.f32.mrf.mxu1  ;;  %1731 = vmatmul.mubr.f32.gmra.mxu0 %v1434_v5  ;;  %2052 = vmatmul.mubr.f32.gmra.mxu1 %v1434_v5 }
 0x310   :  { %v1437_v12 = vmax.f32 %v1356_v9, 0.0  ;;  %2379 = vmatpush2.msra.mxu0 %v2314_v8  ;;  %v1360_v14 = vadd.f32 %v1359_v10, %v6718_v11  ;;  %2683 = vperm.xlu1 %6056, %v2680_v60  }
 0x311   :  { %v1361_v15 = vpop.f32.mrf.mxu1  ;;  %2380 = vmatprep.subr.mxu0 %v6218_v3 }
 0x312   :  { %v1362_v18 = vadd.f32 %v1361_v15, %v6721_v50  ;;  %1736 = vmatprep.mubr.f32.mxu0 %v1437_v12  ;;  %2057 = vmatprep.mubr.f32.mxu1 %v1437_v12  ;;  %v1438_v20 = vmax.f32 %v1360_v14, 0.0 }
 0x313   :  { %v1365_v17 = vpop.f32.mrf.mxu1  ;;  %1737 = vmatmul.mubr.f32.gmra.mxu0 %v1436_v13  ;;  %2058 = vmatmul.mubr.f32.gmra.mxu1 %v1436_v13 }
 0x314   :  { %v1439_v19 = vmax.f32 %v1362_v18, 0.0  ;;  %2381 = vmatpush2.msra.mxu0 %v2313_v16  ;;  %v1366_v21 = vadd.f32 %v1365_v17, %v6718_v11 }
 0x315   :  { %v1367_v22 = vpop.f32.mrf.mxu1  ;;  %2382 = vmatprep.subr.mxu0 %v6218_v3 }
 0x316   :  { %v1368_v24 = vadd.f32 %v1367_v22, %v6721_v50  ;;  %1742 = vmatprep.mubr.f32.mxu0 %v1439_v19  ;;  %2063 = vmatprep.mubr.f32.mxu1 %v1439_v19  ;;  %v1440_v27 = vmax.f32 %v1366_v21, 0.0 }
 0x317   :  { %v1371_v25 = vpop.f32.mrf.mxu1  ;;  %1743 = vmatmul.mubr.f32.gmra.mxu0 %v1438_v20  ;;  %2064 = vmatmul.mubr.f32.gmra.mxu1 %v1438_v20 }
 0x318   :  { %v1441_v26 = vmax.f32 %v1368_v24, 0.0  ;;  %2383 = vmatpush2.msra.mxu0 %v2312_v23  ;;  %v1372_v28 = vadd.f32 %v1371_v25, %v6718_v11 }
 0x319   :  { %v1373_v29 = vpop.f32.mrf.mxu1  ;;  %2384 = vmatprep.subr.mxu0 %v6218_v3 }
 0x31a   :  { %v1374_v31 = vadd.f32 %v1373_v29, %v6721_v50  ;;  %1748 = vmatprep.mubr.f32.mxu0 %v1441_v26  ;;  %2069 = vmatprep.mubr.f32.mxu1 %v1441_v26  ;;  %v1442_v34 = vmax.f32 %v1372_v28, 0.0 }
 0x31b   :  { %v1377_v32 = vpop.f32.mrf.mxu1  ;;  %1749 = vmatmul.mubr.f32.gmra.mxu0 %v1440_v27  ;;  %2070 = vmatmul.mubr.f32.gmra.mxu1 %v1440_v27 }
 0x31c   :  { %v1443_v33 = vmax.f32 %v1374_v31, 0.0  ;;  %2385 = vmatpush2.msra.mxu0 %v2311_v30  ;;  %v1378_v35 = vadd.f32 %v1377_v32, %v6718_v11  ;;  %v5700_v11 = vld [vmem:[%s7862_s8 + $0x3] ss:$8 sm:$0x3] }
 0x31d   :  { %v1379_v36 = vpop.f32.mrf.mxu1  ;;  %2386 = vmatprep.subr.mxu0 %v6218_v3  ;;  %v6822_v43 = vrot.slane %v5700_v11, %v6709_v47  ;;  %v6825_v48 = vrot.slane %v5700_v11, %v6715_v49 }
 0x31e   :  { %v1380_v38 = vadd.f32 %v1379_v36, %v6721_v50  ;;  %1754 = vmatprep.mubr.f32.mxu0 %v1443_v33  ;;  %2075 = vmatprep.mubr.f32.mxu1 %v1443_v33  ;;  %v1444_v40 = vmax.f32 %v1378_v35, 0.0 }
 0x31f   :  { %1755 = vmatmul.mubr.f32.gmra.mxu0 %v1442_v34  ;;  %2076 = vmatmul.mubr.f32.gmra.mxu1 %v1442_v34 }
 0x320   :  { %v1445_v39 = vmax.f32 %v1380_v38, 0.0  ;;  %2387 = vmatpush2.msra.mxu0 %v2310_v37 }
 0x321   :  { %2388 = vmatprep.subr.mxu0 %v6218_v3 }
 0x322   :  { %1760 = vmatprep.mubr.f32.mxu0 %v1445_v39  ;;  %2081 = vmatprep.mubr.f32.mxu1 %v1445_v39 }
 0x323   :  { %1761 = vmatmul.mubr.f32.gmra.mxu0 %v1444_v40  ;;  %2082 = vmatmul.mubr.f32.gmra.mxu1 %v1444_v40 }
 0x324   :  { %2389 = vmatpush2.msra.mxu0 %v2309_v41 }
 0x367   :  { %v1576_v50 = vpop.f32.mrf.mxu0  ;;  %v1897_v42 = vpop.f32.mrf.mxu1 }
 0x368   :  { %v2088_v44 = vmax.f32 %v1576_v50, %v1897_v42 }
 0x369   :  { %v1578_v3 = vpop.f32.mrf.mxu0  ;;  %v1899_v51 = vpop.f32.mrf.mxu1 }
 0x36a   :  { %v2089_v52 = vmax.f32 %v1578_v3, %v1899_v51  ;;  %v2165_v53 = vadd.f32 %v6822_v43, %v2088_v44 }
 0x36b   :  { %v1582_v54 = vpop.f32.mrf.mxu0  ;;  %v1903_v55 = vpop.f32.mrf.mxu1 }
 0x36c   :  { %v2166_v56 = vadd.f32 %v6825_v48, %v2089_v52  ;;  %v2090_v57 = vmax.f32 %v1582_v54, %v1903_v55  ;;  %v2229_v2 = vmax.f32 %v2165_v53, 0.0 }
 0x36d   :  { %v1584_v58 = vpop.f32.mrf.mxu0  ;;  %v1905_v59 = vpop.f32.mrf.mxu1 }
 0x36e   :  { %v2230_v61 = vmax.f32 %v2166_v56, 0.0  ;;  %v2091_v62 = vmax.f32 %v1584_v58, %v1905_v59  ;;  %v2167_v0 = vadd.f32 %v6822_v43, %v2090_v57 }
 0x36f   :  { %v1588_v1 = vpop.f32.mrf.mxu0  ;;  %v1909_v4 = vpop.f32.mrf.mxu1 }
 0x370   :  { %v2168_v5 = vadd.f32 %v6825_v48, %v2091_v62  ;;  %v2092_v6 = vmax.f32 %v1588_v1, %v1909_v4  ;;  %2390 = vmatprep.mubr.f32.mxu0 %v2230_v61  ;;  %v2231_v12 = vmax.f32 %v2167_v0, 0.0 }
 0x371   :  { %v1590_v7 = vpop.f32.mrf.mxu0  ;;  %v1911_v8 = vpop.f32.mrf.mxu1  ;;  %2391 = vmatmul.mubr.f32.vlgmr.msra.gmra.mxu0 %v2229_v2 }
 0x372   :  { %v2232_v9 = vmax.f32 %v2168_v5, 0.0  ;;  %v2093_v10 = vmax.f32 %v1590_v7, %v1911_v8  ;;  %v2169_v13 = vadd.f32 %v6822_v43, %v2092_v6 }
 0x373   :  { %v1594_v14 = vpop.f32.mrf.mxu0  ;;  %v1915_v15 = vpop.f32.mrf.mxu1 }
 0x374   :  { %v2170_v16 = vadd.f32 %v6825_v48, %v2093_v10  ;;  %v2094_v18 = vmax.f32 %v1594_v14, %v1915_v15  ;;  %2395 = vmatprep.mubr.f32.mxu0 %v2232_v9  ;;  %v2233_v22 = vmax.f32 %v2169_v13, 0.0 }
 0x375   :  { %v1596_v17 = vpop.f32.mrf.mxu0  ;;  %v1917_v19 = vpop.f32.mrf.mxu1  ;;  %2396 = vmatmul.mubr.f32.gmra.mxu0 %v2231_v12 }
 0x376   :  { %v2234_v20 = vmax.f32 %v2170_v16, 0.0  ;;  %v2095_v21 = vmax.f32 %v1596_v17, %v1917_v19  ;;  %v2171_v23 = vadd.f32 %v6822_v43, %v2094_v18 }
 0x377   :  { %v1600_v24 = vpop.f32.mrf.mxu0  ;;  %v1921_v25 = vpop.f32.mrf.mxu1 }
 0x378   :  { %v2172_v26 = vadd.f32 %v6825_v48, %v2095_v21  ;;  %v2096_v27 = vmax.f32 %v1600_v24, %v1921_v25  ;;  %2400 = vmatprep.mubr.f32.mxu0 %v2234_v20  ;;  %v2235_v32 = vmax.f32 %v2171_v23, 0.0 }
 0x379   :  { %v1602_v28 = vpop.f32.mrf.mxu0  ;;  %v1923_v29 = vpop.f32.mrf.mxu1  ;;  %2401 = vmatmul.mubr.f32.gmra.mxu0 %v2233_v22 }
 0x37a   :  { %v2236_v30 = vmax.f32 %v2172_v26, 0.0  ;;  %v2097_v31 = vmax.f32 %v1602_v28, %v1923_v29  ;;  %v2173_v33 = vadd.f32 %v6822_v43, %v2096_v27 }
 0x37b   :  { %v1606_v34 = vpop.f32.mrf.mxu0  ;;  %v1927_v35 = vpop.f32.mrf.mxu1 }
 0x37c   :  { %v2174_v36 = vadd.f32 %v6825_v48, %v2097_v31  ;;  %v2098_v37 = vmax.f32 %v1606_v34, %v1927_v35  ;;  %2405 = vmatprep.mubr.f32.mxu0 %v2236_v30  ;;  %v2237_v11 = vmax.f32 %v2173_v33, 0.0 }
 0x37d   :  { %v1608_v38 = vpop.f32.mrf.mxu0  ;;  %v1929_v39 = vpop.f32.mrf.mxu1  ;;  %2406 = vmatmul.mubr.f32.gmra.mxu0 %v2235_v32 }
 0x37e   :  { %v2238_v40 = vmax.f32 %v2174_v36, 0.0  ;;  %v2099_v41 = vmax.f32 %v1608_v38, %v1929_v39  ;;  %v2175_v50 = vadd.f32 %v6822_v43, %v2098_v37 }
 0x37f   :  { %v1612_v42 = vpop.f32.mrf.mxu0  ;;  %v1933_v44 = vpop.f32.mrf.mxu1 }
 0x380   :  { %v2176_v3 = vadd.f32 %v6825_v48, %v2099_v41  ;;  %v2100_v51 = vmax.f32 %v1612_v42, %v1933_v44  ;;  %2410 = vmatprep.mubr.f32.mxu0 %v2238_v40  ;;  %v2239_v56 = vmax.f32 %v2175_v50, 0.0 }
 0x381   :  { %v1614_v52 = vpop.f32.mrf.mxu0  ;;  %v1935_v53 = vpop.f32.mrf.mxu1  ;;  %2411 = vmatmul.mubr.f32.gmra.mxu0 %v2237_v11 }
 0x382   :  { %v2240_v54 = vmax.f32 %v2176_v3, 0.0  ;;  %v2101_v55 = vmax.f32 %v1614_v52, %v1935_v53  ;;  %v2177_v57 = vadd.f32 %v6822_v43, %v2100_v51 }
 0x383   :  { %v1618_v58 = vpop.f32.mrf.mxu0  ;;  %v1939_v59 = vpop.f32.mrf.mxu1 }
 0x384   :  { %v2178_v60 = vadd.f32 %v6825_v48, %v2101_v55  ;;  %v2102_v61 = vmax.f32 %v1618_v58, %v1939_v59  ;;  %2415 = vmatprep.mubr.f32.mxu0 %v2240_v54  ;;  %v2241_v1 = vmax.f32 %v2177_v57, 0.0 }
 0x385   :  { %v1620_v62 = vpop.f32.mrf.mxu0  ;;  %v1941_v63 = vpop.f32.mrf.mxu1  ;;  %2416 = vmatmul.mubr.f32.gmra.mxu0 %v2239_v56 }
 0x386   :  { %v2242_v2 = vmax.f32 %v2178_v60, 0.0  ;;  %v2103_v0 = vmax.f32 %v1620_v62, %v1941_v63  ;;  %v2179_v4 = vadd.f32 %v6822_v43, %v2102_v61 }
 0x387   :  { %v1624_v5 = vpop.f32.mrf.mxu0  ;;  %v1945_v6 = vpop.f32.mrf.mxu1 }
 0x388   :  { %v2180_v7 = vadd.f32 %v6825_v48, %v2103_v0  ;;  %v2104_v8 = vmax.f32 %v1624_v5, %v1945_v6  ;;  %2420 = vmatprep.mubr.f32.mxu0 %v2242_v2  ;;  %v2243_v14 = vmax.f32 %v2179_v4, 0.0 }
 0x389   :  { %v1626_v9 = vpop.f32.mrf.mxu0  ;;  %v1947_v10 = vpop.f32.mrf.mxu1  ;;  %2421 = vmatmul.mubr.f32.gmra.mxu0 %v2241_v1 }
 0x38a   :  { %v2244_v12 = vmax.f32 %v2180_v7, 0.0  ;;  %v2105_v13 = vmax.f32 %v1626_v9, %v1947_v10  ;;  %v2181_v15 = vadd.f32 %v6822_v43, %v2104_v8 }
 0x38b   :  { %v1630_v16 = vpop.f32.mrf.mxu0  ;;  %v1951_v18 = vpop.f32.mrf.mxu1 }
 0x38c   :  { %v2182_v17 = vadd.f32 %v6825_v48, %v2105_v13  ;;  %v2106_v19 = vmax.f32 %v1630_v16, %v1951_v18  ;;  %2425 = vmatprep.mubr.f32.mxu0 %v2244_v12  ;;  %v2245_v24 = vmax.f32 %v2181_v15, 0.0 }
 0x38d   :  { %v1632_v20 = vpop.f32.mrf.mxu0  ;;  %v1953_v21 = vpop.f32.mrf.mxu1  ;;  %2426 = vmatmul.mubr.f32.gmra.mxu0 %v2243_v14 }
 0x38e   :  { %v2246_v22 = vmax.f32 %v2182_v17, 0.0  ;;  %v2107_v23 = vmax.f32 %v1632_v20, %v1953_v21  ;;  %v2183_v25 = vadd.f32 %v6822_v43, %v2106_v19 }
 0x38f   :  { %v1636_v26 = vpop.f32.mrf.mxu0  ;;  %v1957_v27 = vpop.f32.mrf.mxu1 }
 0x390   :  { %v2184_v28 = vadd.f32 %v6825_v48, %v2107_v23  ;;  %v2108_v29 = vmax.f32 %v1636_v26, %v1957_v27  ;;  %2430 = vmatprep.mubr.f32.mxu0 %v2246_v22  ;;  %v2247_v34 = vmax.f32 %v2183_v25, 0.0 }
 0x391   :  { %v1638_v30 = vpop.f32.mrf.mxu0  ;;  %v1959_v31 = vpop.f32.mrf.mxu1  ;;  %2431 = vmatmul.mubr.f32.gmra.mxu0 %v2245_v24 }
 0x392   :  { %v2248_v32 = vmax.f32 %v2184_v28, 0.0  ;;  %v2109_v33 = vmax.f32 %v1638_v30, %v1959_v31  ;;  %v2185_v35 = vadd.f32 %v6822_v43, %v2108_v29 }
 0x393   :  { %v1642_v36 = vpop.f32.mrf.mxu0  ;;  %v1963_v37 = vpop.f32.mrf.mxu1 }
 0x394   :  { %v2186_v38 = vadd.f32 %v6825_v48, %v2109_v33  ;;  %v2110_v39 = vmax.f32 %v1642_v36, %v1963_v37  ;;  %2435 = vmatprep.mubr.f32.mxu0 %v2248_v32  ;;  %v2249_v42 = vmax.f32 %v2185_v35, 0.0 }
 0x395   :  { %v1644_v40 = vpop.f32.mrf.mxu0  ;;  %v1965_v41 = vpop.f32.mrf.mxu1  ;;  %2436 = vmatmul.mubr.f32.gmra.mxu0 %v2247_v34 }
 0x396   :  { %v2250_v11 = vmax.f32 %v2186_v38, 0.0  ;;  %v2111_v50 = vmax.f32 %v1644_v40, %v1965_v41  ;;  %v2187_v44 = vadd.f32 %v6822_v43, %v2110_v39 }
 0x397   :  { %v1648_v3 = vpop.f32.mrf.mxu0  ;;  %v1969_v51 = vpop.f32.mrf.mxu1 }
 0x398   :  { %v2188_v52 = vadd.f32 %v6825_v48, %v2111_v50  ;;  %v2112_v53 = vmax.f32 %v1648_v3, %v1969_v51  ;;  %2440 = vmatprep.mubr.f32.mxu0 %v2250_v11  ;;  %v2251_v58 = vmax.f32 %v2187_v44, 0.0 }
 0x399   :  { %v1650_v54 = vpop.f32.mrf.mxu0  ;;  %v1971_v55 = vpop.f32.mrf.mxu1  ;;  %2441 = vmatmul.mubr.f32.gmra.mxu0 %v2249_v42 }
 0x39a   :  { %v2252_v56 = vmax.f32 %v2188_v52, 0.0  ;;  %v2113_v57 = vmax.f32 %v1650_v54, %v1971_v55  ;;  %v2189_v59 = vadd.f32 %v6822_v43, %v2112_v53 }
 0x39b   :  { %v1654_v60 = vpop.f32.mrf.mxu0  ;;  %v1975_v61 = vpop.f32.mrf.mxu1 }
 0x39c   :  { %v2190_v62 = vadd.f32 %v6825_v48, %v2113_v57  ;;  %v2114_v63 = vmax.f32 %v1654_v60, %v1975_v61  ;;  %2445 = vmatprep.mubr.f32.mxu0 %v2252_v56  ;;  %v2253_v5 = vmax.f32 %v2189_v59, 0.0 }
 0x39d   :  { %v1656_v2 = vpop.f32.mrf.mxu0  ;;  %v1977_v0 = vpop.f32.mrf.mxu1  ;;  %2446 = vmatmul.mubr.f32.gmra.mxu0 %v2251_v58 }
 0x39e   :  { %v2254_v1 = vmax.f32 %v2190_v62, 0.0  ;;  %v2115_v4 = vmax.f32 %v1656_v2, %v1977_v0  ;;  %v2191_v6 = vadd.f32 %v6822_v43, %v2114_v63 }
 0x39f   :  { %v1660_v7 = vpop.f32.mrf.mxu0  ;;  %v1981_v8 = vpop.f32.mrf.mxu1 }
 0x3a0   :  { %v2192_v9 = vadd.f32 %v6825_v48, %v2115_v4  ;;  %v2116_v10 = vmax.f32 %v1660_v7, %v1981_v8  ;;  %2450 = vmatprep.mubr.f32.mxu0 %v2254_v1  ;;  %v2255_v16 = vmax.f32 %v2191_v6, 0.0 }
 0x3a1   :  { %v1662_v12 = vpop.f32.mrf.mxu0  ;;  %v1983_v13 = vpop.f32.mrf.mxu1  ;;  %2451 = vmatmul.mubr.f32.gmra.mxu0 %v2253_v5 }
 0x3a2   :  { %v2256_v14 = vmax.f32 %v2192_v9, 0.0  ;;  %v2117_v15 = vmax.f32 %v1662_v12, %v1983_v13  ;;  %v2193_v18 = vadd.f32 %v6822_v43, %v2116_v10 }
 0x3a3   :  { %v1666_v17 = vpop.f32.mrf.mxu0  ;;  %v1987_v19 = vpop.f32.mrf.mxu1 }
 0x3a4   :  { %v2194_v20 = vadd.f32 %v6825_v48, %v2117_v15  ;;  %v2118_v21 = vmax.f32 %v1666_v17, %v1987_v19  ;;  %2455 = vmatprep.mubr.f32.mxu0 %v2256_v14  ;;  %v2257_v26 = vmax.f32 %v2193_v18, 0.0 }
 0x3a5   :  { %v1668_v22 = vpop.f32.mrf.mxu0  ;;  %v1989_v23 = vpop.f32.mrf.mxu1  ;;  %2456 = vmatmul.mubr.f32.gmra.mxu0 %v2255_v16 }
 0x3a6   :  { %v2258_v24 = vmax.f32 %v2194_v20, 0.0  ;;  %v2119_v25 = vmax.f32 %v1668_v22, %v1989_v23  ;;  %v2195_v27 = vadd.f32 %v6822_v43, %v2118_v21 }
 0x3a7   :  { %v1672_v28 = vpop.f32.mrf.mxu0  ;;  %v1993_v29 = vpop.f32.mrf.mxu1 }
 0x3a8   :  { %v2196_v30 = vadd.f32 %v6825_v48, %v2119_v25  ;;  %v2120_v31 = vmax.f32 %v1672_v28, %v1993_v29  ;;  %2460 = vmatprep.mubr.f32.mxu0 %v2258_v24  ;;  %v2259_v36 = vmax.f32 %v2195_v27, 0.0 }
 0x3a9   :  { %v1674_v32 = vpop.f32.mrf.mxu0  ;;  %v1995_v33 = vpop.f32.mrf.mxu1  ;;  %2461 = vmatmul.mubr.f32.gmra.mxu0 %v2257_v26 }
 0x3aa   :  { %v2260_v34 = vmax.f32 %v2196_v30, 0.0  ;;  %v2121_v35 = vmax.f32 %v1674_v32, %v1995_v33  ;;  %v2197_v37 = vadd.f32 %v6822_v43, %v2120_v31 }
 0x3ab   :  { %v1678_v38 = vpop.f32.mrf.mxu0  ;;  %v1999_v39 = vpop.f32.mrf.mxu1 }
 0x3ac   :  { %v2198_v40 = vadd.f32 %v6825_v48, %v2121_v35  ;;  %v2122_v41 = vmax.f32 %v1678_v38, %v1999_v39  ;;  %2465 = vmatprep.mubr.f32.mxu0 %v2260_v34  ;;  %v2261_v3 = vmax.f32 %v2197_v37, 0.0 }
 0x3ad   :  { %v1680_v11 = vpop.f32.mrf.mxu0  ;;  %v2001_v50 = vpop.f32.mrf.mxu1  ;;  %2466 = vmatmul.mubr.f32.gmra.mxu0 %v2259_v36 }
 0x3ae   :  { %v2262_v42 = vmax.f32 %v2198_v40, 0.0  ;;  %v2123_v44 = vmax.f32 %v1680_v11, %v2001_v50  ;;  %v2199_v51 = vadd.f32 %v6822_v43, %v2122_v41 }
 0x3af   :  { %v1684_v52 = vpop.f32.mrf.mxu0  ;;  %v2005_v53 = vpop.f32.mrf.mxu1 }
 0x3b0   :  { %v2200_v54 = vadd.f32 %v6825_v48, %v2123_v44  ;;  %v2124_v55 = vmax.f32 %v1684_v52, %v2005_v53  ;;  %2470 = vmatprep.mubr.f32.mxu0 %v2262_v42  ;;  %v2263_v60 = vmax.f32 %v2199_v51, 0.0 }
 0x3b1   :  { %v1686_v56 = vpop.f32.mrf.mxu0  ;;  %v2007_v57 = vpop.f32.mrf.mxu1  ;;  %2471 = vmatmul.mubr.f32.gmra.mxu0 %v2261_v3 }
 0x3b2   :  { %v2264_v58 = vmax.f32 %v2200_v54, 0.0  ;;  %v2125_v59 = vmax.f32 %v1686_v56, %v2007_v57  ;;  %v2201_v61 = vadd.f32 %v6822_v43, %v2124_v55 }
 0x3b3   :  { %v1690_v62 = vpop.f32.mrf.mxu0  ;;  %v2011_v63 = vpop.f32.mrf.mxu1 }
 0x3b4   :  { %v2202_v2 = vadd.f32 %v6825_v48, %v2125_v59  ;;  %v2126_v0 = vmax.f32 %v1690_v62, %v2011_v63  ;;  %2475 = vmatprep.mubr.f32.mxu0 %v2264_v58  ;;  %v2265_v7 = vmax.f32 %v2201_v61, 0.0 }
 0x3b5   :  { %v1692_v1 = vpop.f32.mrf.mxu0  ;;  %v2013_v4 = vpop.f32.mrf.mxu1  ;;  %2476 = vmatmul.mubr.f32.gmra.mxu0 %v2263_v60 }
 0x3b6   :  { %v2266_v5 = vmax.f32 %v2202_v2, 0.0  ;;  %v2127_v6 = vmax.f32 %v1692_v1, %v2013_v4  ;;  %v2203_v8 = vadd.f32 %v6822_v43, %v2126_v0 }
 0x3b7   :  { %v1696_v9 = vpop.f32.mrf.mxu0  ;;  %v2017_v10 = vpop.f32.mrf.mxu1 }
 0x3b8   :  { %v2204_v12 = vadd.f32 %v6825_v48, %v2127_v6  ;;  %v2128_v13 = vmax.f32 %v1696_v9, %v2017_v10  ;;  %2480 = vmatprep.mubr.f32.mxu0 %v2266_v5  ;;  %v2267_v17 = vmax.f32 %v2203_v8, 0.0 }
 0x3b9   :  { %v1698_v14 = vpop.f32.mrf.mxu0  ;;  %v2019_v15 = vpop.f32.mrf.mxu1  ;;  %2481 = vmatmul.mubr.f32.gmra.mxu0 %v2265_v7 }
 0x3ba   :  { %v2268_v16 = vmax.f32 %v2204_v12, 0.0  ;;  %v2129_v18 = vmax.f32 %v1698_v14, %v2019_v15  ;;  %v2205_v19 = vadd.f32 %v6822_v43, %v2128_v13 }
 0x3bb   :  { %v1702_v20 = vpop.f32.mrf.mxu0  ;;  %v2023_v21 = vpop.f32.mrf.mxu1 }
 0x3bc   :  { %v2206_v22 = vadd.f32 %v6825_v48, %v2129_v18  ;;  %v2130_v23 = vmax.f32 %v1702_v20, %v2023_v21  ;;  %2485 = vmatprep.mubr.f32.mxu0 %v2268_v16  ;;  %v2269_v28 = vmax.f32 %v2205_v19, 0.0 }
 0x3bd   :  { %v1704_v24 = vpop.f32.mrf.mxu0  ;;  %v2025_v25 = vpop.f32.mrf.mxu1  ;;  %2486 = vmatmul.mubr.f32.gmra.mxu0 %v2267_v17 }
 0x3be   :  { %v2270_v26 = vmax.f32 %v2206_v22, 0.0  ;;  %v2131_v27 = vmax.f32 %v1704_v24, %v2025_v25  ;;  %v2207_v29 = vadd.f32 %v6822_v43, %v2130_v23 }
 0x3bf   :  { %v1708_v30 = vpop.f32.mrf.mxu0  ;;  %v2029_v31 = vpop.f32.mrf.mxu1 }
 0x3c0   :  { %v2208_v32 = vadd.f32 %v6825_v48, %v2131_v27  ;;  %v2132_v33 = vmax.f32 %v1708_v30, %v2029_v31  ;;  %2490 = vmatprep.mubr.f32.mxu0 %v2270_v26  ;;  %v2271_v38 = vmax.f32 %v2207_v29, 0.0 }
 0x3c1   :  { %v1710_v34 = vpop.f32.mrf.mxu0  ;;  %v2031_v35 = vpop.f32.mrf.mxu1  ;;  %2491 = vmatmul.mubr.f32.gmra.mxu0 %v2269_v28 }
 0x3c2   :  { %v2272_v36 = vmax.f32 %v2208_v32, 0.0  ;;  %v2133_v37 = vmax.f32 %v1710_v34, %v2031_v35  ;;  %v2209_v39 = vadd.f32 %v6822_v43, %v2132_v33 }
 0x3c3   :  { %v1714_v40 = vpop.f32.mrf.mxu0  ;;  %v2035_v41 = vpop.f32.mrf.mxu1 }
 0x3c4   :  { %v2210_v11 = vadd.f32 %v6825_v48, %v2133_v37  ;;  %v2134_v50 = vmax.f32 %v1714_v40, %v2035_v41  ;;  %2495 = vmatprep.mubr.f32.mxu0 %v2272_v36  ;;  %v2273_v52 = vmax.f32 %v2209_v39, 0.0 }
 0x3c5   :  { %v1716_v42 = vpop.f32.mrf.mxu0  ;;  %v2037_v44 = vpop.f32.mrf.mxu1  ;;  %2496 = vmatmul.mubr.f32.gmra.mxu0 %v2271_v38 }
 0x3c6   :  { %v2274_v3 = vmax.f32 %v2210_v11, 0.0  ;;  %v2135_v51 = vmax.f32 %v1716_v42, %v2037_v44  ;;  %v2211_v53 = vadd.f32 %v6822_v43, %v2134_v50 }
 0x3c7   :  { %v1720_v54 = vpop.f32.mrf.mxu0  ;;  %v2041_v55 = vpop.f32.mrf.mxu1 }
 0x3c8   :  { %v2212_v56 = vadd.f32 %v6825_v48, %v2135_v51  ;;  %v2136_v57 = vmax.f32 %v1720_v54, %v2041_v55  ;;  %2500 = vmatprep.mubr.f32.mxu0 %v2274_v3  ;;  %v2275_v62 = vmax.f32 %v2211_v53, 0.0 }
 0x3c9   :  { %v1722_v58 = vpop.f32.mrf.mxu0  ;;  %v2043_v59 = vpop.f32.mrf.mxu1  ;;  %2501 = vmatmul.mubr.f32.gmra.mxu0 %v2273_v52 }
 0x3ca   :  { %v2276_v60 = vmax.f32 %v2212_v56, 0.0  ;;  %v2137_v61 = vmax.f32 %v1722_v58, %v2043_v59  ;;  %v2213_v63 = vadd.f32 %v6822_v43, %v2136_v57 }
 0x3cb   :  { %v1726_v2 = vpop.f32.mrf.mxu0  ;;  %v2047_v0 = vpop.f32.mrf.mxu1 }
 0x3cc   :  { %v2214_v1 = vadd.f32 %v6825_v48, %v2137_v61  ;;  %v2138_v4 = vmax.f32 %v1726_v2, %v2047_v0  ;;  %2505 = vmatprep.mubr.f32.mxu0 %v2276_v60  ;;  %v2277_v9 = vmax.f32 %v2213_v63, 0.0 }
 0x3cd   :  { %v1728_v5 = vpop.f32.mrf.mxu0  ;;  %v2049_v6 = vpop.f32.mrf.mxu1  ;;  %2506 = vmatmul.mubr.f32.gmra.mxu0 %v2275_v62 }
 0x3ce   :  { %v2278_v7 = vmax.f32 %v2214_v1, 0.0  ;;  %v2139_v8 = vmax.f32 %v1728_v5, %v2049_v6  ;;  %v2215_v10 = vadd.f32 %v6822_v43, %v2138_v4 }
 0x3cf   :  { %v1732_v12 = vpop.f32.mrf.mxu0  ;;  %v2053_v13 = vpop.f32.mrf.mxu1 }
 0x3d0   :  { %v2216_v14 = vadd.f32 %v6825_v48, %v2139_v8  ;;  %v2140_v15 = vmax.f32 %v1732_v12, %v2053_v13  ;;  %2510 = vmatprep.mubr.f32.mxu0 %v2278_v7  ;;  %v2279_v20 = vmax.f32 %v2215_v10, 0.0 }
 0x3d1   :  { %v1734_v16 = vpop.f32.mrf.mxu0  ;;  %v2055_v18 = vpop.f32.mrf.mxu1  ;;  %2511 = vmatmul.mubr.f32.gmra.mxu0 %v2277_v9 }
 0x3d2   :  { %v2280_v17 = vmax.f32 %v2216_v14, 0.0  ;;  %v2141_v19 = vmax.f32 %v1734_v16, %v2055_v18  ;;  %v2217_v21 = vadd.f32 %v6822_v43, %v2140_v15  ;;  %v6897_v18 = vld [vmem:[%s7862_s8 + $0x4] ss:$0 sm:$0xff] }
 0x3d3   :  { %v1738_v22 = vpop.f32.mrf.mxu0  ;;  %v2059_v23 = vpop.f32.mrf.mxu1 }
 0x3d4   :  { %v2218_v24 = vadd.f32 %v6825_v48, %v2141_v19  ;;  %v2142_v25 = vmax.f32 %v1738_v22, %v2059_v23  ;;  %2515 = vmatprep.mubr.f32.mxu0 %v2280_v17  ;;  %v2281_v30 = vmax.f32 %v2217_v21, 0.0 }
 0x3d5   :  { %v1740_v26 = vpop.f32.mrf.mxu0  ;;  %v2061_v27 = vpop.f32.mrf.mxu1  ;;  %2516 = vmatmul.mubr.f32.gmra.mxu0 %v2279_v20 }
 0x3d6   :  { %v2282_v28 = vmax.f32 %v2218_v24, 0.0  ;;  %v2143_v29 = vmax.f32 %v1740_v26, %v2061_v27  ;;  %v2219_v31 = vadd.f32 %v6822_v43, %v2142_v25 }
 0x3d7   :  { %v1744_v32 = vpop.f32.mrf.mxu0  ;;  %v2065_v33 = vpop.f32.mrf.mxu1 }
 0x3d8   :  { %v2220_v34 = vadd.f32 %v6825_v48, %v2143_v29  ;;  %v2144_v35 = vmax.f32 %v1744_v32, %v2065_v33  ;;  %2520 = vmatprep.mubr.f32.mxu0 %v2282_v28  ;;  %v2283_v40 = vmax.f32 %v2219_v31, 0.0 }
 0x3d9   :  { %v1746_v36 = vpop.f32.mrf.mxu0  ;;  %v2067_v37 = vpop.f32.mrf.mxu1  ;;  %2521 = vmatmul.mubr.f32.gmra.mxu0 %v2281_v30 }
 0x3da   :  { %v2284_v38 = vmax.f32 %v2220_v34, 0.0  ;;  %v2145_v39 = vmax.f32 %v1746_v36, %v2067_v37  ;;  %v2221_v41 = vadd.f32 %v6822_v43, %v2144_v35 }
 0x3db   :  { %v1750_v11 = vpop.f32.mrf.mxu0  ;;  %v2071_v50 = vpop.f32.mrf.mxu1 }
 0x3dc   :  { %v2222_v42 = vadd.f32 %v6825_v48, %v2145_v39  ;;  %v2146_v44 = vmax.f32 %v1750_v11, %v2071_v50  ;;  %2525 = vmatprep.mubr.f32.mxu0 %v2284_v38  ;;  %v2285_v54 = vmax.f32 %v2221_v41, 0.0 }
 0x3dd   :  { %v1752_v3 = vpop.f32.mrf.mxu0  ;;  %v2073_v51 = vpop.f32.mrf.mxu1  ;;  %2526 = vmatmul.mubr.f32.gmra.mxu0 %v2283_v40 }
 0x3de   :  { %v2286_v52 = vmax.f32 %v2222_v42, 0.0  ;;  %v2147_v53 = vmax.f32 %v1752_v3, %v2073_v51  ;;  %v2223_v55 = vadd.f32 %v6822_v43, %v2146_v44 }
 0x3df   :  { %v1756_v56 = vpop.f32.mrf.mxu0  ;;  %v2077_v57 = vpop.f32.mrf.mxu1 }
 0x3e0   :  { %v2224_v58 = vadd.f32 %v6825_v48, %v2147_v53  ;;  %v2148_v59 = vmax.f32 %v1756_v56, %v2077_v57  ;;  %2530 = vmatprep.mubr.f32.mxu0 %v2286_v52  ;;  %v2287_v2 = vmax.f32 %v2223_v55, 0.0 }
 0x3e1   :  { %v1758_v60 = vpop.f32.mrf.mxu0  ;;  %v2079_v61 = vpop.f32.mrf.mxu1  ;;  %2531 = vmatmul.mubr.f32.gmra.mxu0 %v2285_v54 }
 0x3e2   :  { %v2288_v62 = vmax.f32 %v2224_v58, 0.0  ;;  %v2149_v63 = vmax.f32 %v1758_v60, %v2079_v61  ;;  %v2225_v0 = vadd.f32 %v6822_v43, %v2148_v59 }
 0x3e3   :  { %v1762_v1 = vpop.f32.mrf.mxu0  ;;  %v2083_v4 = vpop.f32.mrf.mxu1 }
 0x3e4   :  { %v2226_v5 = vadd.f32 %v6825_v48, %v2149_v63  ;;  %v2150_v6 = vmax.f32 %v1762_v1, %v2083_v4  ;;  %2535 = vmatprep.mubr.f32.mxu0 %v2288_v62  ;;  %v2289_v12 = vmax.f32 %v2225_v0, 0.0 }
 0x3e5   :  { %v1764_v7 = vpop.f32.mrf.mxu0  ;;  %v2085_v8 = vpop.f32.mrf.mxu1  ;;  %2536 = vmatmul.mubr.f32.gmra.mxu0 %v2287_v2 }
 0x3e6   :  { %v2290_v9 = vmax.f32 %v2226_v5, 0.0  ;;  %v2151_v10 = vmax.f32 %v1764_v7, %v2085_v8  ;;  %v2227_v13 = vadd.f32 %v6822_v43, %v2150_v6  ;;  %v6903_v43 = vld [vmem:[%s7862_s8 + $0x5] ss:$0 sm:$0xff]  ;;  %s6221_s8 = smov [#allocation13]  }
 0x3e7   :  { %s5655_s22 = sshll.u32 %s6221_s8, 4  ;;  %s5656_s22 = int_to_ptr.vmem [resolvable:$true] %s5655_s22 }
 0x3e8   :  { %v2228_v14 = vadd.f32 %v6825_v48, %v2151_v10  ;;  %2540 = vmatprep.mubr.f32.mxu0 %v2290_v9  ;;  %v2291_v16 = vmax.f32 %v2227_v13, 0.0  ;;  %s6178_s7 = scalar_lea.vmem %s5656_s22, 32  ;;  %p6183_p3 = scmp.lt.s32.totalorder %s5656_s22, %s5656_s22 }
 0x3e9   :  { %2541 = vmatmul.mubr.f32.gmra.mxu0 %v2289_v12  ;;  %p6179_p2 = scmp.ne.s32.totalorder %s5656_s22, %s6178_s7  ;;  %p6184_p4 = scmp.lt.s32.totalorder %s6178_s7, %s6178_s7 }
 0x3ea   :  { %v2292_v15 = vmax.f32 %v2228_v14, 0.0 }
 0x3eb   :  { %p6185_p5 = por %p6184_p4, %p6183_p3 }
 0x3ec   :  { %2545 = vmatprep.mubr.f32.mxu0 %v2292_v15 }
 0x3ed   :  { %2546 = vmatmul.mubr.f32.gmra.mxu0 %v2291_v16  ;;  %p6186_p6 = pnand %p6185_p5, %p6179_p2 }
 0x431   :  { %v2392_v17 = vpop.f32.mrf.mxu0 }
 0x432   :  { %v2393_v19 = vadd.f32 %v2392_v17, %v6897_v18 }
 0x433   :  { %v2394_v20 = vpop.f32.mrf.mxu0 }
 0x434   :  { %v2551_v48 = vmax.f32 %v2393_v19, 0.0 }
 0x435   :  { %v2397_v21 = vpop.f32.mrf.mxu0 }
 0x436   :  { %v2398_v22 = vadd.f32 %v2397_v21, %v6897_v18  ;;  %v2584_v23 = vmul.f32 %v6903_v43, %v2551_v48 }
 0x437   :  { %v2399_v24 = vpop.f32.mrf.mxu0 }
 0x438   :  { %v2552_v25 = vmax.f32 %v2398_v22, 0.0  ;;  %2616 = vadd.xlane.f32.xlu0 %v2584_v23 }
 0x439   :  { %v2402_v26 = vpop.f32.mrf.mxu0 }
 0x43a   :  { %v2403_v27 = vadd.f32 %v2402_v26, %v6897_v18  ;;  %v2585_v28 = vmul.f32 %v6903_v43, %v2552_v25 }
 0x43b   :  { %v2404_v29 = vpop.f32.mrf.mxu0 }
 0x43c   :  { %v2553_v30 = vmax.f32 %v2403_v27, 0.0  ;;  %2618 = vadd.xlane.f32.xlu0 %v2585_v28 }
 0x43d   :  { %v2407_v31 = vpop.f32.mrf.mxu0 }
 0x43e   :  { %v2408_v32 = vadd.f32 %v2407_v31, %v6897_v18  ;;  %v2586_v33 = vmul.f32 %v6903_v43, %v2553_v30 }
 0x43f   :  { %v2409_v34 = vpop.f32.mrf.mxu0 }
 0x440   :  { %v2554_v35 = vmax.f32 %v2408_v32, 0.0  ;;  %2620 = vadd.xlane.f32.xlu1 %v2586_v33 }
 0x441   :  { %v2412_v36 = vpop.f32.mrf.mxu0 }
 0x442   :  { %v2413_v37 = vadd.f32 %v2412_v36, %v6897_v18  ;;  %v2587_v38 = vmul.f32 %v6903_v43, %v2554_v35 }
 0x443   :  { %v2414_v39 = vpop.f32.mrf.mxu0 }
 0x444   :  { %v2555_v40 = vmax.f32 %v2413_v37, 0.0  ;;  %2622 = vadd.xlane.f32.xlu1 %v2587_v38 }
 0x445   :  { %v2417_v41 = vpop.f32.mrf.mxu0 }
 0x446   :  { %v2418_v11 = vadd.f32 %v2417_v41, %v6897_v18  ;;  %v2588_v50 = vmul.f32 %v6903_v43, %v2555_v40 }
 0x447   :  { %v2419_v42 = vpop.f32.mrf.mxu0 }
 0x448   :  { %v2556_v44 = vmax.f32 %v2418_v11, 0.0  ;;  %2624 = vadd.xlane.f32.xlu0 %v2588_v50 }
 0x449   :  { %v2422_v3 = vpop.f32.mrf.mxu0 }
 0x44a   :  { %v2423_v51 = vadd.f32 %v2422_v3, %v6897_v18  ;;  %v2589_v52 = vmul.f32 %v6903_v43, %v2556_v44 }
 0x44b   :  { %v2424_v53 = vpop.f32.mrf.mxu0 }
 0x44c   :  { %v2557_v54 = vmax.f32 %v2423_v51, 0.0  ;;  %2626 = vadd.xlane.f32.xlu1 %v2589_v52 }
 0x44d   :  { %v2427_v55 = vpop.f32.mrf.mxu0 }
 0x44e   :  { %v2428_v56 = vadd.f32 %v2427_v55, %v6897_v18  ;;  %v2590_v57 = vmul.f32 %v6903_v43, %v2557_v54 }
 0x44f   :  { %v2429_v58 = vpop.f32.mrf.mxu0 }
 0x450   :  { %v2558_v59 = vmax.f32 %v2428_v56, 0.0  ;;  %2628 = vadd.xlane.f32.xlu0 %v2590_v57 }
 0x451   :  { %v2432_v60 = vpop.f32.mrf.mxu0 }
 0x452   :  { %v2433_v61 = vadd.f32 %v2432_v60, %v6897_v18  ;;  %v2591_v62 = vmul.f32 %v6903_v43, %v2558_v59 }
 0x453   :  { %v2434_v63 = vpop.f32.mrf.mxu0 }
 0x454   :  { %v2559_v2 = vmax.f32 %v2433_v61, 0.0  ;;  %2630 = vadd.xlane.f32.xlu1 %v2591_v62 }
 0x455   :  { %v2437_v0 = vpop.f32.mrf.mxu0 }
 0x456   :  { %v2438_v1 = vadd.f32 %v2437_v0, %v6897_v18  ;;  %v2592_v4 = vmul.f32 %v6903_v43, %v2559_v2 }
 0x457   :  { %v2439_v5 = vpop.f32.mrf.mxu0 }
 0x458   :  { %v2560_v6 = vmax.f32 %v2438_v1, 0.0  ;;  %2632 = vadd.xlane.f32.xlu0 %v2592_v4 }
 0x459   :  { %v2442_v7 = vpop.f32.mrf.mxu0 }
 0x45a   :  { %v2443_v8 = vadd.f32 %v2442_v7, %v6897_v18  ;;  %v2593_v9 = vmul.f32 %v6903_v43, %v2560_v6 }
 0x45b   :  { %v2444_v10 = vpop.f32.mrf.mxu0 }
 0x45c   :  { %v2561_v12 = vmax.f32 %v2443_v8, 0.0  ;;  %2634 = vadd.xlane.f32.xlu1 %v2593_v9 }
 0x45d   :  { %v2447_v13 = vpop.f32.mrf.mxu0 }
 0x45e   :  { %v2448_v14 = vadd.f32 %v2447_v13, %v6897_v18  ;;  %v2594_v15 = vmul.f32 %v6903_v43, %v2561_v12 }
 0x45f   :  { %v2449_v16 = vpop.f32.mrf.mxu0 }
 0x460   :  { %v2562_v17 = vmax.f32 %v2448_v14, 0.0  ;;  %2636 = vadd.xlane.f32.xlu0 %v2594_v15 }
 0x461   :  { %v2452_v19 = vpop.f32.mrf.mxu0 }
 0x462   :  { %v2453_v20 = vadd.f32 %v2452_v19, %v6897_v18  ;;  %v2595_v48 = vmul.f32 %v6903_v43, %v2562_v17 }
 0x463   :  { %v2454_v21 = vpop.f32.mrf.mxu0 }
 0x464   :  { %v2563_v22 = vmax.f32 %v2453_v20, 0.0  ;;  %2638 = vadd.xlane.f32.xlu1 %v2595_v48 }
 0x465   :  { %v2457_v23 = vpop.f32.mrf.mxu0 }
 0x466   :  { %v2458_v24 = vadd.f32 %v2457_v23, %v6897_v18  ;;  %v2596_v25 = vmul.f32 %v6903_v43, %v2563_v22 }
 0x467   :  { %v2459_v26 = vpop.f32.mrf.mxu0 }
 0x468   :  { %v2564_v27 = vmax.f32 %v2458_v24, 0.0  ;;  %2640 = vadd.xlane.f32.xlu0 %v2596_v25 }
 0x469   :  { %v2462_v28 = vpop.f32.mrf.mxu0 }
 0x46a   :  { %v2463_v29 = vadd.f32 %v2462_v28, %v6897_v18  ;;  %v2597_v30 = vmul.f32 %v6903_v43, %v2564_v27 }
 0x46b   :  { %v2464_v31 = vpop.f32.mrf.mxu0 }
 0x46c   :  { %v2565_v32 = vmax.f32 %v2463_v29, 0.0  ;;  %2642 = vadd.xlane.f32.xlu1 %v2597_v30 }
 0x46d   :  { %v2467_v33 = vpop.f32.mrf.mxu0 }
 0x46e   :  { %v2468_v34 = vadd.f32 %v2467_v33, %v6897_v18  ;;  %v2598_v35 = vmul.f32 %v6903_v43, %v2565_v32 }
 0x46f   :  { %v2469_v36 = vpop.f32.mrf.mxu0 }
 0x470   :  { %v2566_v37 = vmax.f32 %v2468_v34, 0.0  ;;  %2644 = vadd.xlane.f32.xlu0 %v2598_v35 }
 0x471   :  { %v2472_v38 = vpop.f32.mrf.mxu0 }
 0x472   :  { %v2473_v39 = vadd.f32 %v2472_v38, %v6897_v18  ;;  %v2599_v40 = vmul.f32 %v6903_v43, %v2566_v37 }
 0x473   :  { %v2474_v41 = vpop.f32.mrf.mxu0 }
 0x474   :  { %v2567_v11 = vmax.f32 %v2473_v39, 0.0  ;;  %2646 = vadd.xlane.f32.xlu1 %v2599_v40 }
 0x475   :  { %v2477_v50 = vpop.f32.mrf.mxu0 }
 0x476   :  { %v2478_v42 = vadd.f32 %v2477_v50, %v6897_v18  ;;  %v2600_v44 = vmul.f32 %v6903_v43, %v2567_v11 }
 0x477   :  { %v2479_v3 = vpop.f32.mrf.mxu0 }
 0x478   :  { %v2568_v51 = vmax.f32 %v2478_v42, 0.0  ;;  %2648 = vadd.xlane.f32.xlu0 %v2600_v44 }
 0x479   :  { %v2482_v52 = vpop.f32.mrf.mxu0 }
 0x47a   :  { %v2483_v53 = vadd.f32 %v2482_v52, %v6897_v18  ;;  %v2601_v54 = vmul.f32 %v6903_v43, %v2568_v51 }
 0x47b   :  { %v2484_v55 = vpop.f32.mrf.mxu0 }
 0x47c   :  { %v2569_v56 = vmax.f32 %v2483_v53, 0.0  ;;  %2650 = vadd.xlane.f32.xlu1 %v2601_v54 }
 0x47d   :  { %v2487_v57 = vpop.f32.mrf.mxu0 }
 0x47e   :  { %v2488_v58 = vadd.f32 %v2487_v57, %v6897_v18  ;;  %v2602_v59 = vmul.f32 %v6903_v43, %v2569_v56 }
 0x47f   :  { %v2489_v60 = vpop.f32.mrf.mxu0 }
 0x480   :  { %v2570_v61 = vmax.f32 %v2488_v58, 0.0  ;;  %2652 = vadd.xlane.f32.xlu0 %v2602_v59 }
 0x481   :  { %v2492_v62 = vpop.f32.mrf.mxu0 }
 0x482   :  { %v2493_v63 = vadd.f32 %v2492_v62, %v6897_v18  ;;  %v2603_v2 = vmul.f32 %v6903_v43, %v2570_v61 }
 0x483   :  { %v2494_v0 = vpop.f32.mrf.mxu0 }
 0x484   :  { %v2571_v1 = vmax.f32 %v2493_v63, 0.0  ;;  %2654 = vadd.xlane.f32.xlu1 %v2603_v2  ;;  %v6220_v0 = vmov 1966171168  }
 0x485   :  { %v2497_v4 = vpop.f32.mrf.mxu0 }
 0x486   :  { %v2498_v5 = vadd.f32 %v2497_v4, %v6897_v18  ;;  %v2604_v6 = vmul.f32 %v6903_v43, %v2571_v1  ;;  %v3779_v1 = vunpack.c.l.s4 %v6220_v0 }
 0x487   :  { %v2499_v7 = vpop.f32.mrf.mxu0 }
 0x488   :  { %v2572_v8 = vmax.f32 %v2498_v5, 0.0  ;;  %2656 = vadd.xlane.f32.xlu0 %v2604_v6  ;;  %v3780_v4 = vunpack.c.0.s8 %v3779_v1  ;;  %v6969_v5 = vsub.s32 2, %v6706_v46  ;;  %v6972_v6 = vsub.s32 3, %v6706_v46  ;;  %v6974_v7 = vpop.permute.xlu1 %2683 }
 0x489   :  { %v2502_v9 = vpop.f32.mrf.mxu0 }
 0x48a   :  { %v2503_v10 = vadd.f32 %v2502_v9, %v6897_v18  ;;  %v2605_v12 = vmul.f32 %v6903_v43, %v2572_v8  ;;  %v6977_v8 = vsub.s32 4, %v6706_v46  ;;  %v6980_v9 = vsub.s32 5, %v6706_v46 }
 0x48b   :  { %v2504_v13 = vpop.f32.mrf.mxu0 }
 0x48c   :  { %v2573_v14 = vmax.f32 %v2503_v10, 0.0  ;;  %2658 = vadd.xlane.f32.xlu1 %v2605_v12  ;;  %v6986_v10 = vsub.s32 7, %v6706_v46  ;;  %v6990_v13 = vsub.s32 %v3780_v4, %v6706_v46 }
 0x48d   :  { %v2507_v15 = vpop.f32.mrf.mxu0 }
 0x48e   :  { %v2508_v16 = vadd.f32 %v2507_v15, %v6897_v18  ;;  %v2606_v17 = vmul.f32 %v6903_v43, %v2573_v14 }
 0x48f   :  { %v2509_v19 = vpop.f32.mrf.mxu0 }
 0x490   :  { %v2574_v20 = vmax.f32 %v2508_v16, 0.0  ;;  %2660 = vadd.xlane.f32.xlu0 %v2606_v17 }
 0x491   :  { %v2512_v48 = vpop.f32.mrf.mxu0 }
 0x492   :  { %v2513_v21 = vadd.f32 %v2512_v48, %v6897_v18  ;;  %v2607_v22 = vmul.f32 %v6903_v43, %v2574_v20 }
 0x493   :  { %v2514_v23 = vpop.f32.mrf.mxu0 }
 0x494   :  { %v2575_v24 = vmax.f32 %v2513_v21, 0.0  ;;  %2662 = vadd.xlane.f32.xlu1 %v2607_v22 }
 0x495   :  { %v2517_v25 = vpop.f32.mrf.mxu0 }
 0x496   :  { %v2518_v26 = vadd.f32 %v2517_v25, %v6897_v18  ;;  %v2608_v27 = vmul.f32 %v6903_v43, %v2575_v24 }
 0x497   :  { %v2519_v28 = vpop.f32.mrf.mxu0 }
 0x498   :  { %v2576_v29 = vmax.f32 %v2518_v26, 0.0  ;;  %2664 = vadd.xlane.f32.xlu0 %v2608_v27 }
 0x499   :  { %v2522_v30 = vpop.f32.mrf.mxu0 }
 0x49a   :  { %v2523_v31 = vadd.f32 %v2522_v30, %v6897_v18  ;;  %v2609_v32 = vmul.f32 %v6903_v43, %v2576_v29 }
 0x49b   :  { %v2524_v33 = vpop.f32.mrf.mxu0 }
 0x49c   :  { %v2577_v34 = vmax.f32 %v2523_v31, 0.0  ;;  %2666 = vadd.xlane.f32.xlu0 %v2609_v32 }
 0x49d   :  { %v2527_v35 = vpop.f32.mrf.mxu0 }
 0x49e   :  { %v2528_v36 = vadd.f32 %v2527_v35, %v6897_v18  ;;  %v2610_v37 = vmul.f32 %v6903_v43, %v2577_v34 }
 0x49f   :  { %v2529_v38 = vpop.f32.mrf.mxu0 }
 0x4a0   :  { %v2578_v39 = vmax.f32 %v2528_v36, 0.0  ;;  %2668 = vadd.xlane.f32.xlu0 %v2610_v37 }
 0x4a1   :  { %v2532_v40 = vpop.f32.mrf.mxu0 }
 0x4a2   :  { %v2533_v41 = vadd.f32 %v2532_v40, %v6897_v18  ;;  %v2611_v11 = vmul.f32 %v6903_v43, %v2578_v39 }
 0x4a3   :  { %v2534_v50 = vpop.f32.mrf.mxu0 }
 0x4a4   :  { %v2579_v42 = vmax.f32 %v2533_v41, 0.0  ;;  %2670 = vadd.xlane.f32.xlu0 %v2611_v11 }
 0x4a5   :  { %v2537_v44 = vpop.f32.mrf.mxu0 }
 0x4a6   :  { %v2538_v3 = vadd.f32 %v2537_v44, %v6897_v18  ;;  %v2612_v51 = vmul.f32 %v6903_v43, %v2579_v42 }
 0x4a7   :  { %v2539_v52 = vpop.f32.mrf.mxu0 }
 0x4a8   :  { %v2580_v53 = vmax.f32 %v2538_v3, 0.0  ;;  %2672 = vadd.xlane.f32.xlu0 %v2612_v51 }
 0x4a9   :  { %v2542_v54 = vpop.f32.mrf.mxu0 }
 0x4aa   :  { %v2543_v55 = vadd.f32 %v2542_v54, %v6897_v18  ;;  %v2613_v56 = vmul.f32 %v6903_v43, %v2580_v53 }
 0x4ab   :  { %v2544_v57 = vpop.f32.mrf.mxu0 }
 0x4ac   :  { %v2581_v58 = vmax.f32 %v2543_v55, 0.0  ;;  %2674 = vadd.xlane.f32.xlu1 %v2613_v56 }
 0x4ad   :  { %v2547_v59 = vpop.f32.mrf.mxu0 }
 0x4ae   :  { %v2548_v60 = vadd.f32 %v2547_v59, %v6897_v18  ;;  %v2614_v61 = vmul.f32 %v6903_v43, %v2581_v58 }
 0x4af   :  { %v2549_v62 = vpop.f32.mrf.mxu0 }
 0x4b0   :  { %v2582_v63 = vmax.f32 %v2548_v60, 0.0  ;;  %2676 = vadd.xlane.f32.xlu0 %v2614_v61 }
 0x4b2   :  { %v2615_v2 = vmul.f32 %v6903_v43, %v2582_v63  ;;  %v6983_v43 = vsub.s32 6, %v6706_v46 }
 0x4b4   :  { %2678 = vadd.xlane.f32.xlu0 %v2615_v2 }
 0x4c1   :  { %v2617_v18 = vpop.xlane.xlu0 %2616 }
 0x4c2   :  { %v2686_v12 = vadd.f32 %v6974_v7, %v2617_v18 }
 0x4c4   :  { %v2753_v14 = vrot.slane %v2686_v12, %v6709_v47  ;;  %v2757_v15 = vrot.slane %v2686_v12, %v6715_v49  ;;  %v2761_v16 = vrot.slane %v2686_v12, %v6969_v5  ;;  %v2765_v17 = vrot.slane %v2686_v12, %v6972_v6 }
 0x4c5   :  { %v2619_v19 = vpop.xlane.xlu0 %2618  ;;  %v2769_v20 = vrot.slane %v2686_v12, %v6977_v8  ;;  %v2773_v48 = vrot.slane %v2686_v12, %v6980_v9  ;;  %v2777_v21 = vrot.slane %v2686_v12, %v6983_v43  ;;  %v2781_v22 = vrot.slane %v2686_v12, %v6986_v10 }
 0x4c6   :  { %v2687_v23 = vadd.f32 %v6974_v7, %v2619_v19  ;;  %v3774_v24 = vcombine.low %v2753_v14, %v2757_v15  ;;  %v3775_v25 = vcombine.low %v2761_v16, %v2765_v17 }
 0x4c7   :  { %v3776_v26 = vcombine.low %v2769_v20, %v2773_v48  ;;  %v3777_v27 = vcombine.low %v2777_v21, %v2781_v22 }
 0x4c8   :  { %v3784_v28 = vrot.slane %v3774_v24, %v6990_v13  ;;  %v3791_v29 = vrot.slane %v3775_v25, %v6990_v13  ;;  %v2785_v30 = vrot.slane %v2687_v23, %v6709_v47  ;;  %v2789_v31 = vrot.slane %v2687_v23, %v6715_v49 }
 0x4c9   :  { %v2621_v32 = vpop.xlane.xlu1 %2620  ;;  %v3798_v33 = vrot.slane %v3776_v26, %v6990_v13  ;;  %v3805_v34 = vrot.slane %v3777_v27, %v6990_v13  ;;  %v2793_v35 = vrot.slane %v2687_v23, %v6969_v5  ;;  %v2797_v36 = vrot.slane %v2687_v23, %v6972_v6 }
 0x4ca   :  { %v2688_v37 = vadd.f32 %v6974_v7, %v2621_v32  ;;  %v3806_v38 = vcombine.low %v3784_v28, %v3791_v29  ;;  %v2801_v39 = vrot.slane %v2687_v23, %v6977_v8  ;;  %v2805_v40 = vrot.slane %v2687_v23, %v6980_v9 }
 0x4cb   :  { %v3807_v41 = vcombine.low %v3798_v33, %v3805_v34  ;;  %v2809_v11 = vrot.slane %v2687_v23, %v6983_v43  ;;  %v2813_v50 = vrot.slane %v2687_v23, %v6986_v10  ;;  %v3823_v42 = vcombine.low %v2785_v30, %v2789_v31 }
 0x4cc   :  { %v3814_v44 = vrot.slane %v3806_v38, %v6990_v13  ;;  %v3824_v3 = vcombine.low %v2793_v35, %v2797_v36  ;;  %v3825_v51 = vcombine.low %v2801_v39, %v2805_v40  ;;  %v2817_v52 = vrot.slane %v2688_v37, %v6709_v47 }
 0x4cd   :  { %v2623_v53 = vpop.xlane.xlu1 %2622  ;;  %v3821_v54 = vrot.slane %v3807_v41, %v6990_v13  ;;  %v3826_v55 = vcombine.low %v2809_v11, %v2813_v50  ;;  %v3833_v56 = vrot.slane %v3823_v42, %v6990_v13  ;;  %v2821_v57 = vrot.slane %v2688_v37, %v6715_v49 }
 0x4ce   :  { %v2689_v58 = vadd.f32 %v6974_v7, %v2623_v53  ;;  %v3840_v59 = vrot.slane %v3824_v3, %v6990_v13  ;;  %v3847_v60 = vrot.slane %v3825_v51, %v6990_v13  ;;  %v2825_v61 = vrot.slane %v2688_v37, %v6969_v5 }
 0x4cf   :  { %v3822_v62 = vcombine.low %v3814_v44, %v3821_v54  ;;  %v3854_v63 = vrot.slane %v3826_v55, %v6990_v13  ;;  %v2829_v2 = vrot.slane %v2688_v37, %v6972_v6  ;;  %v2833_v0 = vrot.slane %v2688_v37, %v6977_v8 }
 0x4d0   :  { %v3855_v1 = vcombine.low %v3833_v56, %v3840_v59  ;;  %v2837_v4 = vrot.slane %v2688_v37, %v6980_v9  ;;  %v2841_v18 = vrot.slane %v2688_v37, %v6983_v43  ;;  %v2845_v12 = vrot.slane %v2688_v37, %v6986_v10 }
 0x4d1   :  { %5343 = vperm.xlu0 %6057, %v3822_v62   ;;  %v2625_v14 = vpop.xlane.xlu0 %2624  ;;  %v3856_v15 = vcombine.low %v3847_v60, %v3854_v63  ;;  %v3872_v16 = vcombine.low %v2817_v52, %v2821_v57  ;;  %v3873_v17 = vcombine.low %v2825_v61, %v2829_v2  ;;  %v2849_v19 = vrot.slane %v2689_v58, %v6709_v47 }
 0x4d2   :  { %v2690_v20 = vadd.f32 %v6974_v7, %v2625_v14  ;;  %v3863_v48 = vrot.slane %v3855_v1, %v6990_v13  ;;  %v3874_v21 = vcombine.low %v2833_v0, %v2837_v4  ;;  %v3875_v22 = vcombine.low %v2841_v18, %v2845_v12 }
 0x4d3   :  { %v3870_v23 = vrot.slane %v3856_v15, %v6990_v13  ;;  %v3882_v24 = vrot.slane %v3872_v16, %v6990_v13  ;;  %v3889_v25 = vrot.slane %v3873_v17, %v6990_v13  ;;  %v2853_v26 = vrot.slane %v2689_v58, %v6715_v49 }
 0x4d4   :  { %v3896_v27 = vrot.slane %v3874_v21, %v6990_v13  ;;  %v3903_v28 = vrot.slane %v3875_v22, %v6990_v13  ;;  %v2857_v29 = vrot.slane %v2689_v58, %v6969_v5  ;;  %v2861_v30 = vrot.slane %v2689_v58, %v6972_v6 }
 0x4d5   :  { %v3871_v31 = vcombine.low %v3863_v48, %v3870_v23  ;;  %v2627_v32 = vpop.xlane.xlu1 %2626  ;;  %v3904_v33 = vcombine.low %v3882_v24, %v3889_v25  ;;  %v2865_v34 = vrot.slane %v2689_v58, %v6977_v8  ;;  %v2869_v35 = vrot.slane %v2689_v58, %v6980_v9 }
 0x4d6   :  { %v2691_v36 = vadd.f32 %v6974_v7, %v2627_v32  ;;  %v3905_v37 = vcombine.low %v3896_v27, %v3903_v28  ;;  %v2873_v38 = vrot.slane %v2689_v58, %v6983_v43  ;;  %v2877_v39 = vrot.slane %v2689_v58, %v6986_v10 }
 0x4d7   :  { %5346 = vperm.xlu1 %6056, %v3871_v31   ;;  %v3912_v40 = vrot.slane %v3904_v33, %v6990_v13  ;;  %v3921_v41 = vcombine.low %v2849_v19, %v2853_v26  ;;  %v3922_v11 = vcombine.low %v2857_v29, %v2861_v30  ;;  %v3923_v50 = vcombine.low %v2865_v34, %v2869_v35 }
 0x4d8   :  { %v3919_v42 = vrot.slane %v3905_v37, %v6990_v13  ;;  %v3924_v44 = vcombine.low %v2873_v38, %v2877_v39  ;;  %v2881_v3 = vrot.slane %v2690_v20, %v6709_v47  ;;  %v2885_v51 = vrot.slane %v2690_v20, %v6715_v49 }
 0x4d9   :  { %v2629_v52 = vpop.xlane.xlu0 %2628  ;;  %v3931_v53 = vrot.slane %v3921_v41, %v6990_v13  ;;  %v3938_v54 = vrot.slane %v3922_v11, %v6990_v13  ;;  %v3945_v55 = vrot.slane %v3923_v50, %v6990_v13  ;;  %v2889_v56 = vrot.slane %v2690_v20, %v6969_v5 }
 0x4da   :  { %v3920_v57 = vcombine.low %v3912_v40, %v3919_v42  ;;  %v7054_v58 = vadd.f32 %v6974_v7, %v2629_v52  ;;  %v3952_v59 = vrot.slane %v3924_v44, %v6990_v13  ;;  %v2893_v60 = vrot.slane %v2690_v20, %v6972_v6 }
 0x4db   :  { %v3953_v61 = vcombine.low %v3931_v53, %v3938_v54  ;;  %v2897_v62 = vrot.slane %v2690_v20, %v6977_v8  ;;  %v2901_v63 = vrot.slane %v2690_v20, %v6980_v9  ;;  %v2905_v2 = vrot.slane %v2690_v20, %v6983_v43 }
 0x4dc   :  { %5349 = vperm.xlu1 %6056, %v3920_v57   ;;  %v3954_v0 = vcombine.low %v3945_v55, %v3952_v59  ;;  %v2909_v1 = vrot.slane %v2690_v20, %v6986_v10  ;;  %v3970_v4 = vcombine.low %v2881_v3, %v2885_v51  ;;  %v3971_v18 = vcombine.low %v2889_v56, %v2893_v60 }
 0x4dd   :  { %v3961_v12 = vrot.slane %v3953_v61, %v6990_v13  ;;  %v2631_v14 = vpop.xlane.xlu1 %2630  ;;  %v3972_v15 = vcombine.low %v2897_v62, %v2901_v63  ;;  %v2913_v16 = vrot.slane %v2691_v36, %v6709_v47  ;;  %v2917_v17 = vrot.slane %v2691_v36, %v6715_v49 }
 0x4de   :  { %v3968_v19 = vrot.slane %v3954_v0, %v6990_v13  ;;  %v7067_v48 = vadd.f32 %v6974_v7, %v2631_v14  ;;  %v3973_v21 = vcombine.low %v2905_v2, %v2909_v1  ;;  %v3980_v22 = vrot.slane %v3970_v4, %v6990_v13 }
 0x4df   :  { %v3987_v20 = vrot.slane %v3971_v18, %v6990_v13  ;;  %v3994_v23 = vrot.slane %v3972_v15, %v6990_v13  ;;  %v2921_v24 = vrot.slane %v2691_v36, %v6969_v5  ;;  %v2925_v25 = vrot.slane %v2691_v36, %v6972_v6 }
 0x4e0   :  { %v3969_v26 = vcombine.low %v3961_v12, %v3968_v19  ;;  %v4001_v27 = vrot.slane %v3973_v21, %v6990_v13  ;;  %v2929_v28 = vrot.slane %v2691_v36, %v6977_v8  ;;  %v2933_v29 = vrot.slane %v2691_v36, %v6980_v9 }
 0x4e1   :  { %v4002_v30 = vcombine.low %v3980_v22, %v3987_v20  ;;  %v2633_v31 = vpop.xlane.xlu0 %2632  ;;  %v2937_v32 = vrot.slane %v2691_v36, %v6983_v43  ;;  %v2941_v33 = vrot.slane %v2691_v36, %v6986_v10  ;;  %v4019_v34 = vcombine.low %v2913_v16, %v2917_v17 }
 0x4e2   :  { %5352 = vperm.xlu1 %6056, %v3969_v26   ;;  %v4003_v35 = vcombine.low %v3994_v23, %v4001_v27  ;;  %v7080_v37 = vadd.f32 %v6974_v7, %v2633_v31  ;;  %v4020_v38 = vcombine.low %v2921_v24, %v2925_v25  ;;  %v4021_v39 = vcombine.low %v2929_v28, %v2933_v29 }
 0x4e3   :  { %v4010_v40 = vrot.slane %v4002_v30, %v6990_v13  ;;  %v4022_v41 = vcombine.low %v2937_v32, %v2941_v33  ;;  %v4029_v11 = vrot.slane %v4019_v34, %v6990_v13  ;;  %v2945_v50 = vrot.slane %v7054_v58, %v6709_v47 }
 0x4e4   :  { %v4017_v42 = vrot.slane %v4003_v35, %v6990_v13  ;;  %v4036_v36 = vrot.slane %v4020_v38, %v6990_v13  ;;  %v4043_v44 = vrot.slane %v4021_v39, %v6990_v13  ;;  %v2949_v3 = vrot.slane %v7054_v58, %v6715_v49 }
 0x4e5   :  { %v4050_v51 = vrot.slane %v4022_v41, %v6990_v13  ;;  %v2635_v52 = vpop.xlane.xlu1 %2634  ;;  %v2953_v53 = vrot.slane %v7054_v58, %v6969_v5  ;;  %v2957_v54 = vrot.slane %v7054_v58, %v6972_v6  ;;  %v2961_v55 = vrot.slane %v7054_v58, %v6977_v8 }
 0x4e6   :  { %v4018_v56 = vcombine.low %v4010_v40, %v4017_v42  ;;  %v4051_v57 = vcombine.low %v4029_v11, %v4036_v36  ;;  %v7099_v59 = vadd.f32 %v6974_v7, %v2635_v52  ;;  %v2965_v60 = vrot.slane %v7054_v58, %v6980_v9 }
 0x4e7   :  { %v4052_v61 = vcombine.low %v4043_v44, %v4050_v51  ;;  %v2969_v62 = vrot.slane %v7054_v58, %v6983_v43  ;;  %v2973_v63 = vrot.slane %v7054_v58, %v6986_v10  ;;  %v4068_v2 = vcombine.low %v2945_v50, %v2949_v3 }
 0x4e8   :  { %5355 = vperm.xlu1 %6056, %v4018_v56   ;;  %v4059_v0 = vrot.slane %v4051_v57, %v6990_v13  ;;  %v4069_v1 = vcombine.low %v2953_v53, %v2957_v54  ;;  %v4070_v4 = vcombine.low %v2961_v55, %v2965_v60  ;;  %v2977_v18 = vrot.slane %v7067_v48, %v6709_v47 }
 0x4e9   :  { %v4066_v12 = vrot.slane %v4052_v61, %v6990_v13  ;;  %v4071_v14 = vcombine.low %v2969_v62, %v2973_v63  ;;  %v4078_v15 = vrot.slane %v4068_v2, %v6990_v13  ;;  %v2637_v16 = vpop.xlane.xlu0 %2636  ;;  %v2981_v17 = vrot.slane %v7067_v48, %v6715_v49 }
 0x4ea   :  { %v4085_v58 = vrot.slane %v4069_v1, %v6990_v13  ;;  %v4092_v19 = vrot.slane %v4070_v4, %v6990_v13  ;;  %v7117_v21 = vadd.f32 %v6974_v7, %v2637_v16  ;;  %v2985_v22 = vrot.slane %v7067_v48, %v6969_v5 }
 0x4eb   :  { %v4067_v20 = vcombine.low %v4059_v0, %v4066_v12  ;;  %v4099_v23 = vrot.slane %v4071_v14, %v6990_v13  ;;  %v2989_v24 = vrot.slane %v7067_v48, %v6972_v6  ;;  %v2993_v25 = vrot.slane %v7067_v48, %v6977_v8 }
 0x4ec   :  { %v4100_v26 = vcombine.low %v4078_v15, %v4085_v58  ;;  %v2997_v27 = vrot.slane %v7067_v48, %v6980_v9  ;;  %v3001_v28 = vrot.slane %v7067_v48, %v6983_v43  ;;  %v3005_v29 = vrot.slane %v7067_v48, %v6986_v10 }
 0x4ed   :  { %5358 = vperm.xlu1 %6056, %v4067_v20   ;;  %v4101_v30 = vcombine.low %v4092_v19, %v4099_v23  ;;  %v4117_v31 = vcombine.low %v2977_v18, %v2981_v17  ;;  %v4118_v32 = vcombine.low %v2985_v22, %v2989_v24  ;;  %v2639_v33 = vpop.xlane.xlu1 %2638  ;;  %v3009_v34 = vrot.slane %v7080_v37, %v6709_v47 }
 0x4ee   :  { %v4108_v35 = vrot.slane %v4100_v26, %v6990_v13  ;;  %v4119_v38 = vcombine.low %v2993_v25, %v2997_v27  ;;  %v4120_v39 = vcombine.low %v3001_v28, %v3005_v29  ;;  %v7136_v40 = vadd.f32 %v6974_v7, %v2639_v33 }
 0x4ef   :  { %v4115_v41 = vrot.slane %v4101_v30, %v6990_v13  ;;  %v4127_v11 = vrot.slane %v4117_v31, %v6990_v13  ;;  %v4134_v48 = vrot.slane %v4118_v32, %v6990_v13  ;;  %v3013_v50 = vrot.slane %v7080_v37, %v6715_v49 }
 0x4f0   :  { %v4141_v42 = vrot.slane %v4119_v38, %v6990_v13  ;;  %v4148_v36 = vrot.slane %v4120_v39, %v6990_v13  ;;  %v3017_v44 = vrot.slane %v7080_v37, %v6969_v5  ;;  %v3021_v3 = vrot.slane %v7080_v37, %v6972_v6 }
 0x4f1   :  { %v4116_v51 = vcombine.low %v4108_v35, %v4115_v41  ;;  %v4149_v52 = vcombine.low %v4127_v11, %v4134_v48  ;;  %v3025_v53 = vrot.slane %v7080_v37, %v6977_v8  ;;  %v3029_v54 = vrot.slane %v7080_v37, %v6980_v9  ;;  %v2641_v55 = vpop.xlane.xlu0 %2640 }
 0x4f2   :  { %v4150_v56 = vcombine.low %v4141_v42, %v4148_v36  ;;  %v3033_v57 = vrot.slane %v7080_v37, %v6983_v43  ;;  %v3037_v60 = vrot.slane %v7080_v37, %v6986_v10  ;;  %v4166_v61 = vcombine.low %v3009_v34, %v3013_v50 }
 0x4f3   :  { %5361 = vperm.xlu1 %6056, %v4116_v51   ;;  %v4157_v62 = vrot.slane %v4149_v52, %v6990_v13  ;;  %v4167_v63 = vcombine.low %v3017_v44, %v3021_v3  ;;  %v4168_v2 = vcombine.low %v3025_v53, %v3029_v54  ;;  %v7159_v0 = vadd.f32 %v6974_v7, %v2641_v55 }
 0x4f4   :  { %v4164_v1 = vrot.slane %v4150_v56, %v6990_v13  ;;  %v4169_v4 = vcombine.low %v3033_v57, %v3037_v60  ;;  %v4176_v18 = vrot.slane %v4166_v61, %v6990_v13  ;;  %v3041_v12 = vrot.slane %v7099_v59, %v6709_v47 }
 0x4f5   :  { %v4183_v14 = vrot.slane %v4167_v63, %v6990_v13  ;;  %v4190_v37 = vrot.slane %v4168_v2, %v6990_v13  ;;  %v3045_v15 = vrot.slane %v7099_v59, %v6715_v49  ;;  %v3049_v16 = vrot.slane %v7099_v59, %v6969_v5  ;;  %v2643_v17 = vpop.xlane.xlu1 %2642 }
 0x4f6   :  { %v4165_v58 = vcombine.low %v4157_v62, %v4164_v1  ;;  %v4197_v19 = vrot.slane %v4169_v4, %v6990_v13  ;;  %v3053_v22 = vrot.slane %v7099_v59, %v6972_v6  ;;  %v3057_v20 = vrot.slane %v7099_v59, %v6977_v8 }
 0x4f7   :  { %v4198_v23 = vcombine.low %v4176_v18, %v4183_v14  ;;  %v3061_v24 = vrot.slane %v7099_v59, %v6980_v9  ;;  %v3065_v25 = vrot.slane %v7099_v59, %v6983_v43  ;;  %v3069_v26 = vrot.slane %v7099_v59, %v6986_v10 }
 0x4f8   :  { %5364 = vperm.xlu1 %6056, %v4165_v58   ;;  %v4199_v27 = vcombine.low %v4190_v37, %v4197_v19  ;;  %v4215_v28 = vcombine.low %v3041_v12, %v3045_v15  ;;  %v4216_v29 = vcombine.low %v3049_v16, %v3053_v22  ;;  %v7183_v30 = vadd.f32 %v6974_v7, %v2643_v17 }
 0x4f9   :  { %v4206_v31 = vrot.slane %v4198_v23, %v6990_v13  ;;  %v4217_v32 = vcombine.low %v3057_v20, %v3061_v24  ;;  %v4218_v33 = vcombine.low %v3065_v25, %v3069_v26  ;;  %v3073_v34 = vrot.slane %v7117_v21, %v6709_v47  ;;  %v2645_v42 = vpop.xlane.xlu0 %2644 }
 0x4fa   :  { %v4213_v35 = vrot.slane %v4199_v27, %v6990_v13  ;;  %v4225_v38 = vrot.slane %v4215_v28, %v6990_v13  ;;  %v4232_v59 = vrot.slane %v4216_v29, %v6990_v13  ;;  %v3077_v39 = vrot.slane %v7117_v21, %v6715_v49 }
 0x4fb   :  { %v4239_v41 = vrot.slane %v4217_v32, %v6990_v13  ;;  %v4246_v11 = vrot.slane %v4218_v33, %v6990_v13  ;;  %v3081_v48 = vrot.slane %v7117_v21, %v6969_v5  ;;  %v3085_v50 = vrot.slane %v7117_v21, %v6972_v6 }
 0x4fc   :  { %v4214_v36 = vcombine.low %v4206_v31, %v4213_v35  ;;  %v4247_v44 = vcombine.low %v4225_v38, %v4232_v59  ;;  %v3089_v3 = vrot.slane %v7117_v21, %v6977_v8  ;;  %v3093_v51 = vrot.slane %v7117_v21, %v6980_v9 }
 0x4fd   :  { %v4248_v52 = vcombine.low %v4239_v41, %v4246_v11  ;;  %v3097_v53 = vrot.slane %v7117_v21, %v6983_v43  ;;  %v3101_v54 = vrot.slane %v7117_v21, %v6986_v10  ;;  %v4264_v55 = vcombine.low %v3073_v34, %v3077_v39  ;;  %v2647_v14 = vpop.xlane.xlu1 %2646 }
 0x4fe   :  { %5367 = vperm.xlu1 %6056, %v4214_v36   ;;  %v4255_v56 = vrot.slane %v4247_v44, %v6990_v13  ;;  %v4265_v57 = vcombine.low %v3081_v48, %v3085_v50  ;;  %v4266_v60 = vcombine.low %v3089_v3, %v3093_v51  ;;  %v7209_v61 = vadd.f32 %v6974_v7, %v2645_v42 }
 0x4ff   :  { %v4262_v62 = vrot.slane %v4248_v52, %v6990_v13  ;;  %v4267_v63 = vcombine.low %v3097_v53, %v3101_v54  ;;  %v4274_v2 = vrot.slane %v4264_v55, %v6990_v13  ;;  %v3105_v1 = vrot.slane %v7136_v40, %v6709_v47 }
 0x500   :  { %v4281_v4 = vrot.slane %v4265_v57, %v6990_v13  ;;  %v4288_v21 = vrot.slane %v4266_v60, %v6990_v13  ;;  %v3109_v18 = vrot.slane %v7136_v40, %v6715_v49  ;;  %v3113_v12 = vrot.slane %v7136_v40, %v6969_v5 }
 0x501   :  { %v4263_v37 = vcombine.low %v4255_v56, %v4262_v62  ;;  %v4295_v15 = vrot.slane %v4267_v63, %v6990_v13  ;;  %v3117_v16 = vrot.slane %v7136_v40, %v6972_v6  ;;  %v3121_v17 = vrot.slane %v7136_v40, %v6977_v8  ;;  %v2649_v58 = vpop.xlane.xlu0 %2648 }
 0x502   :  { %v4296_v19 = vcombine.low %v4274_v2, %v4281_v4  ;;  %v3125_v22 = vrot.slane %v7136_v40, %v6980_v9  ;;  %v3129_v20 = vrot.slane %v7136_v40, %v6983_v43  ;;  %v3133_v23 = vrot.slane %v7136_v40, %v6986_v10 }
 0x503   :  { %5370 = vperm.xlu1 %6056, %v4263_v37   ;;  %v4297_v24 = vcombine.low %v4288_v21, %v4295_v15  ;;  %v4313_v25 = vcombine.low %v3105_v1, %v3109_v18  ;;  %v4314_v26 = vcombine.low %v3113_v12, %v3117_v16  ;;  %v7233_v27 = vadd.f32 %v6974_v7, %v2647_v14 }
 0x504   :  { %v4304_v28 = vrot.slane %v4296_v19, %v6990_v13  ;;  %v4315_v29 = vcombine.low %v3121_v17, %v3125_v22  ;;  %v4316_v31 = vcombine.low %v3129_v20, %v3133_v23  ;;  %v2702_v32 = vadd.f32 %v6974_v7, %v2649_v58 }
 0x505   :  { %v4311_v33 = vrot.slane %v4297_v24, %v6990_v13  ;;  %v4323_v34 = vrot.slane %v4313_v25, %v6990_v13  ;;  %v4330_v35 = vrot.slane %v4314_v26, %v6990_v13  ;;  %v2651_v40 = vpop.xlane.xlu1 %2650  ;;  %v3137_v38 = vrot.slane %v7159_v0, %v6709_v47 }
 0x506   :  { %v4337_v59 = vrot.slane %v4315_v29, %v6990_v13  ;;  %v4344_v39 = vrot.slane %v4316_v31, %v6990_v13  ;;  %v2703_v41 = vadd.f32 %v6974_v7, %v2651_v40  ;;  %v3265_v11 = vrot.slane %v2702_v32, %v6709_v47 }
 0x507   :  { %v4312_v48 = vcombine.low %v4304_v28, %v4311_v33  ;;  %v4345_v50 = vcombine.low %v4323_v34, %v4330_v35  ;;  %v3269_v42 = vrot.slane %v2702_v32, %v6715_v49  ;;  %v3273_v36 = vrot.slane %v2702_v32, %v6969_v5 }
 0x508   :  { %v4346_v44 = vcombine.low %v4337_v59, %v4344_v39  ;;  %v3277_v3 = vrot.slane %v2702_v32, %v6972_v6  ;;  %v3281_v51 = vrot.slane %v2702_v32, %v6977_v8  ;;  %v3285_v52 = vrot.slane %v2702_v32, %v6980_v9 }
 0x509   :  { %5373 = vperm.xlu1 %6056, %v4312_v48   ;;  %v4353_v53 = vrot.slane %v4345_v50, %v6990_v13  ;;  %v2653_v54 = vpop.xlane.xlu0 %2652  ;;  %v3289_v55 = vrot.slane %v2702_v32, %v6983_v43  ;;  %v3293_v56 = vrot.slane %v2702_v32, %v6986_v10  ;;  %v4558_v57 = vcombine.low %v3265_v11, %v3269_v42 }
 0x50a   :  { %v4360_v60 = vrot.slane %v4346_v44, %v6990_v13  ;;  %v7256_v62 = vadd.f32 %v6974_v7, %v2653_v54  ;;  %v4559_v63 = vcombine.low %v3273_v36, %v3277_v3  ;;  %v4560_v2 = vcombine.low %v3281_v51, %v3285_v52 }
 0x50b   :  { %v4561_v1 = vcombine.low %v3289_v55, %v3293_v56  ;;  %v4568_v4 = vrot.slane %v4558_v57, %v6990_v13  ;;  %v3297_v21 = vrot.slane %v2703_v41, %v6709_v47  ;;  %v3301_v18 = vrot.slane %v2703_v41, %v6715_v49 }
 0x50c   :  { %v4361_v12 = vcombine.low %v4353_v53, %v4360_v60  ;;  %v4575_v14 = vrot.slane %v4559_v63, %v6990_v13  ;;  %v4582_v37 = vrot.slane %v4560_v2, %v6990_v13  ;;  %v3305_v15 = vrot.slane %v2703_v41, %v6969_v5 }
 0x50d   :  { %v2655_v16 = vpop.xlane.xlu1 %2654  ;;  %v4589_v17 = vrot.slane %v4561_v1, %v6990_v13  ;;  %v3309_v58 = vrot.slane %v2703_v41, %v6972_v6  ;;  %v3313_v19 = vrot.slane %v2703_v41, %v6977_v8  ;;  %v3317_v22 = vrot.slane %v2703_v41, %v6980_v9 }
 0x50e   :  { %5376 = vperm.xlu1 %6056, %v4361_v12   ;;  %v7269_v20 = vadd.f32 %v6974_v7, %v2655_v16  ;;  %v4590_v23 = vcombine.low %v4568_v4, %v4575_v14  ;;  %v3321_v24 = vrot.slane %v2703_v41, %v6983_v43  ;;  %v3325_v25 = vrot.slane %v2703_v41, %v6986_v10 }
 0x50f   :  { %v4591_v26 = vcombine.low %v4582_v37, %v4589_v17  ;;  %v4607_v28 = vcombine.low %v3297_v21, %v3301_v18  ;;  %v4608_v29 = vcombine.low %v3305_v15, %v3309_v58  ;;  %v4609_v31 = vcombine.low %v3313_v19, %v3317_v22 }
 0x510   :  { %v4598_v32 = vrot.slane %v4590_v23, %v6990_v13  ;;  %v4610_v33 = vcombine.low %v3321_v24, %v3325_v25  ;;  %v3141_v34 = vrot.slane %v7159_v0, %v6715_v49  ;;  %v3145_v35 = vrot.slane %v7159_v0, %v6969_v5 }
 0x511   :  { %v4605_v40 = vrot.slane %v4591_v26, %v6990_v13  ;;  %v2657_v59 = vpop.xlane.xlu0 %2656  ;;  %v4617_v39 = vrot.slane %v4607_v28, %v6990_v13  ;;  %v4624_v41 = vrot.slane %v4608_v29, %v6990_v13  ;;  %v4631_v11 = vrot.slane %v4609_v31, %v6990_v13 }
 0x512   :  { %v7283_v48 = vadd.f32 %v6974_v7, %v2657_v59  ;;  %v4638_v50 = vrot.slane %v4610_v33, %v6990_v13  ;;  %v3149_v42 = vrot.slane %v7159_v0, %v6972_v6  ;;  %v3153_v36 = vrot.slane %v7159_v0, %v6977_v8 }
 0x513   :  { %v4606_v44 = vcombine.low %v4598_v32, %v4605_v40  ;;  %v4639_v3 = vcombine.low %v4617_v39, %v4624_v41  ;;  %v3157_v51 = vrot.slane %v7159_v0, %v6980_v9  ;;  %v3161_v52 = vrot.slane %v7159_v0, %v6983_v43 }
 0x514   :  { %v4640_v53 = vcombine.low %v4631_v11, %v4638_v50  ;;  %v3165_v54 = vrot.slane %v7159_v0, %v6986_v10  ;;  %v4362_v55 = vcombine.low %v3137_v38, %v3141_v34  ;;  %v4363_v56 = vcombine.low %v3145_v35, %v3149_v42 }
 0x515   :  { %5391 = vperm.xlu0 %6057, %v4606_v44   ;;  %v4647_v57 = vrot.slane %v4639_v3, %v6990_v13  ;;  %v2659_v60 = vpop.xlane.xlu1 %2658  ;;  %v4364_v63 = vcombine.low %v3153_v36, %v3157_v51  ;;  %v3329_v2 = vrot.slane %v7256_v62, %v6709_v47  ;;  %v3333_v1 = vrot.slane %v7256_v62, %v6715_v49 }
 0x516   :  { %v4654_v4 = vrot.slane %v4640_v53, %v6990_v13  ;;  %v7306_v21 = vadd.f32 %v6974_v7, %v2659_v60  ;;  %v4365_v18 = vcombine.low %v3161_v52, %v3165_v54  ;;  %v4372_v0 = vrot.slane %v4362_v55, %v6990_v13 }
 0x517   :  { %v4379_v38 = vrot.slane %v4363_v56, %v6990_v13  ;;  %v4386_v12 = vrot.slane %v4364_v63, %v6990_v13  ;;  %v3337_v14 = vrot.slane %v7256_v62, %v6969_v5  ;;  %v3341_v37 = vrot.slane %v7256_v62, %v6972_v6 }
 0x518   :  { %v4655_v15 = vcombine.low %v4647_v57, %v4654_v4  ;;  %v4393_v16 = vrot.slane %v4365_v18, %v6990_v13  ;;  %v3345_v17 = vrot.slane %v7256_v62, %v6977_v8  ;;  %v3349_v58 = vrot.slane %v7256_v62, %v6980_v9 }
 0x519   :  { %v4394_v19 = vcombine.low %v4372_v0, %v4379_v38  ;;  %v3353_v22 = vrot.slane %v7256_v62, %v6983_v43  ;;  %v3357_v23 = vrot.slane %v7256_v62, %v6986_v10  ;;  %v4656_v24 = vcombine.low %v3329_v2, %v3333_v1  ;;  %v2661_v25 = vpop.xlane.xlu0 %2660 }
 0x51a   :  { %5394 = vperm.xlu1 %6056, %v4655_v15   ;;  %v4395_v26 = vcombine.low %v4386_v12, %v4393_v16  ;;  %v4657_v28 = vcombine.low %v3337_v14, %v3341_v37  ;;  %v4658_v29 = vcombine.low %v3345_v17, %v3349_v58  ;;  %v7325_v31 = vadd.f32 %v6974_v7, %v2661_v25 }
 0x51b   :  { %v4402_v32 = vrot.slane %v4394_v19, %v6990_v13  ;;  %v4659_v33 = vcombine.low %v3353_v22, %v3357_v23  ;;  %v4666_v34 = vrot.slane %v4656_v24, %v6990_v13  ;;  %v3169_v35 = vrot.slane %v7183_v30, %v6709_v47 }
 0x51c   :  { %v4409_v40 = vrot.slane %v4395_v26, %v6990_v13  ;;  %v4673_v62 = vrot.slane %v4657_v28, %v6990_v13  ;;  %v4680_v59 = vrot.slane %v4658_v29, %v6990_v13  ;;  %v3173_v39 = vrot.slane %v7183_v30, %v6715_v49 }
 0x51d   :  { %v4687_v41 = vrot.slane %v4659_v33, %v6990_v13  ;;  %v3177_v11 = vrot.slane %v7183_v30, %v6969_v5  ;;  %v3181_v50 = vrot.slane %v7183_v30, %v6972_v6  ;;  %v3185_v42 = vrot.slane %v7183_v30, %v6977_v8  ;;  %v2663_v14 = vpop.xlane.xlu1 %2662 }
 0x51e   :  { %v4410_v36 = vcombine.low %v4402_v32, %v4409_v40  ;;  %v4688_v44 = vcombine.low %v4666_v34, %v4673_v62  ;;  %v3189_v3 = vrot.slane %v7183_v30, %v6980_v9  ;;  %v3193_v51 = vrot.slane %v7183_v30, %v6983_v43 }
 0x51f   :  { %v4689_v52 = vcombine.low %v4680_v59, %v4687_v41  ;;  %v3197_v53 = vrot.slane %v7183_v30, %v6986_v10  ;;  %v4411_v54 = vcombine.low %v3169_v35, %v3173_v39  ;;  %v4412_v55 = vcombine.low %v3177_v11, %v3181_v50 }
 0x520   :  { %5379 = vperm.xlu1 %6056, %v4410_v36   ;;  %v4696_v56 = vrot.slane %v4688_v44, %v6990_v13  ;;  %v4413_v57 = vcombine.low %v3185_v42, %v3189_v3  ;;  %v3361_v60 = vrot.slane %v7269_v20, %v6709_v47  ;;  %v3365_v63 = vrot.slane %v7269_v20, %v6715_v49 }
 0x521   :  { %v4703_v2 = vrot.slane %v4689_v52, %v6990_v13  ;;  %v4414_v1 = vcombine.low %v3193_v51, %v3197_v53  ;;  %v4421_v4 = vrot.slane %v4411_v54, %v6990_v13  ;;  %v4428_v18 = vrot.slane %v4412_v55, %v6990_v13 }
 0x522   :  { %v4435_v30 = vrot.slane %v4413_v57, %v6990_v13  ;;  %v3369_v0 = vrot.slane %v7269_v20, %v6969_v5  ;;  %v3373_v38 = vrot.slane %v7269_v20, %v6972_v6  ;;  %v3377_v12 = vrot.slane %v7269_v20, %v6977_v8 }
 0x523   :  { %v4704_v37 = vcombine.low %v4696_v56, %v4703_v2  ;;  %v4442_v15 = vrot.slane %v4414_v1, %v6990_v13  ;;  %v4443_v16 = vcombine.low %v4421_v4, %v4428_v18  ;;  %v3381_v17 = vrot.slane %v7269_v20, %v6980_v9 }
 0x524   :  { %v3385_v58 = vrot.slane %v7269_v20, %v6983_v43  ;;  %v3389_v19 = vrot.slane %v7269_v20, %v6986_v10  ;;  %v4705_v22 = vcombine.low %v3361_v60, %v3365_v63  ;;  %v4706_v23 = vcombine.low %v3369_v0, %v3373_v38  ;;  %v2665_v0 = vpop.xlane.xlu0 %2664 }
 0x525   :  { %5397 = vperm.xlu0 %6057, %v4704_v37   ;;  %v4444_v24 = vcombine.low %v4435_v30, %v4442_v15  ;;  %v4451_v25 = vrot.slane %v4443_v16, %v6990_v13  ;;  %v4707_v26 = vcombine.low %v3377_v12, %v3381_v17  ;;  %v7373_v28 = vadd.f32 %v6974_v7, %v2663_v14 }
 0x526   :  { %v4708_v29 = vcombine.low %v3385_v58, %v3389_v19  ;;  %v4715_v32 = vrot.slane %v4705_v22, %v6990_v13  ;;  %v4722_v33 = vrot.slane %v4706_v23, %v6990_v13  ;;  %v3201_v34 = vrot.slane %v7209_v61, %v6709_v47 }
 0x527   :  { %v4458_v20 = vrot.slane %v4444_v24, %v6990_v13  ;;  %v4729_v35 = vrot.slane %v4707_v26, %v6990_v13  ;;  %v3205_v40 = vrot.slane %v7209_v61, %v6715_v49  ;;  %v3209_v62 = vrot.slane %v7209_v61, %v6969_v5 }
 0x528   :  { %v4736_v59 = vrot.slane %v4708_v29, %v6990_v13  ;;  %v4737_v39 = vcombine.low %v4715_v32, %v4722_v33  ;;  %v3213_v41 = vrot.slane %v7209_v61, %v6972_v6  ;;  %v3217_v11 = vrot.slane %v7209_v61, %v6977_v8 }
 0x529   :  { %v4459_v50 = vcombine.low %v4451_v25, %v4458_v20  ;;  %v3221_v42 = vrot.slane %v7209_v61, %v6980_v9  ;;  %v3225_v36 = vrot.slane %v7209_v61, %v6983_v43  ;;  %v3229_v44 = vrot.slane %v7209_v61, %v6986_v10 }
 0x52a   :  { %v4738_v3 = vcombine.low %v4729_v35, %v4736_v59  ;;  %v4745_v51 = vrot.slane %v4737_v39, %v6990_v13  ;;  %v4460_v52 = vcombine.low %v3201_v34, %v3205_v40  ;;  %v4461_v53 = vcombine.low %v3209_v62, %v3213_v41 }
 0x52b   :  { %5382 = vperm.xlu1 %6056, %v4459_v50   ;;  %v4462_v54 = vcombine.low %v3217_v11, %v3221_v42  ;;  %v4463_v55 = vcombine.low %v3225_v36, %v3229_v44  ;;  %v3393_v56 = vrot.slane %v7283_v48, %v6709_v47  ;;  %v3397_v57 = vrot.slane %v7283_v48, %v6715_v49 }
 0x52c   :  { %v4752_v60 = vrot.slane %v4738_v3, %v6990_v13  ;;  %v4470_v63 = vrot.slane %v4460_v52, %v6990_v13  ;;  %v4477_v61 = vrot.slane %v4461_v53, %v6990_v13  ;;  %v3401_v2 = vrot.slane %v7283_v48, %v6969_v5 }
 0x52d   :  { %v4484_v1 = vrot.slane %v4462_v54, %v6990_v13  ;;  %v4491_v4 = vrot.slane %v4463_v55, %v6990_v13  ;;  %v3405_v18 = vrot.slane %v7283_v48, %v6972_v6  ;;  %v3409_v30 = vrot.slane %v7283_v48, %v6977_v8  ;;  %v2667_v55 = vpop.xlane.xlu0 %2666 }
 0x52e   :  { %v4753_v38 = vcombine.low %v4745_v51, %v4752_v60  ;;  %v4492_v12 = vcombine.low %v4470_v63, %v4477_v61  ;;  %v3413_v14 = vrot.slane %v7283_v48, %v6980_v9  ;;  %v3417_v37 = vrot.slane %v7283_v48, %v6983_v43 }
 0x52f   :  { %v4493_v15 = vcombine.low %v4484_v1, %v4491_v4  ;;  %v3421_v16 = vrot.slane %v7283_v48, %v6986_v10  ;;  %v4754_v17 = vcombine.low %v3393_v56, %v3397_v57  ;;  %v4755_v58 = vcombine.low %v3401_v2, %v3405_v18 }
 0x530   :  { %5400 = vperm.xlu0 %6057, %v4753_v38   ;;  %v4500_v19 = vrot.slane %v4492_v12, %v6990_v13  ;;  %v4756_v22 = vcombine.low %v3409_v30, %v3413_v14  ;;  %v7420_v23 = vadd.f32 %v6974_v7, %v2665_v0  ;;  %v3233_v24 = vrot.slane %v7233_v27, %v6709_v47 }
 0x531   :  { %v4507_v25 = vrot.slane %v4493_v15, %v6990_v13  ;;  %v4757_v26 = vcombine.low %v3417_v37, %v3421_v16  ;;  %v4764_v29 = vrot.slane %v4754_v17, %v6990_v13  ;;  %v4771_v32 = vrot.slane %v4755_v58, %v6990_v13 }
 0x532   :  { %v4778_v48 = vrot.slane %v4756_v22, %v6990_v13  ;;  %v3237_v33 = vrot.slane %v7233_v27, %v6715_v49  ;;  %v3241_v34 = vrot.slane %v7233_v27, %v6969_v5  ;;  %v3245_v20 = vrot.slane %v7233_v27, %v6972_v6 }
 0x533   :  { %v4508_v35 = vcombine.low %v4500_v19, %v4507_v25  ;;  %v4785_v40 = vrot.slane %v4757_v26, %v6990_v13  ;;  %v4786_v62 = vcombine.low %v4764_v29, %v4771_v32  ;;  %v3249_v59 = vrot.slane %v7233_v27, %v6977_v8  ;;  %v2669_v25 = vpop.xlane.xlu0 %2668 }
 0x534   :  { %v3253_v39 = vrot.slane %v7233_v27, %v6980_v9  ;;  %v3257_v41 = vrot.slane %v7233_v27, %v6983_v43  ;;  %v3261_v11 = vrot.slane %v7233_v27, %v6986_v10  ;;  %v4509_v50 = vcombine.low %v3233_v24, %v3237_v33 }
 0x535   :  { %5385 = vperm.xlu1 %6056, %v4508_v35   ;;  %v4787_v42 = vcombine.low %v4778_v48, %v4785_v40  ;;  %v4794_v36 = vrot.slane %v4786_v62, %v6990_v13  ;;  %v4510_v44 = vcombine.low %v3241_v34, %v3245_v20  ;;  %v3425_v3 = vrot.slane %v7306_v21, %v6709_v47 }
 0x536   :  { %v4511_v51 = vcombine.low %v3249_v59, %v3253_v39  ;;  %v4512_v52 = vcombine.low %v3257_v41, %v3261_v11  ;;  %v4519_v53 = vrot.slane %v4509_v50, %v6990_v13  ;;  %v3429_v54 = vrot.slane %v7306_v21, %v6715_v49 }
 0x537   :  { %v4801_v56 = vrot.slane %v4787_v42, %v6990_v13  ;;  %v4526_v27 = vrot.slane %v4510_v44, %v6990_v13  ;;  %v3433_v57 = vrot.slane %v7306_v21, %v6969_v5  ;;  %v3437_v60 = vrot.slane %v7306_v21, %v6972_v6 }
 0x538   :  { %v4533_v63 = vrot.slane %v4511_v51, %v6990_v13  ;;  %v4540_v61 = vrot.slane %v4512_v52, %v6990_v13  ;;  %v3441_v2 = vrot.slane %v7306_v21, %v6977_v8  ;;  %v3445_v1 = vrot.slane %v7306_v21, %v6980_v9 }
 0x539   :  { %v4802_v4 = vcombine.low %v4794_v36, %v4801_v56  ;;  %v4541_v18 = vcombine.low %v4519_v53, %v4526_v27  ;;  %v3449_v30 = vrot.slane %v7306_v21, %v6983_v43  ;;  %v3453_v0 = vrot.slane %v7306_v21, %v6986_v10 }
 0x53a   :  { %v4542_v38 = vcombine.low %v4533_v63, %v4540_v61  ;;  %v4803_v12 = vcombine.low %v3425_v3, %v3429_v54  ;;  %v4804_v14 = vcombine.low %v3433_v57, %v3437_v60  ;;  %v4805_v37 = vcombine.low %v3441_v2, %v3445_v1 }
 0x53b   :  { %5403 = vperm.xlu0 %6057, %v4802_v4   ;;  %v4549_v15 = vrot.slane %v4541_v18, %v6990_v13  ;;  %v4806_v16 = vcombine.low %v3449_v30, %v3453_v0  ;;  %v7467_v17 = vadd.f32 %v6974_v7, %v2667_v55  ;;  %v3457_v58 = vrot.slane %v7325_v31, %v6709_v47  ;;  %v2671_v55 = vpop.xlane.xlu0 %2670 }
 0x53c   :  { %v4556_v19 = vrot.slane %v4542_v38, %v6990_v13  ;;  %v4813_v22 = vrot.slane %v4803_v12, %v6990_v13  ;;  %v4820_v21 = vrot.slane %v4804_v14, %v6990_v13  ;;  %v4827_v24 = vrot.slane %v4805_v37, %v6990_v13 }
 0x53d   :  { %v4834_v26 = vrot.slane %v4806_v16, %v6990_v13  ;;  %v3461_v29 = vrot.slane %v7325_v31, %v6715_v49  ;;  %v3465_v32 = vrot.slane %v7325_v31, %v6969_v5  ;;  %v3469_v48 = vrot.slane %v7325_v31, %v6972_v6 }
 0x53e   :  { %v4557_v33 = vcombine.low %v4549_v15, %v4556_v19  ;;  %v4835_v34 = vcombine.low %v4813_v22, %v4820_v21  ;;  %v3473_v20 = vrot.slane %v7325_v31, %v6977_v8  ;;  %v3477_v35 = vrot.slane %v7325_v31, %v6980_v9 }
 0x53f   :  { %v4836_v40 = vcombine.low %v4827_v24, %v4834_v26  ;;  %v3481_v62 = vrot.slane %v7325_v31, %v6983_v43  ;;  %v3485_v59 = vrot.slane %v7325_v31, %v6986_v10  ;;  %v4852_v39 = vcombine.low %v3457_v58, %v3461_v29 }
 0x540   :  { %5388 = vperm.xlu1 %6056, %v4557_v33   ;;  %v4843_v41 = vrot.slane %v4835_v34, %v6990_v13  ;;  %v4853_v11 = vcombine.low %v3465_v32, %v3469_v48  ;;  %v4854_v50 = vcombine.low %v3473_v20, %v3477_v35  ;;  %v7492_v42 = vadd.f32 %v6974_v7, %v2669_v25  ;;  %v2673_v25 = vpop.xlane.xlu0 %2672 }
 0x541   :  { %v4850_v36 = vrot.slane %v4836_v40, %v6990_v13  ;;  %v4855_v44 = vcombine.low %v3481_v62, %v3485_v59  ;;  %v4862_v3 = vrot.slane %v4852_v39, %v6990_v13  ;;  %v3489_v51 = vrot.slane %v7373_v28, %v6709_v47 }
 0x542   :  { %v4869_v52 = vrot.slane %v4853_v11, %v6990_v13  ;;  %v4876_v31 = vrot.slane %v4854_v50, %v6990_v13  ;;  %v3493_v53 = vrot.slane %v7373_v28, %v6715_v49  ;;  %v3497_v54 = vrot.slane %v7373_v28, %v6969_v5 }
 0x543   :  { %v4851_v56 = vcombine.low %v4843_v41, %v4850_v36  ;;  %v4883_v27 = vrot.slane %v4855_v44, %v6990_v13  ;;  %v3501_v57 = vrot.slane %v7373_v28, %v6972_v6  ;;  %v3505_v60 = vrot.slane %v7373_v28, %v6977_v8 }
 0x544   :  { %v4884_v63 = vcombine.low %v4862_v3, %v4869_v52  ;;  %v3509_v61 = vrot.slane %v7373_v28, %v6980_v9  ;;  %v3513_v2 = vrot.slane %v7373_v28, %v6983_v43  ;;  %v3517_v1 = vrot.slane %v7373_v28, %v6986_v10  ;;  %v2675_v52 = vpop.xlane.xlu1 %2674 }
 0x545   :  { %5406 = vperm.xlu0 %6057, %v4851_v56   ;;  %v4885_v4 = vcombine.low %v4876_v31, %v4883_v27  ;;  %v4901_v18 = vcombine.low %v3489_v51, %v3493_v53  ;;  %v4902_v30 = vcombine.low %v3497_v54, %v3501_v57  ;;  %v7516_v0 = vadd.f32 %v6974_v7, %v2671_v55 }
 0x546   :  { %v4892_v38 = vrot.slane %v4884_v63, %v6990_v13  ;;  %v4903_v12 = vcombine.low %v3505_v60, %v3509_v61  ;;  %v4904_v14 = vcombine.low %v3513_v2, %v3517_v1  ;;  %v3521_v37 = vrot.slane %v7420_v23, %v6709_v47 }
 0x547   :  { %v4899_v15 = vrot.slane %v4885_v4, %v6990_v13  ;;  %v4911_v16 = vrot.slane %v4901_v18, %v6990_v13  ;;  %v4918_v28 = vrot.slane %v4902_v30, %v6990_v13  ;;  %v3525_v58 = vrot.slane %v7420_v23, %v6715_v49 }
 0x548   :  { %v4925_v19 = vrot.slane %v4903_v12, %v6990_v13  ;;  %v4932_v22 = vrot.slane %v4904_v14, %v6990_v13  ;;  %v3529_v21 = vrot.slane %v7420_v23, %v6969_v5  ;;  %v3533_v24 = vrot.slane %v7420_v23, %v6972_v6 }
 0x549   :  { %v4900_v26 = vcombine.low %v4892_v38, %v4899_v15  ;;  %v4933_v29 = vcombine.low %v4911_v16, %v4918_v28  ;;  %v3537_v32 = vrot.slane %v7420_v23, %v6977_v8  ;;  %v3541_v48 = vrot.slane %v7420_v23, %v6980_v9  ;;  %v2677_v15 = vpop.xlane.xlu0 %2676 }
 0x54a   :  { %v4934_v33 = vcombine.low %v4925_v19, %v4932_v22  ;;  %v3545_v34 = vrot.slane %v7420_v23, %v6983_v43  ;;  %v3549_v20 = vrot.slane %v7420_v23, %v6986_v10  ;;  %v4950_v35 = vcombine.low %v3521_v37, %v3525_v58 }
 0x54b   :  { %5409 = vperm.xlu0 %6057, %v4900_v26   ;;  %v4941_v40 = vrot.slane %v4933_v29, %v6990_v13  ;;  %v4951_v62 = vcombine.low %v3529_v21, %v3533_v24  ;;  %v4952_v59 = vcombine.low %v3537_v32, %v3541_v48  ;;  %v7542_v39 = vadd.f32 %v6974_v7, %v2673_v25 }
 0x54c   :  { %v4948_v41 = vrot.slane %v4934_v33, %v6990_v13  ;;  %v4953_v11 = vcombine.low %v3545_v34, %v3549_v20  ;;  %v4960_v50 = vrot.slane %v4950_v35, %v6990_v13  ;;  %v3553_v36 = vrot.slane %v7467_v17, %v6709_v47 }
 0x54d   :  { %v4967_v44 = vrot.slane %v4951_v62, %v6990_v13  ;;  %v4974_v23 = vrot.slane %v4952_v59, %v6990_v13  ;;  %v3557_v3 = vrot.slane %v7467_v17, %v6715_v49  ;;  %v3561_v51 = vrot.slane %v7467_v17, %v6969_v5 }
 0x54e   :  { %v4949_v31 = vcombine.low %v4941_v40, %v4948_v41  ;;  %v4981_v53 = vrot.slane %v4953_v11, %v6990_v13  ;;  %v3565_v54 = vrot.slane %v7467_v17, %v6972_v6  ;;  %v3569_v55 = vrot.slane %v7467_v17, %v6977_v8 }
 0x54f   :  { %v4982_v56 = vcombine.low %v4960_v50, %v4967_v44  ;;  %v3573_v27 = vrot.slane %v7467_v17, %v6980_v9  ;;  %v3577_v57 = vrot.slane %v7467_v17, %v6983_v43  ;;  %v3581_v60 = vrot.slane %v7467_v17, %v6986_v10  ;;  %v2679_v44 = vpop.xlane.xlu0 %2678 }
 0x550   :  { %5412 = vperm.xlu0 %6057, %v4949_v31   ;;  %v4983_v63 = vcombine.low %v4974_v23, %v4981_v53  ;;  %v4999_v61 = vcombine.low %v3553_v36, %v3557_v3  ;;  %v5000_v2 = vcombine.low %v3561_v51, %v3565_v54  ;;  %v7566_v1 = vadd.f32 %v6974_v7, %v2675_v52 }
 0x551   :  { %v4990_v4 = vrot.slane %v4982_v56, %v6990_v13  ;;  %v5001_v18 = vcombine.low %v3569_v55, %v3573_v27  ;;  %v5002_v30 = vcombine.low %v3577_v57, %v3581_v60  ;;  %v3585_v38 = vrot.slane %v7492_v42, %v6709_v47 }
 0x552   :  { %v4997_v12 = vrot.slane %v4983_v63, %v6990_v13  ;;  %v5009_v14 = vrot.slane %v4999_v61, %v6990_v13  ;;  %v5016_v17 = vrot.slane %v5000_v2, %v6990_v13  ;;  %v3589_v37 = vrot.slane %v7492_v42, %v6715_v49 }
 0x553   :  { %v5023_v16 = vrot.slane %v5001_v18, %v6990_v13  ;;  %v5030_v28 = vrot.slane %v5002_v30, %v6990_v13  ;;  %v3593_v58 = vrot.slane %v7492_v42, %v6969_v5  ;;  %v3597_v19 = vrot.slane %v7492_v42, %v6972_v6 }
 0x554   :  { %v4998_v22 = vcombine.low %v4990_v4, %v4997_v12  ;;  %v5031_v21 = vcombine.low %v5009_v14, %v5016_v17  ;;  %v3601_v24 = vrot.slane %v7492_v42, %v6977_v8  ;;  %v3605_v25 = vrot.slane %v7492_v42, %v6980_v9 }
 0x555   :  { %v5032_v26 = vcombine.low %v5023_v16, %v5030_v28  ;;  %v3609_v29 = vrot.slane %v7492_v42, %v6983_v43  ;;  %v3613_v32 = vrot.slane %v7492_v42, %v6986_v10  ;;  %v5048_v48 = vcombine.low %v3585_v38, %v3589_v37 }
 0x556   :  { %5415 = vperm.xlu0 %6057, %v4998_v22   ;;  %v5039_v33 = vrot.slane %v5031_v21, %v6990_v13  ;;  %v5049_v34 = vcombine.low %v3593_v58, %v3597_v19  ;;  %v5050_v20 = vcombine.low %v3601_v24, %v3605_v25  ;;  %v7592_v35 = vadd.f32 %v6974_v7, %v2677_v15 }
 0x557   :  { %v5046_v40 = vrot.slane %v5032_v26, %v6990_v13  ;;  %v5051_v62 = vcombine.low %v3609_v29, %v3613_v32  ;;  %v5058_v59 = vrot.slane %v5048_v48, %v6990_v13  ;;  %v3617_v41 = vrot.slane %v7516_v0, %v6709_v47 }
 0x558   :  { %v5065_v11 = vrot.slane %v5049_v34, %v6990_v13  ;;  %v5072_v42 = vrot.slane %v5050_v20, %v6990_v13  ;;  %v3621_v50 = vrot.slane %v7516_v0, %v6715_v49  ;;  %v3625_v36 = vrot.slane %v7516_v0, %v6969_v5 }
 0x559   :  { %v5047_v23 = vcombine.low %v5039_v33, %v5046_v40  ;;  %v5079_v3 = vrot.slane %v5051_v62, %v6990_v13  ;;  %v3629_v51 = vrot.slane %v7516_v0, %v6972_v6  ;;  %v3633_v52 = vrot.slane %v7516_v0, %v6977_v8 }
 0x55a   :  { %v5080_v31 = vcombine.low %v5058_v59, %v5065_v11  ;;  %v3637_v53 = vrot.slane %v7516_v0, %v6980_v9  ;;  %v3641_v54 = vrot.slane %v7516_v0, %v6983_v43  ;;  %v3645_v55 = vrot.slane %v7516_v0, %v6986_v10 }
 0x55b   :  { %5418 = vperm.xlu0 %6057, %v5047_v23   ;;  %v5081_v56 = vcombine.low %v5072_v42, %v5079_v3  ;;  %v5097_v27 = vcombine.low %v3617_v41, %v3621_v50  ;;  %v5098_v57 = vcombine.low %v3625_v36, %v3629_v51  ;;  %v7616_v60 = vadd.f32 %v6974_v7, %v2679_v44 }
 0x55c   :  { %v5088_v63 = vrot.slane %v5080_v31, %v6990_v13  ;;  %v5099_v61 = vcombine.low %v3633_v52, %v3637_v53  ;;  %v5100_v2 = vcombine.low %v3641_v54, %v3645_v55  ;;  %v3649_v4 = vrot.slane %v7542_v39, %v6709_v47 }
 0x55d   :  { %v5095_v18 = vrot.slane %v5081_v56, %v6990_v13  ;;  %v5107_v30 = vrot.slane %v5097_v27, %v6990_v13  ;;  %v5114_v0 = vrot.slane %v5098_v57, %v6990_v13  ;;  %v3653_v38 = vrot.slane %v7542_v39, %v6715_v49 }
 0x55e   :  { %v5121_v12 = vrot.slane %v5099_v61, %v6990_v13  ;;  %v5128_v7 = vrot.slane %v5100_v2, %v6990_v13  ;;  %v3657_v14 = vrot.slane %v7542_v39, %v6969_v5  ;;  %v3661_v17 = vrot.slane %v7542_v39, %v6972_v6 }
 0x55f   :  { %v5096_v37 = vcombine.low %v5088_v63, %v5095_v18  ;;  %v5129_v15 = vcombine.low %v5107_v30, %v5114_v0  ;;  %v3665_v16 = vrot.slane %v7542_v39, %v6977_v8  ;;  %v3669_v28 = vrot.slane %v7542_v39, %v6980_v9 }
 0x560   :  { %v5130_v58 = vcombine.low %v5121_v12, %v5128_v7  ;;  %v3673_v19 = vrot.slane %v7542_v39, %v6983_v43  ;;  %v3677_v22 = vrot.slane %v7542_v39, %v6986_v10  ;;  %v5146_v21 = vcombine.low %v3649_v4, %v3653_v38 }
 0x561   :  { %5421 = vperm.xlu0 %6057, %v5096_v37   ;;  %v5137_v24 = vrot.slane %v5129_v15, %v6990_v13  ;;  %v5147_v25 = vcombine.low %v3657_v14, %v3661_v17  ;;  %v5148_v26 = vcombine.low %v3665_v16, %v3669_v28  ;;  %v3681_v29 = vrot.slane %v7566_v1, %v6709_v47 }
 0x562   :  { %v5144_v32 = vrot.slane %v5130_v58, %v6990_v13  ;;  %v5149_v48 = vcombine.low %v3673_v19, %v3677_v22  ;;  %v5156_v33 = vrot.slane %v5146_v21, %v6990_v13  ;;  %v3685_v34 = vrot.slane %v7566_v1, %v6715_v49 }
 0x563   :  { %v5163_v20 = vrot.slane %v5147_v25, %v6990_v13  ;;  %v5170_v39 = vrot.slane %v5148_v26, %v6990_v13  ;;  %v3689_v40 = vrot.slane %v7566_v1, %v6969_v5  ;;  %v3693_v62 = vrot.slane %v7566_v1, %v6972_v6 }
 0x564   :  { %v5145_v59 = vcombine.low %v5137_v24, %v5144_v32  ;;  %v5177_v41 = vrot.slane %v5149_v48, %v6990_v13  ;;  %v3697_v11 = vrot.slane %v7566_v1, %v6977_v8  ;;  %v3701_v42 = vrot.slane %v7566_v1, %v6980_v9 }
 0x565   :  { %v5178_v50 = vcombine.low %v5156_v33, %v5163_v20  ;;  %v3705_v36 = vrot.slane %v7566_v1, %v6983_v43  ;;  %v3709_v44 = vrot.slane %v7566_v1, %v6986_v10  ;;  %v5195_v23 = vcombine.low %v3681_v29, %v3685_v34 }
 0x566   :  { %5424 = vperm.xlu0 %6057, %v5145_v59   ;;  %v5179_v3 = vcombine.low %v5170_v39, %v5177_v41  ;;  %v5196_v51 = vcombine.low %v3689_v40, %v3693_v62  ;;  %v5197_v52 = vcombine.low %v3697_v11, %v3701_v42  ;;  %v3713_v31 = vrot.slane %v7592_v35, %v6709_v47 }
 0x567   :  { %v5186_v53 = vrot.slane %v5178_v50, %v6990_v13  ;;  %v5198_v54 = vcombine.low %v3705_v36, %v3709_v44  ;;  %v5205_v55 = vrot.slane %v5195_v23, %v6990_v13  ;;  %v3717_v56 = vrot.slane %v7592_v35, %v6715_v49  ;;  %v5347_v36 = vpop.permute.xlu1 %5346  ;;  %v5344_v23 = vpop.permute.xlu0 %5343 }
 0x568   :  { %v5193_v27 = vrot.slane %v5179_v3, %v6990_v13  ;;  %v5212_v1 = vrot.slane %v5196_v51, %v6990_v13  ;;  %v5219_v57 = vrot.slane %v5197_v52, %v6990_v13  ;;  %v3721_v63 = vrot.slane %v7592_v35, %v6969_v5 }
 0x569   :  { %v5226_v61 = vrot.slane %v5198_v54, %v6990_v13  ;;  %v3725_v2 = vrot.slane %v7592_v35, %v6972_v6  ;;  %v3729_v4 = vrot.slane %v7592_v35, %v6977_v8  ;;  %v3733_v18 = vrot.slane %v7592_v35, %v6980_v9 }
 0x56a   :  { %v5194_v30 = vcombine.low %v5186_v53, %v5193_v27  ;;  %v5227_v0 = vcombine.low %v5205_v55, %v5212_v1  ;;  %v3737_v38 = vrot.slane %v7592_v35, %v6983_v43  ;;  %v3741_v12 = vrot.slane %v7592_v35, %v6986_v10 }
 0x56b   :  { %v5228_v7 = vcombine.low %v5219_v57, %v5226_v61  ;;  %v5244_v14 = vcombine.low %v3713_v31, %v3717_v56  ;;  %v5245_v17 = vcombine.low %v3721_v63, %v3725_v2  ;;  %v5246_v37 = vcombine.low %v3729_v4, %v3733_v18  ;;  %v5350_v44 = vpop.permute.xlu1 %5349 }
 0x56c   :  { %5427 = vperm.xlu0 %6057, %v5194_v30   ;;  %v5235_v15 = vrot.slane %v5227_v0, %v6990_v13  ;;  %v5247_v16 = vcombine.low %v3737_v38, %v3741_v12  ;;  %v3745_v28 = vrot.slane %v7616_v60, %v6709_v47  ;;  %v3749_v24 = vrot.slane %v7616_v60, %v6715_v49 }
 0x56d   :  { %v5242_v58 = vrot.slane %v5228_v7, %v6990_v13  ;;  %v5254_v19 = vrot.slane %v5244_v14, %v6990_v13  ;;  %v5261_v22 = vrot.slane %v5245_v17, %v6990_v13  ;;  %v5268_v21 = vrot.slane %v5246_v37, %v6990_v13 }
 0x56e   :  { %v5275_v35 = vrot.slane %v5247_v16, %v6990_v13  ;;  %v3753_v25 = vrot.slane %v7616_v60, %v6969_v5  ;;  %v3757_v47 = vrot.slane %v7616_v60, %v6972_v6  ;;  %v3761_v32 = vrot.slane %v7616_v60, %v6977_v8 }
 0x56f   :  { %v5243_v26 = vcombine.low %v5235_v15, %v5242_v58  ;;  %v5276_v29 = vcombine.low %v5254_v19, %v5261_v22  ;;  %v3765_v33 = vrot.slane %v7616_v60, %v6980_v9  ;;  %v3769_v34 = vrot.slane %v7616_v60, %v6983_v43  ;;  %v5353_v3 = vpop.permute.xlu1 %5352 }
 0x570   :  { %v5277_v48 = vcombine.low %v5268_v21, %v5275_v35  ;;  %v3773_v5 = vrot.slane %v7616_v60, %v6986_v10  ;;  %v5293_v20 = vcombine.low %v3745_v28, %v3749_v24  ;;  %v5294_v39 = vcombine.low %v3753_v25, %v3757_v47 }
 0x571   :  { %5430 = vperm.xlu0 %6057, %v5243_v26   ;;  %v5284_v49 = vrot.slane %v5276_v29, %v6990_v13  ;;  %v5295_v40 = vcombine.low %v3761_v32, %v3765_v33  ;;  %v7741_v0 = vand.u32 127, %v1115_v45 }
 0x572   :  { %v5291_v6 = vrot.slane %v5277_v48, %v6990_v13  ;;  %v5296_v62 = vcombine.low %v3769_v34, %v3773_v5  ;;  %v5303_v8 = vrot.slane %v5293_v20, %v6990_v13  ;;  %v5310_v59 = vrot.slane %v5294_v39, %v6990_v13 }
 0x573   :  { %v5317_v41 = vrot.slane %v5295_v40, %v6990_v13  ;;  %v5356_v52 = vpop.permute.xlu1 %5355  ;;  %v5444_v12 = vadd.s32 4294967288, %v7741_v0  ;;  %v5451_v7 = vadd.s32 4294967280, %v7741_v0  ;;  %v5458_v14 = vadd.s32 4294967272, %v7741_v0 }
 0x574   :  { %v5292_v9 = vcombine.low %v5284_v49, %v5291_v6  ;;  %v5324_v43 = vrot.slane %v5296_v62, %v6990_v13  ;;  %v5325_v11 = vcombine.low %v5303_v8, %v5310_v59  ;;  %v5465_v17 = vadd.s32 4294967264, %v7741_v0 }
 0x575   :  { %v5447_v16 = vsub.s32 %v5444_v12, %v6706_v46  ;;  %v5472_v28 = vadd.s32 4294967256, %v7741_v0  ;;  %v5454_v58 = vsub.s32 %v5451_v7, %v6706_v46  ;;  %v5479_v19 = vadd.s32 4294967248, %v7741_v0 }
 0x576   :  { %5433 = vperm.xlu0 %6057, %v5292_v9   ;;  %v5326_v42 = vcombine.low %v5317_v41, %v5324_v43  ;;  %v5333_v10 = vrot.slane %v5325_v11, %v6990_v13  ;;  %v5442_v22 = vsub.s32 %v7741_v0, %v6706_v46  ;;  %v5461_v21 = vsub.s32 %v5458_v14, %v6706_v46 }
 0x577   :  { %v5359_v53 = vpop.permute.xlu1 %5358  ;;  %v5486_v35 = vadd.s32 4294967240, %v7741_v0  ;;  %v7760_v24 = vsub.s32 %v5465_v17, %v6706_v46  ;;  %v5448_v25 = vrot.slane %v5347_v36, %v5447_v16  ;;  %v7763_v26 = vsub.s32 %v5472_v28, %v6706_v46 }
 0x578   :  { %v5340_v60 = vrot.slane %v5326_v42, %v6990_v13  ;;  %v5455_v47 = vrot.slane %v5350_v44, %v5454_v58  ;;  %v7768_v32 = vsub.s32 %v5479_v19, %v6706_v46  ;;  %v5443_v33 = vrot.slane %v5344_v23, %v5442_v22 }
 0x579   :  { %v5462_v34 = vrot.slane %v5353_v3, %v5461_v21  ;;  %v7773_v49 = vsub.s32 %v5486_v35, %v6706_v46  ;;  %v5469_v5 = vrot.slane %v5356_v52, %v7760_v24  ;;  %v5493_v20 = vadd.s32 4294967232, %v7741_v0 }
 0x57a   :  { %v5341_v50 = vcombine.low %v5333_v10, %v5340_v60  ;;  %v5450_v39 = vsel %vm5449_vm1, %v5448_v25, %v5443_v33  ;;  %v5476_v6 = vrot.slane %v5359_v53, %v7763_v26  ;;  %v5500_v8 = vadd.s32 4294967224, %v7741_v0 }
 0x57b   :  { %v5362_v55 = vpop.permute.xlu1 %5361  ;;  %v5457_v40 = vsel %vm5456_vm2, %v5455_v47, %v5450_v39  ;;  %v5496_v11 = vsub.s32 %v5493_v20, %v6706_v46  ;;  %v5507_v42 = vadd.s32 4294967216, %v7741_v0  ;;  %v5514_v52 = vadd.s32 4294967208, %v7741_v0 }
 0x57c   :  { %5436 = vperm.xlu0 %6057, %v5341_v50   ;;  %v5483_v62 = vrot.slane %v5362_v55, %v7768_v32  ;;  %v5464_v59 = vsel %vm5463_vm3, %v5462_v34, %v5457_v40  ;;  %v5503_v44 = vsub.s32 %v5500_v8, %v6706_v46  ;;  %v5521_v7 = vadd.s32 4294967200, %v7741_v0 }
 0x57d   :  { %v5471_v43 = vsel %vm5470_vm4, %v5469_v5, %v5464_v59  ;;  %v5510_v12 = vsub.s32 %v5507_v42, %v6706_v46 }
 0x57e   :  { %v5478_v60 = vsel %vm5477_vm5, %v5476_v6, %v5471_v43 }
 0x57f   :  { %v7722_v27 = vpop.permute.xlu1 %5364  ;;  %v5485_v36 = vsel %vm5484_vm6, %v5483_v62, %v5478_v60 }
 0x580   :  { %v5490_v9 = vrot.slane %v7722_v27, %v7773_v49 }
 0x582   :  { %v5492_v3 = vsel %vm5491_vm7, %v5490_v9, %v5485_v36 }
 0x583   :  { %v7726_v57 = vpop.permute.xlu1 %5367 }
 0x584   :  { %v5497_v27 = vrot.slane %v7726_v57, %v5496_v11 }
 0x587   :  { %v7732_v2 = vpop.permute.xlu1 %5370 }
 0x58b   :  { %v7736_v18 = vpop.permute.xlu1 %5373 }
 0x58f   :  { %v7743_v38 = vpop.permute.xlu1 %5376 }
 0x590   :  { %v7714_v51 = vpop.permute.xlu0 %5391 }
 0x591   :  { %v5552_v53 = vrot.slane %v7714_v51, %v5442_v22  ;;  %v5542_v22 = vadd.s32 4294967176, %v7741_v0 }
 0x595   :  { %v5395_v37 = vpop.permute.xlu1 %5394 }
 0x596   :  { %v5556_v50 = vrot.slane %v5395_v37, %v5447_v16  ;;  %v5528_v37 = vadd.s32 4294967192, %v7741_v0  ;;  %v5535_v16 = vadd.s32 4294967184, %v7741_v0  ;;  %v5511_v0 = vrot.slane %v7736_v18, %v5510_v12 }
 0x598   :  { %v5538_v47 = vsub.s32 %v5535_v16, %v6706_v46 }
 0x59b   :  { %v7770_v48 = vpop.permute.xlu1 %5379 }
 0x5a0   :  { %v7716_v31 = vpop.permute.xlu0 %5397 }
 0x5a1   :  { %v5561_v23 = vrot.slane %v7716_v31, %v5454_v58  ;;  %v5557_v31 = vsel %vm5449_vm1, %v5556_v50, %v5552_v53 }
 0x5a3   :  { %v5562_v57 = vsel %vm5456_vm2, %v5561_v23, %v5557_v31 }
 0x5a6   :  { %v7790_v10 = vpop.permute.xlu1 %5382 }
 0x5ab   :  { %v7718_v54 = vpop.permute.xlu0 %5400 }
 0x5ac   :  { %v5566_v55 = vrot.slane %v7718_v54, %v5461_v21  ;;  %v5504_v54 = vrot.slane %v7732_v2, %v5503_v44 }
 0x5ae   :  { %v5567_v19 = vsel %vm5463_vm3, %v5566_v55, %v5562_v57 }
 0x5b0   :  { %v5386_v28 = vpop.permute.xlu1 %5385 }
 0x5b1   :  { %v5539_v62 = vrot.slane %v5386_v28, %v5538_v47 }
 0x5b6   :  { %v7720_v56 = vpop.permute.xlu0 %5403 }
 0x5b7   :  { %v5571_v14 = vrot.slane %v7720_v56, %v7760_v24  ;;  %v5517_v56 = vsub.s32 %v5514_v52, %v6706_v46  ;;  %v5499_v24 = vsel %vm5498_vm8, %v5497_v27, %v5492_v3 }
 0x5b8   :  { %v5506_v6 = vsel %vm5505_vm9, %v5504_v54, %v5499_v24 }
 0x5b9   :  { %v5572_v2 = vsel %vm5470_vm4, %v5571_v14, %v5567_v19  ;;  %v5518_v34 = vrot.slane %v7743_v38, %v5517_v56 }
 0x5c0   :  { %v7724_v1 = vpop.permute.xlu0 %5406 }
 0x5c1   :  { %v5576_v51 = vrot.slane %v7724_v1, %v7763_v26  ;;  %v5524_v1 = vsub.s32 %v5521_v7, %v6706_v46 }
 0x5c3   :  { %v5577_v25 = vsel %vm5477_vm5, %v5576_v51, %v5572_v2  ;;  %v5525_v20 = vrot.slane %v7770_v48, %v5524_v1 }
 0x5c6   :  { %v7728_v63 = vpop.permute.xlu0 %5409 }
 0x5c7   :  { %v5581_v58 = vrot.slane %v7728_v63, %v7768_v32  ;;  %v5531_v63 = vsub.s32 %v5528_v37, %v6706_v46 }
 0x5cb   :  { %v7730_v61 = vpop.permute.xlu0 %5412 }
 0x5cc   :  { %v5586_v21 = vrot.slane %v7730_v61, %v7773_v49  ;;  %v5582_v61 = vsel %vm5484_vm6, %v5581_v58, %v5577_v25 }
 0x5ce   :  { %v5587_v49 = vsel %vm5491_vm7, %v5586_v21, %v5582_v61 }
 0x5d1   :  { %v7734_v4 = vpop.permute.xlu0 %5415 }
 0x5d2   :  { %v5591_v35 = vrot.slane %v7734_v4, %v5496_v11  ;;  %v5545_v4 = vsub.s32 %v5542_v22, %v6706_v46  ;;  %v5513_v46 = vsel %vm5512_vm10, %v5511_v0, %v5506_v6 }
 0x5d3   :  { %v5520_v48 = vsel %vm5519_vm11, %v5518_v34, %v5513_v46 }
 0x5d4   :  { %v5592_v18 = vsel %vm5498_vm8, %v5591_v35, %v5587_v49 }
 0x5d6   :  { %v7738_v30 = vpop.permute.xlu0 %5418 }
 0x5d7   :  { %v5596_v26 = vrot.slane %v7738_v30, %v5503_v44  ;;  %v5389_v30 = vpop.permute.xlu1 %5388 }
 0x5d8   :  { %v5546_v59 = vrot.slane %v5389_v30, %v5545_v4 }
 0x5d9   :  { %v5597_v38 = vsel %vm5505_vm9, %v5596_v26, %v5592_v18 }
 0x5dc   :  { %v7749_v15 = vpop.permute.xlu0 %5421 }
 0x5dd   :  { %v5601_v32 = vrot.slane %v7749_v15, %v5510_v12  ;;  %v5532_v15 = vrot.slane %v7790_v10, %v5531_v63 }
 0x5e1   :  { %v7765_v29 = vpop.permute.xlu0 %5424 }
 0x5e2   :  { %v5606_v5 = vrot.slane %v7765_v29, %v5517_v56  ;;  %v5602_v29 = vsel %vm5512_vm10, %v5601_v32, %v5597_v38 }
 0x5e4   :  { %v5607_v9 = vsel %vm5519_vm11, %v5606_v5, %v5602_v29 }
 0x5e7   :  { %v7785_v41 = vpop.permute.xlu0 %5427 }
 0x5e8   :  { %v5611_v39 = vrot.slane %v7785_v41, %v5524_v1  ;;  %v5527_v41 = vsel %vm5526_vm12, %v5525_v20, %v5520_v48 }
 0x5e9   :  { %v5534_v42 = vsel %vm5533_vm13, %v5532_v15, %v5527_v41 }
 0x5ea   :  { %v5612_v43 = vsel %vm5526_vm12, %v5611_v39, %v5607_v9  ;;  %v5541_v50 = vsel %vm5540_vm14, %v5539_v62, %v5534_v42 }
 0x5eb   :  { %v5548_v44 = vsel %vm5547_vm15, %v5546_v59, %v5541_v50 }
 0x5ec   :  { %v5431_v17 = vpop.permute.xlu0 %5430 }
 0x5ed   :  { %v5616_v40 = vrot.slane %v5431_v17, %v5531_v63 }
 0x5ef   :  { %v5617_v10 = vsel %vm5533_vm13, %v5616_v40, %v5612_v43 }
 0x5f1   :  { %v5434_v33 = vpop.permute.xlu0 %5433 }
 0x5f2   :  { %v5621_v8 = vrot.slane %v5434_v33, %v5538_v47 }
 0x5f4   :  { %v5622_v36 = vsel %vm5540_vm14, %v5621_v8, %v5617_v10 }
 0x5f7   :  { %v5437_v11 = vpop.permute.xlu0 %5436 }
 0x5f8   :  { %v5626_v60 = vrot.slane %v5437_v11, %v5545_v4 }
 0x5fa   :  { %v5627_v23 = vsel %vm5547_vm15, %v5626_v60, %v5622_v36 }
 0x5fb   :  { %v5628_v3 = vcombine.low %v5548_v44, %v5627_v23 }
 0x5fd   :  { %v5635_v52 = vrot.slane %v5628_v3, %v6990_v13 }
 0x5ff   :  { %v5642_v53 = vrot.slane %v5635_v52, %v6990_v13 }
 0x601   :  { %5648 = vst.msk [vmem:[#allocation13] sm:$0x3] %vm5646_vm0, %v5642_v53 }
 0x602   :  { %6189 = shalt.err (!%p6186_p6)
}
 0x603   :  { %5658 = dma.vmem_to_hbm [thread:$0]  %s5656_s22, 32, %s7863_s9, [#allocation4]  }
 0x604   :  { %6206 = dma.done.wait [#allocation4], 32  }
 0x605   :  { %6207 = vsyncadd [#allocation4], 4294967264 }
 0x606   :  { %5662 = vsyncpa [#allocation3], 1 }
 0x607   :  { %5663 = vsyncpa [#allocation6], 1 }
 0x608   :  { %5664 = vsyncpa [#allocation9], 1 }
 0x609   :  { %5665 = vsyncpa [#allocation12], 1 }
 0x60a   :  { %5666 = vsyncpa [#allocation4], 1 }

</bundles_post_ra>
